<compile_context>
chip_gen: v6e
topology: v6e:2x2x1
jax: 0.10.0
libtpu: 0.0.40
codegen_flags: <defaults>
</compile_context>

<pallas_src>
import math
import functools

import jax
import jax.numpy as jnp
from jax import lax
from jax.experimental import pallas as pl
from jax.experimental.pallas import tpu as pltpu


_NEG_BIG = -1e30                 # finite floor for softmax max (masked-row guard)
_LN_EPS = 1e-5
_VMEM_LIMIT_BYTES = 48 * 1024 * 1024   # > 16/32 MiB defaults, < v7x 64 MiB/TC


def _round_up(x, m):
    return ((x + m - 1) // m) * m


# ----------------------------------------------------------------------------
# In-kernel helpers (operate on traced values, not refs)
# ----------------------------------------------------------------------------

def _layernorm(y, g, b, eps=_LN_EPS):
    mean = jnp.mean(y, axis=-1, keepdims=True)
    var = jnp.mean((y - mean) ** 2, axis=-1, keepdims=True)
    return (y - mean) * lax.rsqrt(var + eps) * g + b


def _causal_bias(lq, lk):
    # Generated in-kernel (no HBM traffic): 0 where key j <= query i, else -inf.
    i = lax.broadcasted_iota(jnp.int32, (lq, lk), 0)
    j = lax.broadcasted_iota(jnp.int32, (lq, lk), 1)
    return jnp.where(j <= i, 0.0, -jnp.inf).astype(jnp.float32)


def _mha(q, k, v, bias, wo, bo, nhead, scale):
    """q:(Lq,d) k/v:(Lk,d) f32, bias:(Lq,Lk) additive (-inf masked),
    wo:(d,d) bf16, bo:(1,d) f32.  Head-batched attention, single out-proj."""
    lq, d = q.shape
    dh = d // nhead

    def split_heads(t):            # (L, d) -> (nhead, L, dh) bf16
        return jnp.stack([t[:, h * dh:(h + 1) * dh] for h in range(nhead)],
                         axis=0).astype(jnp.bfloat16)

    q3, k3, v3 = split_heads(q), split_heads(k), split_heads(v)

    # batched QK^T: (h, Lq, Lk) f32 accumulation on the MXU
    s = jnp.einsum('hqd,hkd->hqk', q3, k3,
                   preferred_element_type=jnp.float32) * scale + bias[None]
    m = jnp.maximum(jnp.max(s, axis=-1, keepdims=True), _NEG_BIG)
    p = jnp.exp(s - m)
    denom = jnp.sum(p, axis=-1, keepdims=True)
    denom = jnp.where(denom > 0.0, denom, 1.0)      # fully-masked row -> 0 out
    p = p * pl.reciprocal(denom, approx=True)

    # batched PV: (h, Lq, dh) f32
    ctx = jnp.einsum('hqk,hkd->hqd', p.astype(jnp.bfloat16), v3,
                     preferred_element_type=jnp.float32)
    # concat heads -> ONE (Lq, d) @ (d, d) out-projection (K = d, fills MXU)
    ctx = jnp.concatenate([ctx[h] for h in range(nhead)], axis=-1)
    return jnp.dot(ctx.astype(jnp.bfloat16), wo,
                   preferred_element_type=jnp.float32) + bo


def _ffn_core(x, w1, b1, w2, b2):
    h = jnp.dot(x.astype(jnp.bfloat16), w1,
                preferred_element_type=jnp.float32) + b1
    h = jnp.maximum(h, 0.0)
    return jnp.dot(h.astype(jnp.bfloat16), w2,
                   preferred_element_type=jnp.float32) + b2


# ----------------------------------------------------------------------------
# Fused Pallas kernels (one per encoder layer / decoder layer / output proj)
# ----------------------------------------------------------------------------

def _encoder_layer_kernel(x_ref, spad_ref,
                          wqkv_ref, bqkv_ref, wo_ref, bo_ref,
                          ln1_g_ref, ln1_b_ref,
                          w1_ref, b1_ref, w2_ref, b2_ref,
                          ln2_g_ref, ln2_b_ref,
                          fin_g_ref, fin_b_ref,
                          o_ref, *, nhead, final_ln):
    xb = x_ref[0]                              # (S, d) bf16
    x = xb.astype(jnp.float32)
    S, d = x.shape
    scale = 1.0 / math.sqrt(d // nhead)
    bias = _causal_bias(S, S) + spad_ref[0]    # (S, S): in-kernel causal + pad

    qkv = jnp.dot(xb, wqkv_ref[...],
                  preferred_element_type=jnp.float32) + bqkv_ref[...]
    q, k, v = qkv[:, :d], qkv[:, d:2 * d], qkv[:, 2 * d:]

    sa = _mha(q, k, v, bias, wo_ref[...], bo_ref[...], nhead, scale)
    x2 = _layernorm(x + sa, ln1_g_ref[...], ln1_b_ref[...])

    ff = _ffn_core(x2, w1_ref[...], b1_ref[...], w2_ref[...], b2_ref[...])
    y = _layernorm(x2 + ff, ln2_g_ref[...], ln2_b_ref[...])
    if final_ln:                               # encoder's final LN fused here
        y = _layernorm(y, fin_g_ref[...], fin_b_ref[...])
    o_ref[0] = y.astype(o_ref.dtype)           # bf16 inter-layer activation


def _decoder_layer_kernel(x_ref, mem_ref, tpad_ref, spad_ref,
                          wqkv_ref, bqkv_ref, wo_ref, bo_ref,
                          ln1_g_ref, ln1_b_ref,
                          wq_ref, bq_ref, wkv_ref, bkv_ref, woc_ref, boc_ref,
                          ln2_g_ref, ln2_b_ref,
                          w1_ref, b1_ref, w2_ref, b2_ref,
                          ln3_g_ref, ln3_b_ref,
                          o_ref, *, nhead):
    xb = x_ref[0]                              # (T, d) bf16
    memb = mem_ref[0]                          # (S, d) bf16
    x = xb.astype(jnp.float32)
    T, d = x.shape
    S = memb.shape[0]
    scale = 1.0 / math.sqrt(d // nhead)
    tbias = _causal_bias(T, T) + tpad_ref[0]   # (T, T)
    mbias = _causal_bias(T, S) + spad_ref[0]   # (T, S) memory mask + src pad

    # --- self attention + LN1 ---
    qkv = jnp.dot(xb, wqkv_ref[...],
                  preferred_element_type=jnp.float32) + bqkv_ref[...]
    q, k, v = qkv[:, :d], qkv[:, d:2 * d], qkv[:, 2 * d:]
    sa = _mha(q, k, v, tbias, wo_ref[...], bo_ref[...], nhead, scale)
    x2 = _layernorm(x + sa, ln1_g_ref[...], ln1_b_ref[...])

    # --- cross attention + LN2 (fused KV projection on memory) ---
    qc = jnp.dot(x2.astype(jnp.bfloat16), wq_ref[...],
                 preferred_element_type=jnp.float32) + bq_ref[...]
    kvc = jnp.dot(memb, wkv_ref[...],
                  preferred_element_type=jnp.float32) + bkv_ref[...]
    kc, vc = kvc[:, :d], kvc[:, d:]
    ca = _mha(qc, kc, vc, mbias, woc_ref[...], boc_ref[...], nhead, scale)
    x3 = _layernorm(x2 + ca, ln2_g_ref[...], ln2_b_ref[...])

    # --- FFN + LN3 ---
    ff = _ffn_core(x3, w1_ref[...], b1_ref[...], w2_ref[...], b2_ref[...])
    o_ref[0] = _layernorm(x3 + ff, ln3_g_ref[...],
                          ln3_b_ref[...]).astype(o_ref.dtype)


def _final_proj_kernel(x_ref, g_ref, b_ref, w_ref, wb_ref, o_ref):
    # final decoder LayerNorm fused as prologue of the vocab projection;
    # the output tile is 128-lane dense (tn multiple of 128).
    x = x_ref[...].astype(jnp.float32)
    y = _layernorm(x, g_ref[...], b_ref[...])
    o_ref[...] = jnp.dot(y.astype(jnp.bfloat16), w_ref[...],
                         preferred_element_type=jnp.float32) + wb_ref[...]


# ----------------------------------------------------------------------------
# Pallas wrappers
# ----------------------------------------------------------------------------

def _rep_spec(shape):
    nd = len(shape)
    return pl.BlockSpec(shape, lambda b, _n=nd: (0,) * _n)


def _batch_spec(shape):
    nd = len(shape)
    return pl.BlockSpec((1,) + tuple(shape[1:]),
                        lambda b, _n=nd: (b,) + (0,) * (_n - 1))


def encoder_layer(x, spad, p, nhead, fin_g, fin_b, final_ln):
    B, S, d = x.shape
    ins = [x, spad,
           p["wqkv"], p["bqkv"], p["wo"], p["bo"],
           p["norm1_g"], p["norm1_b"],
           p["lin1_w"], p["lin1_b"], p["lin2_w"], p["lin2_b"],
           p["norm2_g"], p["norm2_b"],
           fin_g, fin_b]
    in_specs = ([_batch_spec(a.shape) for a in ins[:2]] +
                [_rep_spec(a.shape) for a in ins[2:]])
    return pl.pallas_call(
        functools.partial(_encoder_layer_kernel, nhead=nhead,
                          final_ln=final_ln),
        out_shape=jax.ShapeDtypeStruct((B, S, d), jnp.bfloat16),
        grid=(B,),
        in_specs=in_specs,
        out_specs=_batch_spec((B, S, d)),
        compiler_params=pltpu.CompilerParams(
            dimension_semantics=("parallel",),
            vmem_limit_bytes=_VMEM_LIMIT_BYTES),
    )(*ins)


def decoder_layer(x, mem, tpad, spad, p, nhead):
    B, T, d = x.shape
    ins = [x, mem, tpad, spad,
           p["wqkv"], p["bqkv"], p["wo"], p["bo"],
           p["norm1_g"], p["norm1_b"],
           p["wq"], p["bq"], p["wkv"], p["bkv"], p["woc"], p["boc"],
           p["norm2_g"], p["norm2_b"],
           p["lin1_w"], p["lin1_b"], p["lin2_w"], p["lin2_b"],
           p["norm3_g"], p["norm3_b"]]
    in_specs = ([_batch_spec(a.shape) for a in ins[:4]] +
                [_rep_spec(a.shape) for a in ins[4:]])
    return pl.pallas_call(
        functools.partial(_decoder_layer_kernel, nhead=nhead),
        out_shape=jax.ShapeDtypeStruct((B, T, d), jnp.bfloat16),
        grid=(B,),
        in_specs=in_specs,
        out_specs=_batch_spec((B, T, d)),
        compiler_params=pltpu.CompilerParams(
            dimension_semantics=("parallel",),
            vmem_limit_bytes=_VMEM_LIMIT_BYTES),
    )(*ins)


def final_ln_proj(x, g, b, w, wb, tm=512, tn=1024):
    """x:(M, D) bf16 -> LN -> @ w:(D, N) bf16 + wb.  Tiled over M and N."""
    M, D = x.shape
    N = w.shape[1]
    tm = min(tm, _round_up(M, 16))             # bf16 sublane-aligned row tile
    tn = min(tn, _round_up(N, 128))            # 128-lane-dense vocab tile
    Mp = _round_up(M, tm)
    Np = _round_up(N, tn)
    x_p = jnp.pad(x, ((0, Mp - M), (0, 0))) if Mp != M else x
    w_p = jnp.pad(w, ((0, 0), (0, Np - N))) if Np != N else w
    wb_p = jnp.pad(wb, ((0, 0), (0, Np - N))) if Np != N else wb
    out = pl.pallas_call(
        _final_proj_kernel,
        out_shape=jax.ShapeDtypeStruct((Mp, Np), jnp.float32),
        grid=(Mp // tm, Np // tn),
        in_specs=[pl.BlockSpec((tm, D), lambda i, j: (i, 0)),
                  pl.BlockSpec((1, D), lambda i, j: (0, 0)),
                  pl.BlockSpec((1, D), lambda i, j: (0, 0)),
                  pl.BlockSpec((D, tn), lambda i, j: (0, j)),
                  pl.BlockSpec((1, tn), lambda i, j: (0, j))],
        out_specs=pl.BlockSpec((tm, tn), lambda i, j: (i, j)),
        compiler_params=pltpu.CompilerParams(
            dimension_semantics=("parallel", "parallel"),
            vmem_limit_bytes=_VMEM_LIMIT_BYTES),
    )(x_p, g, b, w_p, wb_p)
    return out[:M, :N]


# ----------------------------------------------------------------------------
# Transformer glue (plain JAX around the fused Pallas kernels)
# ----------------------------------------------------------------------------

def positional_encoding(L, d):
    pos = jnp.arange(L, dtype=jnp.float32)[:, None]
    div = jnp.exp(jnp.arange(0, d, 2, dtype=jnp.float32)
                  * (-math.log(10000.0) / d))
    pe = jnp.zeros((L, d), jnp.float32)
    pe = pe.at[:, 0::2].set(jnp.sin(pos * div))
    pe = pe.at[:, 1::2].set(jnp.cos(pos * div))
    return pe                      # (L, d)


def transformer_forward(params, src, tgt, *, nhead, pad_token):
    S, B = src.shape
    T, _ = tgt.shape
    d = params["src_embed"].shape[1]

    # Only tiny (B, 1, Lk) key-padding additive rows leave HBM; the causal
    # terms are generated with iota inside each layer kernel.
    src_pad = jnp.where((src == pad_token).T, -jnp.inf,
                        0.0).astype(jnp.float32)[:, None, :]   # (B, 1, S)
    tgt_pad = jnp.where((tgt == pad_token).T, -jnp.inf,
                        0.0).astype(jnp.float32)[:, None, :]   # (B, 1, T)

    # embedding * sqrt(d) + positional encoding (dropout = identity), bf16
    scale = math.sqrt(d)
    x = (params["src_embed"][src.T] * scale
         + positional_encoding(S, d)[None]).astype(jnp.bfloat16)
    y = (params["tgt_embed"][tgt.T] * scale
         + positional_encoding(T, d)[None]).astype(jnp.bfloat16)

    # encoder stack; the final encoder LayerNorm is fused into the last layer
    nenc = len(params["enc_layers"])
    for li, lp in enumerate(params["enc_layers"]):
        x = encoder_layer(x, src_pad, lp, nhead,
                          params["enc_norm_g"], params["enc_norm_b"],
                          final_ln=(li == nenc - 1))
    memory = x                                               # (B, S, d) bf16

    # decoder stack (one fused kernel per layer)
    for lp in params["dec_layers"]:
        y = decoder_layer(y, memory, tgt_pad, src_pad, lp, nhead)

    # final decoder LayerNorm fused with the tiled vocab projection
    out = final_ln_proj(y.reshape(B * T, d),
                        params["dec_norm_g"], params["dec_norm_b"],
                        params["out_w"], params["out_b"])     # (B*T, V) f32
    V = params["out_b"].shape[1]
    return out.reshape(B, T, V).transpose(1, 0, 2)            # (T, B, V)


# ----------------------------------------------------------------------------
# Deterministic parameter init (synthetic — shapes from TransformerModel.__init__)
# Weight matrices stored (in_features, out_features) in bf16 (MXU operands);
# biases / LayerNorm params / embeddings stay f32.
# ----------------------------------------------------------------------------

def init_params(key, *, ntokens_src, ntokens_tgt, ninp, dim_feedforward, nlayers):
    keys = iter(jax.random.split(key, 512))

    def w(shape, s=0.05, dtype=jnp.bfloat16):
        return (jax.random.normal(next(keys), shape, jnp.float32) * s).astype(dtype)

    def zeros(shape):
        return jnp.zeros(shape, jnp.float32)

    def ones(shape):
        return jnp.ones(shape, jnp.float32)

    def self_attn(d):
        return {"wqkv": w((d, 3 * d)), "bqkv": zeros((1, 3 * d)),
                "wo": w((d, d)), "bo": zeros((1, d))}

    def cross_attn(d):
        return {"wq": w((d, d)), "bq": zeros((1, d)),
                "wkv": w((d, 2 * d)), "bkv": zeros((1, 2 * d)),
                "woc": w((d, d)), "boc": zeros((1, d))}

    def enc_layer(d, ff):
        p = {"lin1_w": w((d, ff)), "lin1_b": zeros((1, ff)),
             "lin2_w": w((ff, d)), "lin2_b": zeros((1, d)),
             "norm1_g": ones((1, d)), "norm1_b": zeros((1, d)),
             "norm2_g": ones((1, d)), "norm2_b": zeros((1, d))}
        p.update(self_attn(d))
        return p

    def dec_layer(d, ff):
        p = enc_layer(d, ff)
        p.update(cross_attn(d))
        p["norm3_g"] = ones((1, d))
        p["norm3_b"] = zeros((1, d))
        return p

    d, ff = ninp, dim_feedforward
    return {
        "src_embed": w((ntokens_src, d), s=1.0, dtype=jnp.float32),
        "tgt_embed": w((ntokens_tgt, d), s=1.0, dtype=jnp.float32),
        "enc_layers": [enc_layer(d, ff) for _ in range(nlayers)],
        "dec_layers": [dec_layer(d, ff) for _ in range(nlayers)],
        "enc_norm_g": ones((1, d)), "enc_norm_b": zeros((1, d)),
        "dec_norm_g": ones((1, d)), "dec_norm_b": zeros((1, d)),
        "out_w": w((d, ntokens_tgt)),
        "out_b": zeros((1, ntokens_tgt)),
    }


# ----------------------------------------------------------------------------
if __name__ == "__main__":
    ntokens_src, ntokens_tgt = 50, 48
    ninp, nhead, dim_feedforward, nlayers = 32, 2, 64, 2
    pad_token = 0
    S, T, B = 8, 10, 2

    root = jax.random.PRNGKey(0)
    kp, ks, kt = jax.random.split(root, 3)
    params = init_params(kp, ntokens_src=ntokens_src, ntokens_tgt=ntokens_tgt,
                         ninp=ninp, dim_feedforward=dim_feedforward,
                         nlayers=nlayers)

    # tokens in [1, ntokens) so no row is fully padded; plant a couple of pads
    src = jax.random.randint(ks, (S, B), 1, ntokens_src, dtype=jnp.int32)
    tgt = jax.random.randint(kt, (T, B), 1, ntokens_tgt, dtype=jnp.int32)
    src = src.at[S - 1, 0].set(pad_token)
    tgt = tgt.at[T - 1, 1].set(pad_token)

    fwd = jax.jit(functools.partial(transformer_forward,
                                    nhead=nhead, pad_token=pad_token))
    out = fwd(params, src, tgt)
    out = jax.block_until_ready(out)

    assert out.shape == (T, B, ntokens_tgt)
    assert bool(jnp.isfinite(out).all())
    print("KERNEL_OK")
</pallas_src>

<mosaic_0001>
module attributes {stable_mosaic.version = 11 : i64} {
  func.func @_encoder_layer_kernel(%arg0: i32, %arg1: memref<1x8x32xbf16, #tpu.memory_space<vmem>>, %arg2: memref<1x1x8xf32, #tpu.memory_space<vmem>>, %arg3: memref<32x96xbf16, #tpu.memory_space<vmem>>, %arg4: memref<1x96xf32, #tpu.memory_space<vmem>>, %arg5: memref<32x32xbf16, #tpu.memory_space<vmem>>, %arg6: memref<1x32xf32, #tpu.memory_space<vmem>>, %arg7: memref<1x32xf32, #tpu.memory_space<vmem>>, %arg8: memref<1x32xf32, #tpu.memory_space<vmem>>, %arg9: memref<32x64xbf16, #tpu.memory_space<vmem>>, %arg10: memref<1x64xf32, #tpu.memory_space<vmem>>, %arg11: memref<64x32xbf16, #tpu.memory_space<vmem>>, %arg12: memref<1x32xf32, #tpu.memory_space<vmem>>, %arg13: memref<1x32xf32, #tpu.memory_space<vmem>>, %arg14: memref<1x32xf32, #tpu.memory_space<vmem>>, %arg15: memref<1x32xf32, #tpu.memory_space<vmem>>, %arg16: memref<1x32xf32, #tpu.memory_space<vmem>>, %arg17: memref<1x8x32xbf16, #tpu.memory_space<vmem>>) attributes {dimension_semantics = [#tpu.dimension_semantics<parallel>], iteration_bounds = array<i64: 2>, scalar_prefetch = 0 : i64, scratch_operands = 0 : i64, tpu.core_type = #tpu.core_type<tc>, window_params = [{transform_indices = @transform_0, window_bounds = array<i64: 1, 8, 32>}, {transform_indices = @transform_1, window_bounds = array<i64: 1, 1, 8>}, {pipeline_mode = #tpu.pipeline_mode<synchronous>, transform_indices = @transform_2, window_bounds = array<i64: 32, 96>}, {pipeline_mode = #tpu.pipeline_mode<synchronous>, transform_indices = @transform_3, window_bounds = array<i64: 1, 96>}, {pipeline_mode = #tpu.pipeline_mode<synchronous>, transform_indices = @transform_4, window_bounds = array<i64: 32, 32>}, {pipeline_mode = #tpu.pipeline_mode<synchronous>, transform_indices = @transform_5, window_bounds = array<i64: 1, 32>}, {pipeline_mode = #tpu.pipeline_mode<synchronous>, transform_indices = @transform_6, window_bounds = array<i64: 1, 32>}, {pipeline_mode = #tpu.pipeline_mode<synchronous>, transform_indices = @transform_7, window_bounds = array<i64: 1, 32>}, {pipeline_mode = #tpu.pipeline_mode<synchronous>, transform_indices = @transform_8, window_bounds = array<i64: 32, 64>}, {pipeline_mode = #tpu.pipeline_mode<synchronous>, transform_indices = @transform_9, window_bounds = array<i64: 1, 64>}, {pipeline_mode = #tpu.pipeline_mode<synchronous>, transform_indices = @transform_10, window_bounds = array<i64: 64, 32>}, {pipeline_mode = #tpu.pipeline_mode<synchronous>, transform_indices = @transform_11, window_bounds = array<i64: 1, 32>}, {pipeline_mode = #tpu.pipeline_mode<synchronous>, transform_indices = @transform_12, window_bounds = array<i64: 1, 32>}, {pipeline_mode = #tpu.pipeline_mode<synchronous>, transform_indices = @transform_13, window_bounds = array<i64: 1, 32>}, {pipeline_mode = #tpu.pipeline_mode<synchronous>, transform_indices = @transform_14, window_bounds = array<i64: 1, 32>}, {pipeline_mode = #tpu.pipeline_mode<synchronous>, transform_indices = @transform_15, window_bounds = array<i64: 1, 32>}, {transform_indices = @transform_16, window_bounds = array<i64: 1, 8, 32>}]} {
    %c0 = arith.constant 0 : index
    %c0_0 = arith.constant 0 : index
    %c0_1 = arith.constant 0 : index
    %0 = vector.load %arg1[%c0, %c0_0, %c0_1] : memref<1x8x32xbf16, #tpu.memory_space<vmem>>, vector<1x8x32xbf16>
    %1 = vector.shape_cast %0 : vector<1x8x32xbf16> to vector<8x32xbf16>
    %2 = arith.extf %1 : vector<8x32xbf16> to vector<8x32xf32>
    %3 = tpu.iota {dimensions = array<i32: 0>} : vector<8x8xi32>
    %4 = tpu.iota {dimensions = array<i32: 1>} : vector<8x8xi32>
    %5 = arith.cmpi sle, %4, %3 : vector<8x8xi32>
    %cst = arith.constant 0.000000e+00 : f32
    %cst_2 = arith.constant 0xFF800000 : f32
    %6 = vector.broadcast %cst : f32 to vector<8x8xf32>
    %7 = vector.broadcast %cst_2 : f32 to vector<8x8xf32>
    %8 = arith.select %5, %6, %7 : vector<8x8xi1>, vector<8x8xf32>
    %c0_3 = arith.constant 0 : index
    %c0_4 = arith.constant 0 : index
    %c0_5 = arith.constant 0 : index
    %9 = vector.load %arg2[%c0_3, %c0_4, %c0_5] : memref<1x1x8xf32, #tpu.memory_space<vmem>>, vector<1x1x8xf32>
    %10 = vector.shape_cast %9 : vector<1x1x8xf32> to vector<1x8xf32>
    %11 = vector.broadcast %10 : vector<1x8xf32> to vector<8x8xf32>
    %12 = arith.addf %8, %11 : vector<8x8xf32>
    %c0_6 = arith.constant 0 : index
    %c0_7 = arith.constant 0 : index
    %13 = vector.load %arg3[%c0_6, %c0_7] : memref<32x96xbf16, #tpu.memory_space<vmem>>, vector<32x96xbf16>
    %cst_8 = arith.constant dense<0.000000e+00> : vector<8x96xf32>
    %14 = tpu.matmul %1, %13, %cst_8 {dimension_numbers = #tpu.dot_dimension_numbers<[1], [0], [0], [1], [0, 0, 1, 1], [], []>} : vector<8x32xbf16>, vector<32x96xbf16>, vector<8x96xf32> -> vector<8x96xf32>
    %c0_9 = arith.constant 0 : index
    %c0_10 = arith.constant 0 : index
    %15 = vector.load %arg4[%c0_9, %c0_10] : memref<1x96xf32, #tpu.memory_space<vmem>>, vector<1x96xf32>
    %16 = vector.broadcast %15 : vector<1x96xf32> to vector<8x96xf32>
    %17 = arith.addf %14, %16 : vector<8x96xf32>
    %18 = vector.extract_strided_slice %17 {offsets = [0, 0], sizes = [8, 32], strides = [1, 1]} : vector<8x96xf32> to vector<8x32xf32>
    %19 = vector.extract_strided_slice %17 {offsets = [0, 32], sizes = [8, 32], strides = [1, 1]} : vector<8x96xf32> to vector<8x32xf32>
    %20 = vector.extract_strided_slice %17 {offsets = [0, 64], sizes = [8, 32], strides = [1, 1]} : vector<8x96xf32> to vector<8x32xf32>
    %c0_11 = arith.constant 0 : index
    %c0_12 = arith.constant 0 : index
    %21 = vector.load %arg5[%c0_11, %c0_12] : memref<32x32xbf16, #tpu.memory_space<vmem>>, vector<32x32xbf16>
    %c0_13 = arith.constant 0 : index
    %c0_14 = arith.constant 0 : index
    %22 = vector.load %arg6[%c0_13, %c0_14] : memref<1x32xf32, #tpu.memory_space<vmem>>, vector<1x32xf32>
    %23 = vector.extract_strided_slice %18 {offsets = [0, 0], sizes = [8, 16], strides = [1, 1]} : vector<8x32xf32> to vector<8x16xf32>
    %24 = vector.extract_strided_slice %18 {offsets = [0, 16], sizes = [8, 16], strides = [1, 1]} : vector<8x32xf32> to vector<8x16xf32>
    %25 = vector.shape_cast %23 : vector<8x16xf32> to vector<1x8x16xf32>
    %26 = vector.shape_cast %24 : vector<8x16xf32> to vector<1x8x16xf32>
    %27 = tpu.concatenate %25, %26 in 0 : vector<1x8x16xf32>, vector<1x8x16xf32> -> vector<2x8x16xf32>
    %28 = arith.truncf %27 : vector<2x8x16xf32> to vector<2x8x16xbf16>
    %29 = vector.extract_strided_slice %19 {offsets = [0, 0], sizes = [8, 16], strides = [1, 1]} : vector<8x32xf32> to vector<8x16xf32>
    %30 = vector.extract_strided_slice %19 {offsets = [0, 16], sizes = [8, 16], strides = [1, 1]} : vector<8x32xf32> to vector<8x16xf32>
    %31 = vector.shape_cast %29 : vector<8x16xf32> to vector<1x8x16xf32>
    %32 = vector.shape_cast %30 : vector<8x16xf32> to vector<1x8x16xf32>
    %33 = tpu.concatenate %31, %32 in 0 : vector<1x8x16xf32>, vector<1x8x16xf32> -> vector<2x8x16xf32>
    %34 = arith.truncf %33 : vector<2x8x16xf32> to vector<2x8x16xbf16>
    %35 = vector.extract_strided_slice %20 {offsets = [0, 0], sizes = [8, 16], strides = [1, 1]} : vector<8x32xf32> to vector<8x16xf32>
    %36 = vector.extract_strided_slice %20 {offsets = [0, 16], sizes = [8, 16], strides = [1, 1]} : vector<8x32xf32> to vector<8x16xf32>
    %37 = vector.shape_cast %35 : vector<8x16xf32> to vector<1x8x16xf32>
    %38 = vector.shape_cast %36 : vector<8x16xf32> to vector<1x8x16xf32>
    %39 = tpu.concatenate %37, %38 in 0 : vector<1x8x16xf32>, vector<1x8x16xf32> -> vector<2x8x16xf32>
    %40 = arith.truncf %39 : vector<2x8x16xf32> to vector<2x8x16xbf16>
    "tpu.trace_start"() <{level = 10 : i32, message = "hqd,hkd->hqk"}> : () -> ()
    %cst_15 = arith.constant dense<0.000000e+00> : vector<2x8x8xf32>
    %41 = tpu.matmul %28, %34, %cst_15 {dimension_numbers = #tpu.dot_dimension_numbers<[2], [2], [1], [1], [0, 0, 0, 1, 1, 1], [0], [0]>} : vector<2x8x16xbf16>, vector<2x8x16xbf16>, vector<2x8x8xf32> -> vector<2x8x8xf32>
    "tpu.trace_stop"() : () -> ()
    %cst_16 = arith.constant 2.500000e-01 : f32
    %42 = vector.broadcast %cst_16 : f32 to vector<2x8x8xf32>
    %43 = arith.mulf %41, %42 : vector<2x8x8xf32>
    %44 = vector.shape_cast %12 : vector<8x8xf32> to vector<1x8x8xf32>
    %45 = vector.broadcast %44 : vector<1x8x8xf32> to vector<2x8x8xf32>
    %46 = arith.addf %43, %45 : vector<2x8x8xf32>
    %cst_17 = arith.constant dense<0xFF800000> : vector<2x8xf32>
    %47 = vector.multi_reduction <maximumf>, %46, %cst_17 [2] : vector<2x8x8xf32> to vector<2x8xf32>
    %48 = vector.shape_cast %47 : vector<2x8xf32> to vector<2x8x1xf32>
    %cst_18 = arith.constant -1.000000e+30 : f32
    %49 = vector.broadcast %cst_18 : f32 to vector<2x8x1xf32>
    %50 = arith.maximumf %48, %49 : vector<2x8x1xf32>
    %51 = vector.broadcast %50 : vector<2x8x1xf32> to vector<2x8x8xf32>
    %52 = arith.subf %46, %51 : vector<2x8x8xf32>
    %53 = math.exp %52 : vector<2x8x8xf32>
    %cst_19 = arith.constant dense<0.000000e+00> : vector<2x8xf32>
    %54 = vector.multi_reduction <add>, %53, %cst_19 [2] : vector<2x8x8xf32> to vector<2x8xf32>
    %55 = vector.shape_cast %54 : vector<2x8xf32> to vector<2x8x1xf32>
    %cst_20 = arith.constant 0.000000e+00 : f32
    %56 = vector.broadcast %cst_20 : f32 to vector<2x8x1xf32>
    %57 = arith.cmpf ogt, %55, %56 : vector<2x8x1xf32>
    %cst_21 = arith.constant 1.000000e+00 : f32
    %58 = vector.broadcast %cst_21 : f32 to vector<2x8x1xf32>
    %59 = arith.select %57, %55, %58 : vector<2x8x1xi1>, vector<2x8x1xf32>
    %60 = tpu.reciprocal %59 {approx = true} : vector<2x8x1xf32> -> vector<2x8x1xf32>
    %61 = vector.broadcast %60 : vector<2x8x1xf32> to vector<2x8x8xf32>
    %62 = arith.mulf %53, %61 : vector<2x8x8xf32>
    %63 = arith.truncf %62 : vector<2x8x8xf32> to vector<2x8x8xbf16>
    "tpu.trace_start"() <{level = 10 : i32, message = "hqk,hkd->hqd"}> : () -> ()
    %cst_22 = arith.constant dense<0.000000e+00> : vector<2x8x16xf32>
    %64 = tpu.matmul %63, %40, %cst_22 {dimension_numbers = #tpu.dot_dimension_numbers<[2], [1], [1], [2], [0, 0, 0, 1, 1, 2], [0], [0]>} : vector<2x8x8xbf16>, vector<2x8x16xbf16>, vector<2x8x16xf32> -> vector<2x8x16xf32>
    "tpu.trace_stop"() : () -> ()
    %65 = vector.extract_strided_slice %64 {offsets = [0, 0, 0], sizes = [1, 8, 16], strides = [1, 1, 1]} : vector<2x8x16xf32> to vector<1x8x16xf32>
    %66 = vector.shape_cast %65 : vector<1x8x16xf32> to vector<8x16xf32>
    %67 = vector.extract_strided_slice %64 {offsets = [1, 0, 0], sizes = [1, 8, 16], strides = [1, 1, 1]} : vector<2x8x16xf32> to vector<1x8x16xf32>
    %68 = vector.shape_cast %67 : vector<1x8x16xf32> to vector<8x16xf32>
    %69 = tpu.concatenate %66, %68 in 1 : vector<8x16xf32>, vector<8x16xf32> -> vector<8x32xf32>
    %70 = arith.truncf %69 : vector<8x32xf32> to vector<8x32xbf16>
    %cst_23 = arith.constant dense<0.000000e+00> : vector<8x32xf32>
    %71 = tpu.matmul %70, %21, %cst_23 {dimension_numbers = #tpu.dot_dimension_numbers<[1], [0], [0], [1], [0, 0, 1, 1], [], []>} : vector<8x32xbf16>, vector<32x32xbf16>, vector<8x32xf32> -> vector<8x32xf32>
    %72 = vector.broadcast %22 : vector<1x32xf32> to vector<8x32xf32>
    %73 = arith.addf %71, %72 : vector<8x32xf32>
    %74 = arith.addf %2, %73 : vector<8x32xf32>
    %c0_24 = arith.constant 0 : index
    %c0_25 = arith.constant 0 : index
    %75 = vector.load %arg7[%c0_24, %c0_25] : memref<1x32xf32, #tpu.memory_space<vmem>>, vector<1x32xf32>
    %c0_26 = arith.constant 0 : index
    %c0_27 = arith.constant 0 : index
    %76 = vector.load %arg8[%c0_26, %c0_27] : memref<1x32xf32, #tpu.memory_space<vmem>>, vector<1x32xf32>
    %cst_28 = arith.constant dense<0.000000e+00> : vector<8xf32>
    %77 = vector.multi_reduction <add>, %74, %cst_28 [1] : vector<8x32xf32> to vector<8xf32>
    %78 = vector.shape_cast %77 : vector<8xf32> to vector<8x1xf32>
    %cst_29 = arith.constant 3.200000e+01 : f32
    %79 = vector.broadcast %cst_29 : f32 to vector<8x1xf32>
    %80 = arith.divf %78, %79 : vector<8x1xf32>
    %81 = vector.broadcast %80 : vector<8x1xf32> to vector<8x32xf32>
    %82 = arith.subf %74, %81 : vector<8x32xf32>
    %83 = arith.mulf %82, %82 : vector<8x32xf32>
    %cst_30 = arith.constant dense<0.000000e+00> : vector<8xf32>
    %84 = vector.multi_reduction <add>, %83, %cst_30 [1] : vector<8x32xf32> to vector<8xf32>
    %85 = vector.shape_cast %84 : vector<8xf32> to vector<8x1xf32>
    %cst_31 = arith.constant 3.200000e+01 : f32
    %86 = vector.broadcast %cst_31 : f32 to vector<8x1xf32>
    %87 = arith.divf %85, %86 : vector<8x1xf32>
    %88 = vector.broadcast %80 : vector<8x1xf32> to vector<8x32xf32>
    %89 = arith.subf %74, %88 : vector<8x32xf32>
    %cst_32 = arith.constant 9.99999974E-6 : f32
    %90 = vector.broadcast %cst_32 : f32 to vector<8x1xf32>
    %91 = arith.addf %87, %90 : vector<8x1xf32>
    %92 = math.rsqrt %91 : vector<8x1xf32>
    %93 = vector.broadcast %92 : vector<8x1xf32> to vector<8x32xf32>
    %94 = arith.mulf %89, %93 : vector<8x32xf32>
    %95 = vector.broadcast %75 : vector<1x32xf32> to vector<8x32xf32>
    %96 = arith.mulf %94, %95 : vector<8x32xf32>
    %97 = vector.broadcast %76 : vector<1x32xf32> to vector<8x32xf32>
    %98 = arith.addf %96, %97 : vector<8x32xf32>
    %c0_33 = arith.constant 0 : index
    %c0_34 = arith.constant 0 : index
    %99 = vector.load %arg9[%c0_33, %c0_34] : memref<32x64xbf16, #tpu.memory_space<vmem>>, vector<32x64xbf16>
    %c0_35 = arith.constant 0 : index
    %c0_36 = arith.constant 0 : index
    %100 = vector.load %arg10[%c0_35, %c0_36] : memref<1x64xf32, #tpu.memory_space<vmem>>, vector<1x64xf32>
    %c0_37 = arith.constant 0 : index
    %c0_38 = arith.constant 0 : index
    %101 = vector.load %arg11[%c0_37, %c0_38] : memref<64x32xbf16, #tpu.memory_space<vmem>>, vector<64x32xbf16>
    %c0_39 = arith.constant 0 : index
    %c0_40 = arith.constant 0 : index
    %102 = vector.load %arg12[%c0_39, %c0_40] : memref<1x32xf32, #tpu.memory_space<vmem>>, vector<1x32xf32>
    %103 = arith.truncf %98 : vector<8x32xf32> to vector<8x32xbf16>
    %cst_41 = arith.constant dense<0.000000e+00> : vector<8x64xf32>
    %104 = tpu.matmul %103, %99, %cst_41 {dimension_numbers = #tpu.dot_dimension_numbers<[1], [0], [0], [1], [0, 0, 1, 1], [], []>} : vector<8x32xbf16>, vector<32x64xbf16>, vector<8x64xf32> -> vector<8x64xf32>
    %105 = vector.broadcast %100 : vector<1x64xf32> to vector<8x64xf32>
    %106 = arith.addf %104, %105 : vector<8x64xf32>
    %cst_42 = arith.constant 0.000000e+00 : f32
    %107 = vector.broadcast %cst_42 : f32 to vector<8x64xf32>
    %108 = arith.maximumf %106, %107 : vector<8x64xf32>
    %109 = arith.truncf %108 : vector<8x64xf32> to vector<8x64xbf16>
    %cst_43 = arith.constant dense<0.000000e+00> : vector<8x32xf32>
    %110 = tpu.matmul %109, %101, %cst_43 {dimension_numbers = #tpu.dot_dimension_numbers<[1], [0], [0], [1], [0, 0, 1, 1], [], []>} : vector<8x64xbf16>, vector<64x32xbf16>, vector<8x32xf32> -> vector<8x32xf32>
    %111 = vector.broadcast %102 : vector<1x32xf32> to vector<8x32xf32>
    %112 = arith.addf %110, %111 : vector<8x32xf32>
    %113 = arith.addf %98, %112 : vector<8x32xf32>
    %c0_44 = arith.constant 0 : index
    %c0_45 = arith.constant 0 : index
    %114 = vector.load %arg13[%c0_44, %c0_45] : memref<1x32xf32, #tpu.memory_space<vmem>>, vector<1x32xf32>
    %c0_46 = arith.constant 0 : index
    %c0_47 = arith.constant 0 : index
    %115 = vector.load %arg14[%c0_46, %c0_47] : memref<1x32xf32, #tpu.memory_space<vmem>>, vector<1x32xf32>
    %cst_48 = arith.constant dense<0.000000e+00> : vector<8xf32>
    %116 = vector.multi_reduction <add>, %113, %cst_48 [1] : vector<8x32xf32> to vector<8xf32>
    %117 = vector.shape_cast %116 : vector<8xf32> to vector<8x1xf32>
    %cst_49 = arith.constant 3.200000e+01 : f32
    %118 = vector.broadcast %cst_49 : f32 to vector<8x1xf32>
    %119 = arith.divf %117, %118 : vector<8x1xf32>
    %120 = vector.broadcast %119 : vector<8x1xf32> to vector<8x32xf32>
    %121 = arith.subf %113, %120 : vector<8x32xf32>
    %122 = arith.mulf %121, %121 : vector<8x32xf32>
    %cst_50 = arith.constant dense<0.000000e+00> : vector<8xf32>
    %123 = vector.multi_reduction <add>, %122, %cst_50 [1] : vector<8x32xf32> to vector<8xf32>
    %124 = vector.shape_cast %123 : vector<8xf32> to vector<8x1xf32>
    %cst_51 = arith.constant 3.200000e+01 : f32
    %125 = vector.broadcast %cst_51 : f32 to vector<8x1xf32>
    %126 = arith.divf %124, %125 : vector<8x1xf32>
    %127 = vector.broadcast %119 : vector<8x1xf32> to vector<8x32xf32>
    %128 = arith.subf %113, %127 : vector<8x32xf32>
    %cst_52 = arith.constant 9.99999974E-6 : f32
    %129 = vector.broadcast %cst_52 : f32 to vector<8x1xf32>
    %130 = arith.addf %126, %129 : vector<8x1xf32>
    %131 = math.rsqrt %130 : vector<8x1xf32>
    %132 = vector.broadcast %131 : vector<8x1xf32> to vector<8x32xf32>
    %133 = arith.mulf %128, %132 : vector<8x32xf32>
    %134 = vector.broadcast %114 : vector<1x32xf32> to vector<8x32xf32>
    %135 = arith.mulf %133, %134 : vector<8x32xf32>
    %136 = vector.broadcast %115 : vector<1x32xf32> to vector<8x32xf32>
    %137 = arith.addf %135, %136 : vector<8x32xf32>
    %138 = arith.truncf %137 : vector<8x32xf32> to vector<8x32xbf16>
    %c0_53 = arith.constant 0 : index
    %c0_54 = arith.constant 0 : index
    %c0_55 = arith.constant 0 : index
    %139 = vector.load %arg17[%c0_53, %c0_54, %c0_55] : memref<1x8x32xbf16, #tpu.memory_space<vmem>>, vector<1x8x32xbf16>
    %140 = vector.shape_cast %139 : vector<1x8x32xbf16> to vector<8x32xbf16>
    %141 = vector.shape_cast %138 : vector<8x32xbf16> to vector<1x8x32xbf16>
    tpu.vector_store %arg17[%c0_53, %c0_54, %c0_55], %141 {strides = array<i32>} : memref<1x8x32xbf16, #tpu.memory_space<vmem>>, vector<1x8x32xbf16>,
    return
  }
  func.func @transform_0(%arg0: i32) -> (i32, i32, i32) {
    %c0_i32 = arith.constant 0 : i32
    %c0_i32_0 = arith.constant 0 : i32
    %c0_i32_1 = arith.constant 0 : i32
    return %arg0, %c0_i32, %c0_i32_0 : i32, i32, i32
  }
  func.func @transform_1(%arg0: i32) -> (i32, i32, i32) {
    %c0_i32 = arith.constant 0 : i32
    %c0_i32_0 = arith.constant 0 : i32
    %c0_i32_1 = arith.constant 0 : i32
    return %arg0, %c0_i32, %c0_i32_0 : i32, i32, i32
  }
  func.func @transform_2(%arg0: i32) -> (i32, i32) {
    %c0_i32 = arith.constant 0 : i32
    %c0_i32_0 = arith.constant 0 : i32
    %c0_i32_1 = arith.constant 0 : i32
    return %c0_i32, %c0_i32_0 : i32, i32
  }
  func.func @transform_3(%arg0: i32) -> (i32, i32) {
    %c0_i32 = arith.constant 0 : i32
    %c0_i32_0 = arith.constant 0 : i32
    %c0_i32_1 = arith.constant 0 : i32
    return %c0_i32, %c0_i32_0 : i32, i32
  }
  func.func @transform_4(%arg0: i32) -> (i32, i32) {
    %c0_i32 = arith.constant 0 : i32
    %c0_i32_0 = arith.constant 0 : i32
    %c0_i32_1 = arith.constant 0 : i32
    return %c0_i32, %c0_i32_0 : i32, i32
  }
  func.func @transform_5(%arg0: i32) -> (i32, i32) {
    %c0_i32 = arith.constant 0 : i32
    %c0_i32_0 = arith.constant 0 : i32
    %c0_i32_1 = arith.constant 0 : i32
    return %c0_i32, %c0_i32_0 : i32, i32
  }
  func.func @transform_6(%arg0: i32) -> (i32, i32) {
    %c0_i32 = arith.constant 0 : i32
    %c0_i32_0 = arith.constant 0 : i32
    %c0_i32_1 = arith.constant 0 : i32
    return %c0_i32, %c0_i32_0 : i32, i32
  }
  func.func @transform_7(%arg0: i32) -> (i32, i32) {
    %c0_i32 = arith.constant 0 : i32
    %c0_i32_0 = arith.constant 0 : i32
    %c0_i32_1 = arith.constant 0 : i32
    return %c0_i32, %c0_i32_0 : i32, i32
  }
  func.func @transform_8(%arg0: i32) -> (i32, i32) {
    %c0_i32 = arith.constant 0 : i32
    %c0_i32_0 = arith.constant 0 : i32
    %c0_i32_1 = arith.constant 0 : i32
    return %c0_i32, %c0_i32_0 : i32, i32
  }
  func.func @transform_9(%arg0: i32) -> (i32, i32) {
    %c0_i32 = arith.constant 0 : i32
    %c0_i32_0 = arith.constant 0 : i32
    %c0_i32_1 = arith.constant 0 : i32
    return %c0_i32, %c0_i32_0 : i32, i32
  }
  func.func @transform_10(%arg0: i32) -> (i32, i32) {
    %c0_i32 = arith.constant 0 : i32
    %c0_i32_0 = arith.constant 0 : i32
    %c0_i32_1 = arith.constant 0 : i32
    return %c0_i32, %c0_i32_0 : i32, i32
  }
  func.func @transform_11(%arg0: i32) -> (i32, i32) {
    %c0_i32 = arith.constant 0 : i32
    %c0_i32_0 = arith.constant 0 : i32
    %c0_i32_1 = arith.constant 0 : i32
    return %c0_i32, %c0_i32_0 : i32, i32
  }
  func.func @transform_12(%arg0: i32) -> (i32, i32) {
    %c0_i32 = arith.constant 0 : i32
    %c0_i32_0 = arith.constant 0 : i32
    %c0_i32_1 = arith.constant 0 : i32
    return %c0_i32, %c0_i32_0 : i32, i32
  }
  func.func @transform_13(%arg0: i32) -> (i32, i32) {
    %c0_i32 = arith.constant 0 : i32
    %c0_i32_0 = arith.constant 0 : i32
    %c0_i32_1 = arith.constant 0 : i32
    return %c0_i32, %c0_i32_0 : i32, i32
  }
  func.func @transform_14(%arg0: i32) -> (i32, i32) {
    %c0_i32 = arith.constant 0 : i32
    %c0_i32_0 = arith.constant 0 : i32
    %c0_i32_1 = arith.constant 0 : i32
    return %c0_i32, %c0_i32_0 : i32, i32
  }
  func.func @transform_15(%arg0: i32) -> (i32, i32) {
    %c0_i32 = arith.constant 0 : i32
    %c0_i32_0 = arith.constant 0 : i32
    %c0_i32_1 = arith.constant 0 : i32
    return %c0_i32, %c0_i32_0 : i32, i32
  }
  func.func @transform_16(%arg0: i32) -> (i32, i32, i32) {
    %c0_i32 = arith.constant 0 : i32
    %c0_i32_0 = arith.constant 0 : i32
    %c0_i32_1 = arith.constant 0 : i32
    return %arg0, %c0_i32, %c0_i32_0 : i32, i32, i32
  }
}

module attributes {stable_mosaic.version = 11 : i64} {
  func.func @_encoder_layer_kernel(%arg0: i32, %arg1: memref<1x8x32xbf16, #tpu.memory_space<vmem>>, %arg2: memref<1x1x8xf32, #tpu.memory_space<vmem>>, %arg3: memref<32x96xbf16, #tpu.memory_space<vmem>>, %arg4: memref<1x96xf32, #tpu.memory_space<vmem>>, %arg5: memref<32x32xbf16, #tpu.memory_space<vmem>>, %arg6: memref<1x32xf32, #tpu.memory_space<vmem>>, %arg7: memref<1x32xf32, #tpu.memory_space<vmem>>, %arg8: memref<1x32xf32, #tpu.memory_space<vmem>>, %arg9: memref<32x64xbf16, #tpu.memory_space<vmem>>, %arg10: memref<1x64xf32, #tpu.memory_space<vmem>>, %arg11: memref<64x32xbf16, #tpu.memory_space<vmem>>, %arg12: memref<1x32xf32, #tpu.memory_space<vmem>>, %arg13: memref<1x32xf32, #tpu.memory_space<vmem>>, %arg14: memref<1x32xf32, #tpu.memory_space<vmem>>, %arg15: memref<1x32xf32, #tpu.memory_space<vmem>>, %arg16: memref<1x32xf32, #tpu.memory_space<vmem>>, %arg17: memref<1x8x32xbf16, #tpu.memory_space<vmem>>) attributes {dimension_semantics = [#tpu.dimension_semantics<parallel>], iteration_bounds = array<i64: 2>, scalar_prefetch = 0 : i64, scratch_operands = 0 : i64, tpu.core_type = #tpu.core_type<tc>, window_params = [{transform_indices = @transform_0, window_bounds = array<i64: 1, 8, 32>}, {transform_indices = @transform_1, window_bounds = array<i64: 1, 1, 8>}, {pipeline_mode = #tpu.pipeline_mode<synchronous>, transform_indices = @transform_2, window_bounds = array<i64: 32, 96>}, {pipeline_mode = #tpu.pipeline_mode<synchronous>, transform_indices = @transform_3, window_bounds = array<i64: 1, 96>}, {pipeline_mode = #tpu.pipeline_mode<synchronous>, transform_indices = @transform_4, window_bounds = array<i64: 32, 32>}, {pipeline_mode = #tpu.pipeline_mode<synchronous>, transform_indices = @transform_5, window_bounds = array<i64: 1, 32>}, {pipeline_mode = #tpu.pipeline_mode<synchronous>, transform_indices = @transform_6, window_bounds = array<i64: 1, 32>}, {pipeline_mode = #tpu.pipeline_mode<synchronous>, transform_indices = @transform_7, window_bounds = array<i64: 1, 32>}, {pipeline_mode = #tpu.pipeline_mode<synchronous>, transform_indices = @transform_8, window_bounds = array<i64: 32, 64>}, {pipeline_mode = #tpu.pipeline_mode<synchronous>, transform_indices = @transform_9, window_bounds = array<i64: 1, 64>}, {pipeline_mode = #tpu.pipeline_mode<synchronous>, transform_indices = @transform_10, window_bounds = array<i64: 64, 32>}, {pipeline_mode = #tpu.pipeline_mode<synchronous>, transform_indices = @transform_11, window_bounds = array<i64: 1, 32>}, {pipeline_mode = #tpu.pipeline_mode<synchronous>, transform_indices = @transform_12, window_bounds = array<i64: 1, 32>}, {pipeline_mode = #tpu.pipeline_mode<synchronous>, transform_indices = @transform_13, window_bounds = array<i64: 1, 32>}, {pipeline_mode = #tpu.pipeline_mode<synchronous>, transform_indices = @transform_14, window_bounds = array<i64: 1, 32>}, {pipeline_mode = #tpu.pipeline_mode<synchronous>, transform_indices = @transform_15, window_bounds = array<i64: 1, 32>}, {transform_indices = @transform_16, window_bounds = array<i64: 1, 8, 32>}]} {
    %c0 = arith.constant 0 : index
    %c0_0 = arith.constant 0 : index
    %c0_1 = arith.constant 0 : index
    %0 = vector.load %arg1[%c0, %c0_0, %c0_1] : memref<1x8x32xbf16, #tpu.memory_space<vmem>>, vector<1x8x32xbf16>
    %1 = vector.shape_cast %0 : vector<1x8x32xbf16> to vector<8x32xbf16>
    %2 = arith.extf %1 : vector<8x32xbf16> to vector<8x32xf32>
    %3 = tpu.iota {dimensions = array<i32: 0>} : vector<8x8xi32>
    %4 = tpu.iota {dimensions = array<i32: 1>} : vector<8x8xi32>
    %5 = arith.cmpi sle, %4, %3 : vector<8x8xi32>
    %cst = arith.constant 0.000000e+00 : f32
    %cst_2 = arith.constant 0xFF800000 : f32
    %6 = vector.broadcast %cst : f32 to vector<8x8xf32>
    %7 = vector.broadcast %cst_2 : f32 to vector<8x8xf32>
    %8 = arith.select %5, %6, %7 : vector<8x8xi1>, vector<8x8xf32>
    %c0_3 = arith.constant 0 : index
    %c0_4 = arith.constant 0 : index
    %c0_5 = arith.constant 0 : index
    %9 = vector.load %arg2[%c0_3, %c0_4, %c0_5] : memref<1x1x8xf32, #tpu.memory_space<vmem>>, vector<1x1x8xf32>
    %10 = vector.shape_cast %9 : vector<1x1x8xf32> to vector<1x8xf32>
    %11 = vector.broadcast %10 : vector<1x8xf32> to vector<8x8xf32>
    %12 = arith.addf %8, %11 : vector<8x8xf32>
    %c0_6 = arith.constant 0 : index
    %c0_7 = arith.constant 0 : index
    %13 = vector.load %arg3[%c0_6, %c0_7] : memref<32x96xbf16, #tpu.memory_space<vmem>>, vector<32x96xbf16>
    %cst_8 = arith.constant dense<0.000000e+00> : vector<8x96xf32>
    %14 = tpu.matmul %1, %13, %cst_8 {dimension_numbers = #tpu.dot_dimension_numbers<[1], [0], [0], [1], [0, 0, 1, 1], [], []>} : vector<8x32xbf16>, vector<32x96xbf16>, vector<8x96xf32> -> vector<8x96xf32>
    %c0_9 = arith.constant 0 : index
    %c0_10 = arith.constant 0 : index
    %15 = vector.load %arg4[%c0_9, %c0_10] : memref<1x96xf32, #tpu.memory_space<vmem>>, vector<1x96xf32>
    %16 = vector.broadcast %15 : vector<1x96xf32> to vector<8x96xf32>
    %17 = arith.addf %14, %16 : vector<8x96xf32>
    %18 = vector.extract_strided_slice %17 {offsets = [0, 0], sizes = [8, 32], strides = [1, 1]} : vector<8x96xf32> to vector<8x32xf32>
    %19 = vector.extract_strided_slice %17 {offsets = [0, 32], sizes = [8, 32], strides = [1, 1]} : vector<8x96xf32> to vector<8x32xf32>
    %20 = vector.extract_strided_slice %17 {offsets = [0, 64], sizes = [8, 32], strides = [1, 1]} : vector<8x96xf32> to vector<8x32xf32>
    %c0_11 = arith.constant 0 : index
    %c0_12 = arith.constant 0 : index
    %21 = vector.load %arg5[%c0_11, %c0_12] : memref<32x32xbf16, #tpu.memory_space<vmem>>, vector<32x32xbf16>
    %c0_13 = arith.constant 0 : index
    %c0_14 = arith.constant 0 : index
    %22 = vector.load %arg6[%c0_13, %c0_14] : memref<1x32xf32, #tpu.memory_space<vmem>>, vector<1x32xf32>
    %23 = vector.extract_strided_slice %18 {offsets = [0, 0], sizes = [8, 16], strides = [1, 1]} : vector<8x32xf32> to vector<8x16xf32>
    %24 = vector.extract_strided_slice %18 {offsets = [0, 16], sizes = [8, 16], strides = [1, 1]} : vector<8x32xf32> to vector<8x16xf32>
    %25 = vector.shape_cast %23 : vector<8x16xf32> to vector<1x8x16xf32>
    %26 = vector.shape_cast %24 : vector<8x16xf32> to vector<1x8x16xf32>
    %27 = tpu.concatenate %25, %26 in 0 : vector<1x8x16xf32>, vector<1x8x16xf32> -> vector<2x8x16xf32>
    %28 = arith.truncf %27 : vector<2x8x16xf32> to vector<2x8x16xbf16>
    %29 = vector.extract_strided_slice %19 {offsets = [0, 0], sizes = [8, 16], strides = [1, 1]} : vector<8x32xf32> to vector<8x16xf32>
    %30 = vector.extract_strided_slice %19 {offsets = [0, 16], sizes = [8, 16], strides = [1, 1]} : vector<8x32xf32> to vector<8x16xf32>
    %31 = vector.shape_cast %29 : vector<8x16xf32> to vector<1x8x16xf32>
    %32 = vector.shape_cast %30 : vector<8x16xf32> to vector<1x8x16xf32>
    %33 = tpu.concatenate %31, %32 in 0 : vector<1x8x16xf32>, vector<1x8x16xf32> -> vector<2x8x16xf32>
    %34 = arith.truncf %33 : vector<2x8x16xf32> to vector<2x8x16xbf16>
    %35 = vector.extract_strided_slice %20 {offsets = [0, 0], sizes = [8, 16], strides = [1, 1]} : vector<8x32xf32> to vector<8x16xf32>
    %36 = vector.extract_strided_slice %20 {offsets = [0, 16], sizes = [8, 16], strides = [1, 1]} : vector<8x32xf32> to vector<8x16xf32>
    %37 = vector.shape_cast %35 : vector<8x16xf32> to vector<1x8x16xf32>
    %38 = vector.shape_cast %36 : vector<8x16xf32> to vector<1x8x16xf32>
    %39 = tpu.concatenate %37, %38 in 0 : vector<1x8x16xf32>, vector<1x8x16xf32> -> vector<2x8x16xf32>
    %40 = arith.truncf %39 : vector<2x8x16xf32> to vector<2x8x16xbf16>
    "tpu.trace_start"() <{level = 10 : i32, message = "hqd,hkd->hqk"}> : () -> ()
    %cst_15 = arith.constant dense<0.000000e+00> : vector<2x8x8xf32>
    %41 = tpu.matmul %28, %34, %cst_15 {dimension_numbers = #tpu.dot_dimension_numbers<[2], [2], [1], [1], [0, 0, 0, 1, 1, 1], [0], [0]>} : vector<2x8x16xbf16>, vector<2x8x16xbf16>, vector<2x8x8xf32> -> vector<2x8x8xf32>
    "tpu.trace_stop"() : () -> ()
    %cst_16 = arith.constant 2.500000e-01 : f32
    %42 = vector.broadcast %cst_16 : f32 to vector<2x8x8xf32>
    %43 = arith.mulf %41, %42 : vector<2x8x8xf32>
    %44 = vector.shape_cast %12 : vector<8x8xf32> to vector<1x8x8xf32>
    %45 = vector.broadcast %44 : vector<1x8x8xf32> to vector<2x8x8xf32>
    %46 = arith.addf %43, %45 : vector<2x8x8xf32>
    %cst_17 = arith.constant dense<0xFF800000> : vector<2x8xf32>
    %47 = vector.multi_reduction <maximumf>, %46, %cst_17 [2] : vector<2x8x8xf32> to vector<2x8xf32>
    %48 = vector.shape_cast %47 : vector<2x8xf32> to vector<2x8x1xf32>
    %cst_18 = arith.constant -1.000000e+30 : f32
    %49 = vector.broadcast %cst_18 : f32 to vector<2x8x1xf32>
    %50 = arith.maximumf %48, %49 : vector<2x8x1xf32>
    %51 = vector.broadcast %50 : vector<2x8x1xf32> to vector<2x8x8xf32>
    %52 = arith.subf %46, %51 : vector<2x8x8xf32>
    %53 = math.exp %52 : vector<2x8x8xf32>
    %cst_19 = arith.constant dense<0.000000e+00> : vector<2x8xf32>
    %54 = vector.multi_reduction <add>, %53, %cst_19 [2] : vector<2x8x8xf32> to vector<2x8xf32>
    %55 = vector.shape_cast %54 : vector<2x8xf32> to vector<2x8x1xf32>
    %cst_20 = arith.constant 0.000000e+00 : f32
    %56 = vector.broadcast %cst_20 : f32 to vector<2x8x1xf32>
    %57 = arith.cmpf ogt, %55, %56 : vector<2x8x1xf32>
    %cst_21 = arith.constant 1.000000e+00 : f32
    %58 = vector.broadcast %cst_21 : f32 to vector<2x8x1xf32>
    %59 = arith.select %57, %55, %58 : vector<2x8x1xi1>, vector<2x8x1xf32>
    %60 = tpu.reciprocal %59 {approx = true} : vector<2x8x1xf32> -> vector<2x8x1xf32>
    %61 = vector.broadcast %60 : vector<2x8x1xf32> to vector<2x8x8xf32>
    %62 = arith.mulf %53, %61 : vector<2x8x8xf32>
    %63 = arith.truncf %62 : vector<2x8x8xf32> to vector<2x8x8xbf16>
    "tpu.trace_start"() <{level = 10 : i32, message = "hqk,hkd->hqd"}> : () -> ()
    %cst_22 = arith.constant dense<0.000000e+00> : vector<2x8x16xf32>
    %64 = tpu.matmul %63, %40, %cst_22 {dimension_numbers = #tpu.dot_dimension_numbers<[2], [1], [1], [2], [0, 0, 0, 1, 1, 2], [0], [0]>} : vector<2x8x8xbf16>, vector<2x8x16xbf16>, vector<2x8x16xf32> -> vector<2x8x16xf32>
    "tpu.trace_stop"() : () -> ()
    %65 = vector.extract_strided_slice %64 {offsets = [0, 0, 0], sizes = [1, 8, 16], strides = [1, 1, 1]} : vector<2x8x16xf32> to vector<1x8x16xf32>
    %66 = vector.shape_cast %65 : vector<1x8x16xf32> to vector<8x16xf32>
    %67 = vector.extract_strided_slice %64 {offsets = [1, 0, 0], sizes = [1, 8, 16], strides = [1, 1, 1]} : vector<2x8x16xf32> to vector<1x8x16xf32>
    %68 = vector.shape_cast %67 : vector<1x8x16xf32> to vector<8x16xf32>
    %69 = tpu.concatenate %66, %68 in 1 : vector<8x16xf32>, vector<8x16xf32> -> vector<8x32xf32>
    %70 = arith.truncf %69 : vector<8x32xf32> to vector<8x32xbf16>
    %cst_23 = arith.constant dense<0.000000e+00> : vector<8x32xf32>
    %71 = tpu.matmul %70, %21, %cst_23 {dimension_numbers = #tpu.dot_dimension_numbers<[1], [0], [0], [1], [0, 0, 1, 1], [], []>} : vector<8x32xbf16>, vector<32x32xbf16>, vector<8x32xf32> -> vector<8x32xf32>
    %72 = vector.broadcast %22 : vector<1x32xf32> to vector<8x32xf32>
    %73 = arith.addf %71, %72 : vector<8x32xf32>
    %74 = arith.addf %2, %73 : vector<8x32xf32>
    %c0_24 = arith.constant 0 : index
    %c0_25 = arith.constant 0 : index
    %75 = vector.load %arg7[%c0_24, %c0_25] : memref<1x32xf32, #tpu.memory_space<vmem>>, vector<1x32xf32>
    %c0_26 = arith.constant 0 : index
    %c0_27 = arith.constant 0 : index
    %76 = vector.load %arg8[%c0_26, %c0_27] : memref<1x32xf32, #tpu.memory_space<vmem>>, vector<1x32xf32>
    %cst_28 = arith.constant dense<0.000000e+00> : vector<8xf32>
    %77 = vector.multi_reduction <add>, %74, %cst_28 [1] : vector<8x32xf32> to vector<8xf32>
    %78 = vector.shape_cast %77 : vector<8xf32> to vector<8x1xf32>
    %cst_29 = arith.constant 3.200000e+01 : f32
    %79 = vector.broadcast %cst_29 : f32 to vector<8x1xf32>
    %80 = arith.divf %78, %79 : vector<8x1xf32>
    %81 = vector.broadcast %80 : vector<8x1xf32> to vector<8x32xf32>
    %82 = arith.subf %74, %81 : vector<8x32xf32>
    %83 = arith.mulf %82, %82 : vector<8x32xf32>
    %cst_30 = arith.constant dense<0.000000e+00> : vector<8xf32>
    %84 = vector.multi_reduction <add>, %83, %cst_30 [1] : vector<8x32xf32> to vector<8xf32>
    %85 = vector.shape_cast %84 : vector<8xf32> to vector<8x1xf32>
    %cst_31 = arith.constant 3.200000e+01 : f32
    %86 = vector.broadcast %cst_31 : f32 to vector<8x1xf32>
    %87 = arith.divf %85, %86 : vector<8x1xf32>
    %88 = vector.broadcast %80 : vector<8x1xf32> to vector<8x32xf32>
    %89 = arith.subf %74, %88 : vector<8x32xf32>
    %cst_32 = arith.constant 9.99999974E-6 : f32
    %90 = vector.broadcast %cst_32 : f32 to vector<8x1xf32>
    %91 = arith.addf %87, %90 : vector<8x1xf32>
    %92 = math.rsqrt %91 : vector<8x1xf32>
    %93 = vector.broadcast %92 : vector<8x1xf32> to vector<8x32xf32>
    %94 = arith.mulf %89, %93 : vector<8x32xf32>
    %95 = vector.broadcast %75 : vector<1x32xf32> to vector<8x32xf32>
    %96 = arith.mulf %94, %95 : vector<8x32xf32>
    %97 = vector.broadcast %76 : vector<1x32xf32> to vector<8x32xf32>
    %98 = arith.addf %96, %97 : vector<8x32xf32>
    %c0_33 = arith.constant 0 : index
    %c0_34 = arith.constant 0 : index
    %99 = vector.load %arg9[%c0_33, %c0_34] : memref<32x64xbf16, #tpu.memory_space<vmem>>, vector<32x64xbf16>
    %c0_35 = arith.constant 0 : index
    %c0_36 = arith.constant 0 : index
    %100 = vector.load %arg10[%c0_35, %c0_36] : memref<1x64xf32, #tpu.memory_space<vmem>>, vector<1x64xf32>
    %c0_37 = arith.constant 0 : index
    %c0_38 = arith.constant 0 : index
    %101 = vector.load %arg11[%c0_37, %c0_38] : memref<64x32xbf16, #tpu.memory_space<vmem>>, vector<64x32xbf16>
    %c0_39 = arith.constant 0 : index
    %c0_40 = arith.constant 0 : index
    %102 = vector.load %arg12[%c0_39, %c0_40] : memref<1x32xf32, #tpu.memory_space<vmem>>, vector<1x32xf32>
    %103 = arith.truncf %98 : vector<8x32xf32> to vector<8x32xbf16>
    %cst_41 = arith.constant dense<0.000000e+00> : vector<8x64xf32>
    %104 = tpu.matmul %103, %99, %cst_41 {dimension_numbers = #tpu.dot_dimension_numbers<[1], [0], [0], [1], [0, 0, 1, 1], [], []>} : vector<8x32xbf16>, vector<32x64xbf16>, vector<8x64xf32> -> vector<8x64xf32>
    %105 = vector.broadcast %100 : vector<1x64xf32> to vector<8x64xf32>
    %106 = arith.addf %104, %105 : vector<8x64xf32>
    %cst_42 = arith.constant 0.000000e+00 : f32
    %107 = vector.broadcast %cst_42 : f32 to vector<8x64xf32>
    %108 = arith.maximumf %106, %107 : vector<8x64xf32>
    %109 = arith.truncf %108 : vector<8x64xf32> to vector<8x64xbf16>
    %cst_43 = arith.constant dense<0.000000e+00> : vector<8x32xf32>
    %110 = tpu.matmul %109, %101, %cst_43 {dimension_numbers = #tpu.dot_dimension_numbers<[1], [0], [0], [1], [0, 0, 1, 1], [], []>} : vector<8x64xbf16>, vector<64x32xbf16>, vector<8x32xf32> -> vector<8x32xf32>
    %111 = vector.broadcast %102 : vector<1x32xf32> to vector<8x32xf32>
    %112 = arith.addf %110, %111 : vector<8x32xf32>
    %113 = arith.addf %98, %112 : vector<8x32xf32>
    %c0_44 = arith.constant 0 : index
    %c0_45 = arith.constant 0 : index
    %114 = vector.load %arg13[%c0_44, %c0_45] : memref<1x32xf32, #tpu.memory_space<vmem>>, vector<1x32xf32>
    %c0_46 = arith.constant 0 : index
    %c0_47 = arith.constant 0 : index
    %115 = vector.load %arg14[%c0_46, %c0_47] : memref<1x32xf32, #tpu.memory_space<vmem>>, vector<1x32xf32>
    %cst_48 = arith.constant dense<0.000000e+00> : vector<8xf32>
    %116 = vector.multi_reduction <add>, %113, %cst_48 [1] : vector<8x32xf32> to vector<8xf32>
    %117 = vector.shape_cast %116 : vector<8xf32> to vector<8x1xf32>
    %cst_49 = arith.constant 3.200000e+01 : f32
    %118 = vector.broadcast %cst_49 : f32 to vector<8x1xf32>
    %119 = arith.divf %117, %118 : vector<8x1xf32>
    %120 = vector.broadcast %119 : vector<8x1xf32> to vector<8x32xf32>
    %121 = arith.subf %113, %120 : vector<8x32xf32>
    %122 = arith.mulf %121, %121 : vector<8x32xf32>
    %cst_50 = arith.constant dense<0.000000e+00> : vector<8xf32>
    %123 = vector.multi_reduction <add>, %122, %cst_50 [1] : vector<8x32xf32> to vector<8xf32>
    %124 = vector.shape_cast %123 : vector<8xf32> to vector<8x1xf32>
    %cst_51 = arith.constant 3.200000e+01 : f32
    %125 = vector.broadcast %cst_51 : f32 to vector<8x1xf32>
    %126 = arith.divf %124, %125 : vector<8x1xf32>
    %127 = vector.broadcast %119 : vector<8x1xf32> to vector<8x32xf32>
    %128 = arith.subf %113, %127 : vector<8x32xf32>
    %cst_52 = arith.constant 9.99999974E-6 : f32
    %129 = vector.broadcast %cst_52 : f32 to vector<8x1xf32>
    %130 = arith.addf %126, %129 : vector<8x1xf32>
    %131 = math.rsqrt %130 : vector<8x1xf32>
    %132 = vector.broadcast %131 : vector<8x1xf32> to vector<8x32xf32>
    %133 = arith.mulf %128, %132 : vector<8x32xf32>
    %134 = vector.broadcast %114 : vector<1x32xf32> to vector<8x32xf32>
    %135 = arith.mulf %133, %134 : vector<8x32xf32>
    %136 = vector.broadcast %115 : vector<1x32xf32> to vector<8x32xf32>
    %137 = arith.addf %135, %136 : vector<8x32xf32>
    %c0_53 = arith.constant 0 : index
    %c0_54 = arith.constant 0 : index
    %138 = vector.load %arg15[%c0_53, %c0_54] : memref<1x32xf32, #tpu.memory_space<vmem>>, vector<1x32xf32>
    %c0_55 = arith.constant 0 : index
    %c0_56 = arith.constant 0 : index
    %139 = vector.load %arg16[%c0_55, %c0_56] : memref<1x32xf32, #tpu.memory_space<vmem>>, vector<1x32xf32>
    %cst_57 = arith.constant dense<0.000000e+00> : vector<8xf32>
    %140 = vector.multi_reduction <add>, %137, %cst_57 [1] : vector<8x32xf32> to vector<8xf32>
    %141 = vector.shape_cast %140 : vector<8xf32> to vector<8x1xf32>
    %cst_58 = arith.constant 3.200000e+01 : f32
    %142 = vector.broadcast %cst_58 : f32 to vector<8x1xf32>
    %143 = arith.divf %141, %142 : vector<8x1xf32>
    %144 = vector.broadcast %143 : vector<8x1xf32> to vector<8x32xf32>
    %145 = arith.subf %137, %144 : vector<8x32xf32>
    %146 = arith.mulf %145, %145 : vector<8x32xf32>
    %cst_59 = arith.constant dense<0.000000e+00> : vector<8xf32>
    %147 = vector.multi_reduction <add>, %146, %cst_59 [1] : vector<8x32xf32> to vector<8xf32>
    %148 = vector.shape_cast %147 : vector<8xf32> to vector<8x1xf32>
    %cst_60 = arith.constant 3.200000e+01 : f32
    %149 = vector.broadcast %cst_60 : f32 to vector<8x1xf32>
    %150 = arith.divf %148, %149 : vector<8x1xf32>
    %151 = vector.broadcast %143 : vector<8x1xf32> to vector<8x32xf32>
    %152 = arith.subf %137, %151 : vector<8x32xf32>
    %cst_61 = arith.constant 9.99999974E-6 : f32
    %153 = vector.broadcast %cst_61 : f32 to vector<8x1xf32>
    %154 = arith.addf %150, %153 : vector<8x1xf32>
    %155 = math.rsqrt %154 : vector<8x1xf32>
    %156 = vector.broadcast %155 : vector<8x1xf32> to vector<8x32xf32>
    %157 = arith.mulf %152, %156 : vector<8x32xf32>
    %158 = vector.broadcast %138 : vector<1x32xf32> to vector<8x32xf32>
    %159 = arith.mulf %157, %158 : vector<8x32xf32>
    %160 = vector.broadcast %139 : vector<1x32xf32> to vector<8x32xf32>
    %161 = arith.addf %159, %160 : vector<8x32xf32>
    %162 = arith.truncf %161 : vector<8x32xf32> to vector<8x32xbf16>
    %c0_62 = arith.constant 0 : index
    %c0_63 = arith.constant 0 : index
    %c0_64 = arith.constant 0 : index
    %163 = vector.load %arg17[%c0_62, %c0_63, %c0_64] : memref<1x8x32xbf16, #tpu.memory_space<vmem>>, vector<1x8x32xbf16>
    %164 = vector.shape_cast %163 : vector<1x8x32xbf16> to vector<8x32xbf16>
    %165 = vector.shape_cast %162 : vector<8x32xbf16> to vector<1x8x32xbf16>
    tpu.vector_store %arg17[%c0_62, %c0_63, %c0_64], %165 {strides = array<i32>} : memref<1x8x32xbf16, #tpu.memory_space<vmem>>, vector<1x8x32xbf16>,
    return
  }
  func.func @transform_0(%arg0: i32) -> (i32, i32, i32) {
    %c0_i32 = arith.constant 0 : i32
    %c0_i32_0 = arith.constant 0 : i32
    %c0_i32_1 = arith.constant 0 : i32
    return %arg0, %c0_i32, %c0_i32_0 : i32, i32, i32
  }
  func.func @transform_1(%arg0: i32) -> (i32, i32, i32) {
    %c0_i32 = arith.constant 0 : i32
    %c0_i32_0 = arith.constant 0 : i32
    %c0_i32_1 = arith.constant 0 : i32
    return %arg0, %c0_i32, %c0_i32_0 : i32, i32, i32
  }
  func.func @transform_2(%arg0: i32) -> (i32, i32) {
    %c0_i32 = arith.constant 0 : i32
    %c0_i32_0 = arith.constant 0 : i32
    %c0_i32_1 = arith.constant 0 : i32
    return %c0_i32, %c0_i32_0 : i32, i32
  }
  func.func @transform_3(%arg0: i32) -> (i32, i32) {
    %c0_i32 = arith.constant 0 : i32
    %c0_i32_0 = arith.constant 0 : i32
    %c0_i32_1 = arith.constant 0 : i32
    return %c0_i32, %c0_i32_0 : i32, i32
  }
  func.func @transform_4(%arg0: i32) -> (i32, i32) {
    %c0_i32 = arith.constant 0 : i32
    %c0_i32_0 = arith.constant 0 : i32
    %c0_i32_1 = arith.constant 0 : i32
    return %c0_i32, %c0_i32_0 : i32, i32
  }
  func.func @transform_5(%arg0: i32) -> (i32, i32) {
    %c0_i32 = arith.constant 0 : i32
    %c0_i32_0 = arith.constant 0 : i32
    %c0_i32_1 = arith.constant 0 : i32
    return %c0_i32, %c0_i32_0 : i32, i32
  }
  func.func @transform_6(%arg0: i32) -> (i32, i32) {
    %c0_i32 = arith.constant 0 : i32
    %c0_i32_0 = arith.constant 0 : i32
    %c0_i32_1 = arith.constant 0 : i32
    return %c0_i32, %c0_i32_0 : i32, i32
  }
  func.func @transform_7(%arg0: i32) -> (i32, i32) {
    %c0_i32 = arith.constant 0 : i32
    %c0_i32_0 = arith.constant 0 : i32
    %c0_i32_1 = arith.constant 0 : i32
    return %c0_i32, %c0_i32_0 : i32, i32
  }
  func.func @transform_8(%arg0: i32) -> (i32, i32) {
    %c0_i32 = arith.constant 0 : i32
    %c0_i32_0 = arith.constant 0 : i32
    %c0_i32_1 = arith.constant 0 : i32
    return %c0_i32, %c0_i32_0 : i32, i32
  }
  func.func @transform_9(%arg0: i32) -> (i32, i32) {
    %c0_i32 = arith.constant 0 : i32
    %c0_i32_0 = arith.constant 0 : i32
    %c0_i32_1 = arith.constant 0 : i32
    return %c0_i32, %c0_i32_0 : i32, i32
  }
  func.func @transform_10(%arg0: i32) -> (i32, i32) {
    %c0_i32 = arith.constant 0 : i32
    %c0_i32_0 = arith.constant 0 : i32
    %c0_i32_1 = arith.constant 0 : i32
    return %c0_i32, %c0_i32_0 : i32, i32
  }
  func.func @transform_11(%arg0: i32) -> (i32, i32) {
    %c0_i32 = arith.constant 0 : i32
    %c0_i32_0 = arith.constant 0 : i32
    %c0_i32_1 = arith.constant 0 : i32
    return %c0_i32, %c0_i32_0 : i32, i32
  }
  func.func @transform_12(%arg0: i32) -> (i32, i32) {
    %c0_i32 = arith.constant 0 : i32
    %c0_i32_0 = arith.constant 0 : i32
    %c0_i32_1 = arith.constant 0 : i32
    return %c0_i32, %c0_i32_0 : i32, i32
  }
  func.func @transform_13(%arg0: i32) -> (i32, i32) {
    %c0_i32 = arith.constant 0 : i32
    %c0_i32_0 = arith.constant 0 : i32
    %c0_i32_1 = arith.constant 0 : i32
    return %c0_i32, %c0_i32_0 : i32, i32
  }
  func.func @transform_14(%arg0: i32) -> (i32, i32) {
    %c0_i32 = arith.constant 0 : i32
    %c0_i32_0 = arith.constant 0 : i32
    %c0_i32_1 = arith.constant 0 : i32
    return %c0_i32, %c0_i32_0 : i32, i32
  }
  func.func @transform_15(%arg0: i32) -> (i32, i32) {
    %c0_i32 = arith.constant 0 : i32
    %c0_i32_0 = arith.constant 0 : i32
    %c0_i32_1 = arith.constant 0 : i32
    return %c0_i32, %c0_i32_0 : i32, i32
  }
  func.func @transform_16(%arg0: i32) -> (i32, i32, i32) {
    %c0_i32 = arith.constant 0 : i32
    %c0_i32_0 = arith.constant 0 : i32
    %c0_i32_1 = arith.constant 0 : i32
    return %arg0, %c0_i32, %c0_i32_0 : i32, i32, i32
  }
}

module attributes {stable_mosaic.version = 11 : i64} {
  func.func @_decoder_layer_kernel(%arg0: i32, %arg1: memref<1x10x32xbf16, #tpu.memory_space<vmem>>, %arg2: memref<1x8x32xbf16, #tpu.memory_space<vmem>>, %arg3: memref<1x1x10xf32, #tpu.memory_space<vmem>>, %arg4: memref<1x1x8xf32, #tpu.memory_space<vmem>>, %arg5: memref<32x96xbf16, #tpu.memory_space<vmem>>, %arg6: memref<1x96xf32, #tpu.memory_space<vmem>>, %arg7: memref<32x32xbf16, #tpu.memory_space<vmem>>, %arg8: memref<1x32xf32, #tpu.memory_space<vmem>>, %arg9: memref<1x32xf32, #tpu.memory_space<vmem>>, %arg10: memref<1x32xf32, #tpu.memory_space<vmem>>, %arg11: memref<32x32xbf16, #tpu.memory_space<vmem>>, %arg12: memref<1x32xf32, #tpu.memory_space<vmem>>, %arg13: memref<32x64xbf16, #tpu.memory_space<vmem>>, %arg14: memref<1x64xf32, #tpu.memory_space<vmem>>, %arg15: memref<32x32xbf16, #tpu.memory_space<vmem>>, %arg16: memref<1x32xf32, #tpu.memory_space<vmem>>, %arg17: memref<1x32xf32, #tpu.memory_space<vmem>>, %arg18: memref<1x32xf32, #tpu.memory_space<vmem>>, %arg19: memref<32x64xbf16, #tpu.memory_space<vmem>>, %arg20: memref<1x64xf32, #tpu.memory_space<vmem>>, %arg21: memref<64x32xbf16, #tpu.memory_space<vmem>>, %arg22: memref<1x32xf32, #tpu.memory_space<vmem>>, %arg23: memref<1x32xf32, #tpu.memory_space<vmem>>, %arg24: memref<1x32xf32, #tpu.memory_space<vmem>>, %arg25: memref<1x10x32xbf16, #tpu.memory_space<vmem>>) attributes {dimension_semantics = [#tpu.dimension_semantics<parallel>], iteration_bounds = array<i64: 2>, scalar_prefetch = 0 : i64, scratch_operands = 0 : i64, tpu.core_type = #tpu.core_type<tc>, window_params = [{transform_indices = @transform_0, window_bounds = array<i64: 1, 10, 32>}, {transform_indices = @transform_1, window_bounds = array<i64: 1, 8, 32>}, {transform_indices = @transform_2, window_bounds = array<i64: 1, 1, 10>}, {transform_indices = @transform_3, window_bounds = array<i64: 1, 1, 8>}, {pipeline_mode = #tpu.pipeline_mode<synchronous>, transform_indices = @transform_4, window_bounds = array<i64: 32, 96>}, {pipeline_mode = #tpu.pipeline_mode<synchronous>, transform_indices = @transform_5, window_bounds = array<i64: 1, 96>}, {pipeline_mode = #tpu.pipeline_mode<synchronous>, transform_indices = @transform_6, window_bounds = array<i64: 32, 32>}, {pipeline_mode = #tpu.pipeline_mode<synchronous>, transform_indices = @transform_7, window_bounds = array<i64: 1, 32>}, {pipeline_mode = #tpu.pipeline_mode<synchronous>, transform_indices = @transform_8, window_bounds = array<i64: 1, 32>}, {pipeline_mode = #tpu.pipeline_mode<synchronous>, transform_indices = @transform_9, window_bounds = array<i64: 1, 32>}, {pipeline_mode = #tpu.pipeline_mode<synchronous>, transform_indices = @transform_10, window_bounds = array<i64: 32, 32>}, {pipeline_mode = #tpu.pipeline_mode<synchronous>, transform_indices = @transform_11, window_bounds = array<i64: 1, 32>}, {pipeline_mode = #tpu.pipeline_mode<synchronous>, transform_indices = @transform_12, window_bounds = array<i64: 32, 64>}, {pipeline_mode = #tpu.pipeline_mode<synchronous>, transform_indices = @transform_13, window_bounds = array<i64: 1, 64>}, {pipeline_mode = #tpu.pipeline_mode<synchronous>, transform_indices = @transform_14, window_bounds = array<i64: 32, 32>}, {pipeline_mode = #tpu.pipeline_mode<synchronous>, transform_indices = @transform_15, window_bounds = array<i64: 1, 32>}, {pipeline_mode = #tpu.pipeline_mode<synchronous>, transform_indices = @transform_16, window_bounds = array<i64: 1, 32>}, {pipeline_mode = #tpu.pipeline_mode<synchronous>, transform_indices = @transform_17, window_bounds = array<i64: 1, 32>}, {pipeline_mode = #tpu.pipeline_mode<synchronous>, transform_indices = @transform_18, window_bounds = array<i64: 32, 64>}, {pipeline_mode = #tpu.pipeline_mode<synchronous>, transform_indices = @transform_19, window_bounds = array<i64: 1, 64>}, {pipeline_mode = #tpu.pipeline_mode<synchronous>, transform_indices = @transform_20, window_bounds = array<i64: 64, 32>}, {pipeline_mode = #tpu.pipeline_mode<synchronous>, transform_indices = @transform_21, window_bounds = array<i64: 1, 32>}, {pipeline_mode = #tpu.pipeline_mode<synchronous>, transform_indices = @transform_22, window_bounds = array<i64: 1, 32>}, {pipeline_mode = #tpu.pipeline_mode<synchronous>, transform_indices = @transform_23, window_bounds = array<i64: 1, 32>}, {transform_indices = @transform_24, window_bounds = array<i64: 1, 10, 32>}]} {
    %c0 = arith.constant 0 : index
    %c0_0 = arith.constant 0 : index
    %c0_1 = arith.constant 0 : index
    %0 = vector.load %arg1[%c0, %c0_0, %c0_1] : memref<1x10x32xbf16, #tpu.memory_space<vmem>>, vector<1x10x32xbf16>
    %1 = vector.shape_cast %0 : vector<1x10x32xbf16> to vector<10x32xbf16>
    %c0_2 = arith.constant 0 : index
    %c0_3 = arith.constant 0 : index
    %c0_4 = arith.constant 0 : index
    %2 = vector.load %arg2[%c0_2, %c0_3, %c0_4] : memref<1x8x32xbf16, #tpu.memory_space<vmem>>, vector<1x8x32xbf16>
    %3 = vector.shape_cast %2 : vector<1x8x32xbf16> to vector<8x32xbf16>
    %4 = arith.extf %1 : vector<10x32xbf16> to vector<10x32xf32>
    %5 = tpu.iota {dimensions = array<i32: 0>} : vector<10x10xi32>
    %6 = tpu.iota {dimensions = array<i32: 1>} : vector<10x10xi32>
    %7 = arith.cmpi sle, %6, %5 : vector<10x10xi32>
    %cst = arith.constant 0.000000e+00 : f32
    %cst_5 = arith.constant 0xFF800000 : f32
    %8 = vector.broadcast %cst : f32 to vector<10x10xf32>
    %9 = vector.broadcast %cst_5 : f32 to vector<10x10xf32>
    %10 = arith.select %7, %8, %9 : vector<10x10xi1>, vector<10x10xf32>
    %c0_6 = arith.constant 0 : index
    %c0_7 = arith.constant 0 : index
    %c0_8 = arith.constant 0 : index
    %11 = vector.load %arg3[%c0_6, %c0_7, %c0_8] : memref<1x1x10xf32, #tpu.memory_space<vmem>>, vector<1x1x10xf32>
    %12 = vector.shape_cast %11 : vector<1x1x10xf32> to vector<1x10xf32>
    %13 = vector.broadcast %12 : vector<1x10xf32> to vector<10x10xf32>
    %14 = arith.addf %10, %13 : vector<10x10xf32>
    %15 = tpu.iota {dimensions = array<i32: 0>} : vector<10x8xi32>
    %16 = tpu.iota {dimensions = array<i32: 1>} : vector<10x8xi32>
    %17 = arith.cmpi sle, %16, %15 : vector<10x8xi32>
    %cst_9 = arith.constant 0.000000e+00 : f32
    %cst_10 = arith.constant 0xFF800000 : f32
    %18 = vector.broadcast %cst_9 : f32 to vector<10x8xf32>
    %19 = vector.broadcast %cst_10 : f32 to vector<10x8xf32>
    %20 = arith.select %17, %18, %19 : vector<10x8xi1>, vector<10x8xf32>
    %c0_11 = arith.constant 0 : index
    %c0_12 = arith.constant 0 : index
    %c0_13 = arith.constant 0 : index
    %21 = vector.load %arg4[%c0_11, %c0_12, %c0_13] : memref<1x1x8xf32, #tpu.memory_space<vmem>>, vector<1x1x8xf32>
    %22 = vector.shape_cast %21 : vector<1x1x8xf32> to vector<1x8xf32>
    %23 = vector.broadcast %22 : vector<1x8xf32> to vector<10x8xf32>
    %24 = arith.addf %20, %23 : vector<10x8xf32>
    %c0_14 = arith.constant 0 : index
    %c0_15 = arith.constant 0 : index
    %25 = vector.load %arg5[%c0_14, %c0_15] : memref<32x96xbf16, #tpu.memory_space<vmem>>, vector<32x96xbf16>
    %cst_16 = arith.constant dense<0.000000e+00> : vector<10x96xf32>
    %26 = tpu.matmul %1, %25, %cst_16 {dimension_numbers = #tpu.dot_dimension_numbers<[1], [0], [0], [1], [0, 0, 1, 1], [], []>} : vector<10x32xbf16>, vector<32x96xbf16>, vector<10x96xf32> -> vector<10x96xf32>
    %c0_17 = arith.constant 0 : index
    %c0_18 = arith.constant 0 : index
    %27 = vector.load %arg6[%c0_17, %c0_18] : memref<1x96xf32, #tpu.memory_space<vmem>>, vector<1x96xf32>
    %28 = vector.broadcast %27 : vector<1x96xf32> to vector<10x96xf32>
    %29 = arith.addf %26, %28 : vector<10x96xf32>
    %30 = vector.extract_strided_slice %29 {offsets = [0, 0], sizes = [10, 32], strides = [1, 1]} : vector<10x96xf32> to vector<10x32xf32>
    %31 = vector.extract_strided_slice %29 {offsets = [0, 32], sizes = [10, 32], strides = [1, 1]} : vector<10x96xf32> to vector<10x32xf32>
    %32 = vector.extract_strided_slice %29 {offsets = [0, 64], sizes = [10, 32], strides = [1, 1]} : vector<10x96xf32> to vector<10x32xf32>
    %c0_19 = arith.constant 0 : index
    %c0_20 = arith.constant 0 : index
    %33 = vector.load %arg7[%c0_19, %c0_20] : memref<32x32xbf16, #tpu.memory_space<vmem>>, vector<32x32xbf16>
    %c0_21 = arith.constant 0 : index
    %c0_22 = arith.constant 0 : index
    %34 = vector.load %arg8[%c0_21, %c0_22] : memref<1x32xf32, #tpu.memory_space<vmem>>, vector<1x32xf32>
    %35 = vector.extract_strided_slice %30 {offsets = [0, 0], sizes = [10, 16], strides = [1, 1]} : vector<10x32xf32> to vector<10x16xf32>
    %36 = vector.extract_strided_slice %30 {offsets = [0, 16], sizes = [10, 16], strides = [1, 1]} : vector<10x32xf32> to vector<10x16xf32>
    %37 = vector.shape_cast %35 : vector<10x16xf32> to vector<1x10x16xf32>
    %38 = vector.shape_cast %36 : vector<10x16xf32> to vector<1x10x16xf32>
    %39 = tpu.concatenate %37, %38 in 0 : vector<1x10x16xf32>, vector<1x10x16xf32> -> vector<2x10x16xf32>
    %40 = arith.truncf %39 : vector<2x10x16xf32> to vector<2x10x16xbf16>
    %41 = vector.extract_strided_slice %31 {offsets = [0, 0], sizes = [10, 16], strides = [1, 1]} : vector<10x32xf32> to vector<10x16xf32>
    %42 = vector.extract_strided_slice %31 {offsets = [0, 16], sizes = [10, 16], strides = [1, 1]} : vector<10x32xf32> to vector<10x16xf32>
    %43 = vector.shape_cast %41 : vector<10x16xf32> to vector<1x10x16xf32>
    %44 = vector.shape_cast %42 : vector<10x16xf32> to vector<1x10x16xf32>
    %45 = tpu.concatenate %43, %44 in 0 : vector<1x10x16xf32>, vector<1x10x16xf32> -> vector<2x10x16xf32>
    %46 = arith.truncf %45 : vector<2x10x16xf32> to vector<2x10x16xbf16>
    %47 = vector.extract_strided_slice %32 {offsets = [0, 0], sizes = [10, 16], strides = [1, 1]} : vector<10x32xf32> to vector<10x16xf32>
    %48 = vector.extract_strided_slice %32 {offsets = [0, 16], sizes = [10, 16], strides = [1, 1]} : vector<10x32xf32> to vector<10x16xf32>
    %49 = vector.shape_cast %47 : vector<10x16xf32> to vector<1x10x16xf32>
    %50 = vector.shape_cast %48 : vector<10x16xf32> to vector<1x10x16xf32>
    %51 = tpu.concatenate %49, %50 in 0 : vector<1x10x16xf32>, vector<1x10x16xf32> -> vector<2x10x16xf32>
    %52 = arith.truncf %51 : vector<2x10x16xf32> to vector<2x10x16xbf16>
    "tpu.trace_start"() <{level = 10 : i32, message = "hqd,hkd->hqk"}> : () -> ()
    %cst_23 = arith.constant dense<0.000000e+00> : vector<2x10x10xf32>
    %53 = tpu.matmul %40, %46, %cst_23 {dimension_numbers = #tpu.dot_dimension_numbers<[2], [2], [1], [1], [0, 0, 0, 1, 1, 1], [0], [0]>} : vector<2x10x16xbf16>, vector<2x10x16xbf16>, vector<2x10x10xf32> -> vector<2x10x10xf32>
    "tpu.trace_stop"() : () -> ()
    %cst_24 = arith.constant 2.500000e-01 : f32
    %54 = vector.broadcast %cst_24 : f32 to vector<2x10x10xf32>
    %55 = arith.mulf %53, %54 : vector<2x10x10xf32>
    %56 = vector.shape_cast %14 : vector<10x10xf32> to vector<1x10x10xf32>
    %57 = vector.broadcast %56 : vector<1x10x10xf32> to vector<2x10x10xf32>
    %58 = arith.addf %55, %57 : vector<2x10x10xf32>
    %cst_25 = arith.constant dense<0xFF800000> : vector<2x10xf32>
    %59 = vector.multi_reduction <maximumf>, %58, %cst_25 [2] : vector<2x10x10xf32> to vector<2x10xf32>
    %60 = vector.shape_cast %59 : vector<2x10xf32> to vector<2x10x1xf32>
    %cst_26 = arith.constant -1.000000e+30 : f32
    %61 = vector.broadcast %cst_26 : f32 to vector<2x10x1xf32>
    %62 = arith.maximumf %60, %61 : vector<2x10x1xf32>
    %63 = vector.broadcast %62 : vector<2x10x1xf32> to vector<2x10x10xf32>
    %64 = arith.subf %58, %63 : vector<2x10x10xf32>
    %65 = math.exp %64 : vector<2x10x10xf32>
    %cst_27 = arith.constant dense<0.000000e+00> : vector<2x10xf32>
    %66 = vector.multi_reduction <add>, %65, %cst_27 [2] : vector<2x10x10xf32> to vector<2x10xf32>
    %67 = vector.shape_cast %66 : vector<2x10xf32> to vector<2x10x1xf32>
    %cst_28 = arith.constant 0.000000e+00 : f32
    %68 = vector.broadcast %cst_28 : f32 to vector<2x10x1xf32>
    %69 = arith.cmpf ogt, %67, %68 : vector<2x10x1xf32>
    %cst_29 = arith.constant 1.000000e+00 : f32
    %70 = vector.broadcast %cst_29 : f32 to vector<2x10x1xf32>
    %71 = arith.select %69, %67, %70 : vector<2x10x1xi1>, vector<2x10x1xf32>
    %72 = tpu.reciprocal %71 {approx = true} : vector<2x10x1xf32> -> vector<2x10x1xf32>
    %73 = vector.broadcast %72 : vector<2x10x1xf32> to vector<2x10x10xf32>
    %74 = arith.mulf %65, %73 : vector<2x10x10xf32>
    %75 = arith.truncf %74 : vector<2x10x10xf32> to vector<2x10x10xbf16>
    "tpu.trace_start"() <{level = 10 : i32, message = "hqk,hkd->hqd"}> : () -> ()
    %cst_30 = arith.constant dense<0.000000e+00> : vector<2x10x16xf32>
    %76 = tpu.matmul %75, %52, %cst_30 {dimension_numbers = #tpu.dot_dimension_numbers<[2], [1], [1], [2], [0, 0, 0, 1, 1, 2], [0], [0]>} : vector<2x10x10xbf16>, vector<2x10x16xbf16>, vector<2x10x16xf32> -> vector<2x10x16xf32>
    "tpu.trace_stop"() : () -> ()
    %77 = vector.extract_strided_slice %76 {offsets = [0, 0, 0], sizes = [1, 10, 16], strides = [1, 1, 1]} : vector<2x10x16xf32> to vector<1x10x16xf32>
    %78 = vector.shape_cast %77 : vector<1x10x16xf32> to vector<10x16xf32>
    %79 = vector.extract_strided_slice %76 {offsets = [1, 0, 0], sizes = [1, 10, 16], strides = [1, 1, 1]} : vector<2x10x16xf32> to vector<1x10x16xf32>
    %80 = vector.shape_cast %79 : vector<1x10x16xf32> to vector<10x16xf32>
    %81 = tpu.concatenate %78, %80 in 1 : vector<10x16xf32>, vector<10x16xf32> -> vector<10x32xf32>
    %82 = arith.truncf %81 : vector<10x32xf32> to vector<10x32xbf16>
    %cst_31 = arith.constant dense<0.000000e+00> : vector<10x32xf32>
    %83 = tpu.matmul %82, %33, %cst_31 {dimension_numbers = #tpu.dot_dimension_numbers<[1], [0], [0], [1], [0, 0, 1, 1], [], []>} : vector<10x32xbf16>, vector<32x32xbf16>, vector<10x32xf32> -> vector<10x32xf32>
    %84 = vector.broadcast %34 : vector<1x32xf32> to vector<10x32xf32>
    %85 = arith.addf %83, %84 : vector<10x32xf32>
    %86 = arith.addf %4, %85 : vector<10x32xf32>
    %c0_32 = arith.constant 0 : index
    %c0_33 = arith.constant 0 : index
    %87 = vector.load %arg9[%c0_32, %c0_33] : memref<1x32xf32, #tpu.memory_space<vmem>>, vector<1x32xf32>
    %c0_34 = arith.constant 0 : index
    %c0_35 = arith.constant 0 : index
    %88 = vector.load %arg10[%c0_34, %c0_35] : memref<1x32xf32, #tpu.memory_space<vmem>>, vector<1x32xf32>
    %cst_36 = arith.constant dense<0.000000e+00> : vector<10xf32>
    %89 = vector.multi_reduction <add>, %86, %cst_36 [1] : vector<10x32xf32> to vector<10xf32>
    %90 = vector.shape_cast %89 : vector<10xf32> to vector<10x1xf32>
    %cst_37 = arith.constant 3.200000e+01 : f32
    %91 = vector.broadcast %cst_37 : f32 to vector<10x1xf32>
    %92 = arith.divf %90, %91 : vector<10x1xf32>
    %93 = vector.broadcast %92 : vector<10x1xf32> to vector<10x32xf32>
    %94 = arith.subf %86, %93 : vector<10x32xf32>
    %95 = arith.mulf %94, %94 : vector<10x32xf32>
    %cst_38 = arith.constant dense<0.000000e+00> : vector<10xf32>
    %96 = vector.multi_reduction <add>, %95, %cst_38 [1] : vector<10x32xf32> to vector<10xf32>
    %97 = vector.shape_cast %96 : vector<10xf32> to vector<10x1xf32>
    %cst_39 = arith.constant 3.200000e+01 : f32
    %98 = vector.broadcast %cst_39 : f32 to vector<10x1xf32>
    %99 = arith.divf %97, %98 : vector<10x1xf32>
    %100 = vector.broadcast %92 : vector<10x1xf32> to vector<10x32xf32>
    %101 = arith.subf %86, %100 : vector<10x32xf32>
    %cst_40 = arith.constant 9.99999974E-6 : f32
    %102 = vector.broadcast %cst_40 : f32 to vector<10x1xf32>
    %103 = arith.addf %99, %102 : vector<10x1xf32>
    %104 = math.rsqrt %103 : vector<10x1xf32>
    %105 = vector.broadcast %104 : vector<10x1xf32> to vector<10x32xf32>
    %106 = arith.mulf %101, %105 : vector<10x32xf32>
    %107 = vector.broadcast %87 : vector<1x32xf32> to vector<10x32xf32>
    %108 = arith.mulf %106, %107 : vector<10x32xf32>
    %109 = vector.broadcast %88 : vector<1x32xf32> to vector<10x32xf32>
    %110 = arith.addf %108, %109 : vector<10x32xf32>
    %111 = arith.truncf %110 : vector<10x32xf32> to vector<10x32xbf16>
    %c0_41 = arith.constant 0 : index
    %c0_42 = arith.constant 0 : index
    %112 = vector.load %arg11[%c0_41, %c0_42] : memref<32x32xbf16, #tpu.memory_space<vmem>>, vector<32x32xbf16>
    %cst_43 = arith.constant dense<0.000000e+00> : vector<10x32xf32>
    %113 = tpu.matmul %111, %112, %cst_43 {dimension_numbers = #tpu.dot_dimension_numbers<[1], [0], [0], [1], [0, 0, 1, 1], [], []>} : vector<10x32xbf16>, vector<32x32xbf16>, vector<10x32xf32> -> vector<10x32xf32>
    %c0_44 = arith.constant 0 : index
    %c0_45 = arith.constant 0 : index
    %114 = vector.load %arg12[%c0_44, %c0_45] : memref<1x32xf32, #tpu.memory_space<vmem>>, vector<1x32xf32>
    %115 = vector.broadcast %114 : vector<1x32xf32> to vector<10x32xf32>
    %116 = arith.addf %113, %115 : vector<10x32xf32>
    %c0_46 = arith.constant 0 : index
    %c0_47 = arith.constant 0 : index
    %117 = vector.load %arg13[%c0_46, %c0_47] : memref<32x64xbf16, #tpu.memory_space<vmem>>, vector<32x64xbf16>
    %cst_48 = arith.constant dense<0.000000e+00> : vector<8x64xf32>
    %118 = tpu.matmul %3, %117, %cst_48 {dimension_numbers = #tpu.dot_dimension_numbers<[1], [0], [0], [1], [0, 0, 1, 1], [], []>} : vector<8x32xbf16>, vector<32x64xbf16>, vector<8x64xf32> -> vector<8x64xf32>
    %c0_49 = arith.constant 0 : index
    %c0_50 = arith.constant 0 : index
    %119 = vector.load %arg14[%c0_49, %c0_50] : memref<1x64xf32, #tpu.memory_space<vmem>>, vector<1x64xf32>
    %120 = vector.broadcast %119 : vector<1x64xf32> to vector<8x64xf32>
    %121 = arith.addf %118, %120 : vector<8x64xf32>
    %122 = vector.extract_strided_slice %121 {offsets = [0, 0], sizes = [8, 32], strides = [1, 1]} : vector<8x64xf32> to vector<8x32xf32>
    %123 = vector.extract_strided_slice %121 {offsets = [0, 32], sizes = [8, 32], strides = [1, 1]} : vector<8x64xf32> to vector<8x32xf32>
    %c0_51 = arith.constant 0 : index
    %c0_52 = arith.constant 0 : index
    %124 = vector.load %arg15[%c0_51, %c0_52] : memref<32x32xbf16, #tpu.memory_space<vmem>>, vector<32x32xbf16>
    %c0_53 = arith.constant 0 : index
    %c0_54 = arith.constant 0 : index
    %125 = vector.load %arg16[%c0_53, %c0_54] : memref<1x32xf32, #tpu.memory_space<vmem>>, vector<1x32xf32>
    %126 = vector.extract_strided_slice %116 {offsets = [0, 0], sizes = [10, 16], strides = [1, 1]} : vector<10x32xf32> to vector<10x16xf32>
    %127 = vector.extract_strided_slice %116 {offsets = [0, 16], sizes = [10, 16], strides = [1, 1]} : vector<10x32xf32> to vector<10x16xf32>
    %128 = vector.shape_cast %126 : vector<10x16xf32> to vector<1x10x16xf32>
    %129 = vector.shape_cast %127 : vector<10x16xf32> to vector<1x10x16xf32>
    %130 = tpu.concatenate %128, %129 in 0 : vector<1x10x16xf32>, vector<1x10x16xf32> -> vector<2x10x16xf32>
    %131 = arith.truncf %130 : vector<2x10x16xf32> to vector<2x10x16xbf16>
    %132 = vector.extract_strided_slice %122 {offsets = [0, 0], sizes = [8, 16], strides = [1, 1]} : vector<8x32xf32> to vector<8x16xf32>
    %133 = vector.extract_strided_slice %122 {offsets = [0, 16], sizes = [8, 16], strides = [1, 1]} : vector<8x32xf32> to vector<8x16xf32>
    %134 = vector.shape_cast %132 : vector<8x16xf32> to vector<1x8x16xf32>
    %135 = vector.shape_cast %133 : vector<8x16xf32> to vector<1x8x16xf32>
    %136 = tpu.concatenate %134, %135 in 0 : vector<1x8x16xf32>, vector<1x8x16xf32> -> vector<2x8x16xf32>
    %137 = arith.truncf %136 : vector<2x8x16xf32> to vector<2x8x16xbf16>
    %138 = vector.extract_strided_slice %123 {offsets = [0, 0], sizes = [8, 16], strides = [1, 1]} : vector<8x32xf32> to vector<8x16xf32>
    %139 = vector.extract_strided_slice %123 {offsets = [0, 16], sizes = [8, 16], strides = [1, 1]} : vector<8x32xf32> to vector<8x16xf32>
    %140 = vector.shape_cast %138 : vector<8x16xf32> to vector<1x8x16xf32>
    %141 = vector.shape_cast %139 : vector<8x16xf32> to vector<1x8x16xf32>
    %142 = tpu.concatenate %140, %141 in 0 : vector<1x8x16xf32>, vector<1x8x16xf32> -> vector<2x8x16xf32>
    %143 = arith.truncf %142 : vector<2x8x16xf32> to vector<2x8x16xbf16>
    "tpu.trace_start"() <{level = 10 : i32, message = "hqd,hkd->hqk"}> : () -> ()
    %cst_55 = arith.constant dense<0.000000e+00> : vector<2x10x8xf32>
    %144 = tpu.matmul %131, %137, %cst_55 {dimension_numbers = #tpu.dot_dimension_numbers<[2], [2], [1], [1], [0, 0, 0, 1, 1, 1], [0], [0]>} : vector<2x10x16xbf16>, vector<2x8x16xbf16>, vector<2x10x8xf32> -> vector<2x10x8xf32>
    "tpu.trace_stop"() : () -> ()
    %cst_56 = arith.constant 2.500000e-01 : f32
    %145 = vector.broadcast %cst_56 : f32 to vector<2x10x8xf32>
    %146 = arith.mulf %144, %145 : vector<2x10x8xf32>
    %147 = vector.shape_cast %24 : vector<10x8xf32> to vector<1x10x8xf32>
    %148 = vector.broadcast %147 : vector<1x10x8xf32> to vector<2x10x8xf32>
    %149 = arith.addf %146, %148 : vector<2x10x8xf32>
    %cst_57 = arith.constant dense<0xFF800000> : vector<2x10xf32>
    %150 = vector.multi_reduction <maximumf>, %149, %cst_57 [2] : vector<2x10x8xf32> to vector<2x10xf32>
    %151 = vector.shape_cast %150 : vector<2x10xf32> to vector<2x10x1xf32>
    %cst_58 = arith.constant -1.000000e+30 : f32
    %152 = vector.broadcast %cst_58 : f32 to vector<2x10x1xf32>
    %153 = arith.maximumf %151, %152 : vector<2x10x1xf32>
    %154 = vector.broadcast %153 : vector<2x10x1xf32> to vector<2x10x8xf32>
    %155 = arith.subf %149, %154 : vector<2x10x8xf32>
    %156 = math.exp %155 : vector<2x10x8xf32>
    %cst_59 = arith.constant dense<0.000000e+00> : vector<2x10xf32>
    %157 = vector.multi_reduction <add>, %156, %cst_59 [2] : vector<2x10x8xf32> to vector<2x10xf32>
    %158 = vector.shape_cast %157 : vector<2x10xf32> to vector<2x10x1xf32>
    %cst_60 = arith.constant 0.000000e+00 : f32
    %159 = vector.broadcast %cst_60 : f32 to vector<2x10x1xf32>
    %160 = arith.cmpf ogt, %158, %159 : vector<2x10x1xf32>
    %cst_61 = arith.constant 1.000000e+00 : f32
    %161 = vector.broadcast %cst_61 : f32 to vector<2x10x1xf32>
    %162 = arith.select %160, %158, %161 : vector<2x10x1xi1>, vector<2x10x1xf32>
    %163 = tpu.reciprocal %162 {approx = true} : vector<2x10x1xf32> -> vector<2x10x1xf32>
    %164 = vector.broadcast %163 : vector<2x10x1xf32> to vector<2x10x8xf32>
    %165 = arith.mulf %156, %164 : vector<2x10x8xf32>
    %166 = arith.truncf %165 : vector<2x10x8xf32> to vector<2x10x8xbf16>
    "tpu.trace_start"() <{level = 10 : i32, message = "hqk,hkd->hqd"}> : () -> ()
    %cst_62 = arith.constant dense<0.000000e+00> : vector<2x10x16xf32>
    %167 = tpu.matmul %166, %143, %cst_62 {dimension_numbers = #tpu.dot_dimension_numbers<[2], [1], [1], [2], [0, 0, 0, 1, 1, 2], [0], [0]>} : vector<2x10x8xbf16>, vector<2x8x16xbf16>, vector<2x10x16xf32> -> vector<2x10x16xf32>
    "tpu.trace_stop"() : () -> ()
    %168 = vector.extract_strided_slice %167 {offsets = [0, 0, 0], sizes = [1, 10, 16], strides = [1, 1, 1]} : vector<2x10x16xf32> to vector<1x10x16xf32>
    %169 = vector.shape_cast %168 : vector<1x10x16xf32> to vector<10x16xf32>
    %170 = vector.extract_strided_slice %167 {offsets = [1, 0, 0], sizes = [1, 10, 16], strides = [1, 1, 1]} : vector<2x10x16xf32> to vector<1x10x16xf32>
    %171 = vector.shape_cast %170 : vector<1x10x16xf32> to vector<10x16xf32>
    %172 = tpu.concatenate %169, %171 in 1 : vector<10x16xf32>, vector<10x16xf32> -> vector<10x32xf32>
    %173 = arith.truncf %172 : vector<10x32xf32> to vector<10x32xbf16>
    %cst_63 = arith.constant dense<0.000000e+00> : vector<10x32xf32>
    %174 = tpu.matmul %173, %124, %cst_63 {dimension_numbers = #tpu.dot_dimension_numbers<[1], [0], [0], [1], [0, 0, 1, 1], [], []>} : vector<10x32xbf16>, vector<32x32xbf16>, vector<10x32xf32> -> vector<10x32xf32>
    %175 = vector.broadcast %125 : vector<1x32xf32> to vector<10x32xf32>
    %176 = arith.addf %174, %175 : vector<10x32xf32>
    %177 = arith.addf %110, %176 : vector<10x32xf32>
    %c0_64 = arith.constant 0 : index
    %c0_65 = arith.constant 0 : index
    %178 = vector.load %arg17[%c0_64, %c0_65] : memref<1x32xf32, #tpu.memory_space<vmem>>, vector<1x32xf32>
    %c0_66 = arith.constant 0 : index
    %c0_67 = arith.constant 0 : index
    %179 = vector.load %arg18[%c0_66, %c0_67] : memref<1x32xf32, #tpu.memory_space<vmem>>, vector<1x32xf32>
    %cst_68 = arith.constant dense<0.000000e+00> : vector<10xf32>
    %180 = vector.multi_reduction <add>, %177, %cst_68 [1] : vector<10x32xf32> to vector<10xf32>
    %181 = vector.shape_cast %180 : vector<10xf32> to vector<10x1xf32>
    %cst_69 = arith.constant 3.200000e+01 : f32
    %182 = vector.broadcast %cst_69 : f32 to vector<10x1xf32>
    %183 = arith.divf %181, %182 : vector<10x1xf32>
    %184 = vector.broadcast %183 : vector<10x1xf32> to vector<10x32xf32>
    %185 = arith.subf %177, %184 : vector<10x32xf32>
    %186 = arith.mulf %185, %185 : vector<10x32xf32>
    %cst_70 = arith.constant dense<0.000000e+00> : vector<10xf32>
    %187 = vector.multi_reduction <add>, %186, %cst_70 [1] : vector<10x32xf32> to vector<10xf32>
    %188 = vector.shape_cast %187 : vector<10xf32> to vector<10x1xf32>
    %cst_71 = arith.constant 3.200000e+01 : f32
    %189 = vector.broadcast %cst_71 : f32 to vector<10x1xf32>
    %190 = arith.divf %188, %189 : vector<10x1xf32>
    %191 = vector.broadcast %183 : vector<10x1xf32> to vector<10x32xf32>
    %192 = arith.subf %177, %191 : vector<10x32xf32>
    %cst_72 = arith.constant 9.99999974E-6 : f32
    %193 = vector.broadcast %cst_72 : f32 to vector<10x1xf32>
    %194 = arith.addf %190, %193 : vector<10x1xf32>
    %195 = math.rsqrt %194 : vector<10x1xf32>
    %196 = vector.broadcast %195 : vector<10x1xf32> to vector<10x32xf32>
    %197 = arith.mulf %192, %196 : vector<10x32xf32>
    %198 = vector.broadcast %178 : vector<1x32xf32> to vector<10x32xf32>
    %199 = arith.mulf %197, %198 : vector<10x32xf32>
    %200 = vector.broadcast %179 : vector<1x32xf32> to vector<10x32xf32>
    %201 = arith.addf %199, %200 : vector<10x32xf32>
    %c0_73 = arith.constant 0 : index
    %c0_74 = arith.constant 0 : index
    %202 = vector.load %arg19[%c0_73, %c0_74] : memref<32x64xbf16, #tpu.memory_space<vmem>>, vector<32x64xbf16>
    %c0_75 = arith.constant 0 : index
    %c0_76 = arith.constant 0 : index
    %203 = vector.load %arg20[%c0_75, %c0_76] : memref<1x64xf32, #tpu.memory_space<vmem>>, vector<1x64xf32>
    %c0_77 = arith.constant 0 : index
    %c0_78 = arith.constant 0 : index
    %204 = vector.load %arg21[%c0_77, %c0_78] : memref<64x32xbf16, #tpu.memory_space<vmem>>, vector<64x32xbf16>
    %c0_79 = arith.constant 0 : index
    %c0_80 = arith.constant 0 : index
    %205 = vector.load %arg22[%c0_79, %c0_80] : memref<1x32xf32, #tpu.memory_space<vmem>>, vector<1x32xf32>
    %206 = arith.truncf %201 : vector<10x32xf32> to vector<10x32xbf16>
    %cst_81 = arith.constant dense<0.000000e+00> : vector<10x64xf32>
    %207 = tpu.matmul %206, %202, %cst_81 {dimension_numbers = #tpu.dot_dimension_numbers<[1], [0], [0], [1], [0, 0, 1, 1], [], []>} : vector<10x32xbf16>, vector<32x64xbf16>, vector<10x64xf32> -> vector<10x64xf32>
    %208 = vector.broadcast %203 : vector<1x64xf32> to vector<10x64xf32>
    %209 = arith.addf %207, %208 : vector<10x64xf32>
    %cst_82 = arith.constant 0.000000e+00 : f32
    %210 = vector.broadcast %cst_82 : f32 to vector<10x64xf32>
    %211 = arith.maximumf %209, %210 : vector<10x64xf32>
    %212 = arith.truncf %211 : vector<10x64xf32> to vector<10x64xbf16>
    %cst_83 = arith.constant dense<0.000000e+00> : vector<10x32xf32>
    %213 = tpu.matmul %212, %204, %cst_83 {dimension_numbers = #tpu.dot_dimension_numbers<[1], [0], [0], [1], [0, 0, 1, 1], [], []>} : vector<10x64xbf16>, vector<64x32xbf16>, vector<10x32xf32> -> vector<10x32xf32>
    %214 = vector.broadcast %205 : vector<1x32xf32> to vector<10x32xf32>
    %215 = arith.addf %213, %214 : vector<10x32xf32>
    %216 = arith.addf %201, %215 : vector<10x32xf32>
    %c0_84 = arith.constant 0 : index
    %c0_85 = arith.constant 0 : index
    %217 = vector.load %arg23[%c0_84, %c0_85] : memref<1x32xf32, #tpu.memory_space<vmem>>, vector<1x32xf32>
    %c0_86 = arith.constant 0 : index
    %c0_87 = arith.constant 0 : index
    %218 = vector.load %arg24[%c0_86, %c0_87] : memref<1x32xf32, #tpu.memory_space<vmem>>, vector<1x32xf32>
    %cst_88 = arith.constant dense<0.000000e+00> : vector<10xf32>
    %219 = vector.multi_reduction <add>, %216, %cst_88 [1] : vector<10x32xf32> to vector<10xf32>
    %220 = vector.shape_cast %219 : vector<10xf32> to vector<10x1xf32>
    %cst_89 = arith.constant 3.200000e+01 : f32
    %221 = vector.broadcast %cst_89 : f32 to vector<10x1xf32>
    %222 = arith.divf %220, %221 : vector<10x1xf32>
    %223 = vector.broadcast %222 : vector<10x1xf32> to vector<10x32xf32>
    %224 = arith.subf %216, %223 : vector<10x32xf32>
    %225 = arith.mulf %224, %224 : vector<10x32xf32>
    %cst_90 = arith.constant dense<0.000000e+00> : vector<10xf32>
    %226 = vector.multi_reduction <add>, %225, %cst_90 [1] : vector<10x32xf32> to vector<10xf32>
    %227 = vector.shape_cast %226 : vector<10xf32> to vector<10x1xf32>
    %cst_91 = arith.constant 3.200000e+01 : f32
    %228 = vector.broadcast %cst_91 : f32 to vector<10x1xf32>
    %229 = arith.divf %227, %228 : vector<10x1xf32>
    %230 = vector.broadcast %222 : vector<10x1xf32> to vector<10x32xf32>
    %231 = arith.subf %216, %230 : vector<10x32xf32>
    %cst_92 = arith.constant 9.99999974E-6 : f32
    %232 = vector.broadcast %cst_92 : f32 to vector<10x1xf32>
    %233 = arith.addf %229, %232 : vector<10x1xf32>
    %234 = math.rsqrt %233 : vector<10x1xf32>
    %235 = vector.broadcast %234 : vector<10x1xf32> to vector<10x32xf32>
    %236 = arith.mulf %231, %235 : vector<10x32xf32>
    %237 = vector.broadcast %217 : vector<1x32xf32> to vector<10x32xf32>
    %238 = arith.mulf %236, %237 : vector<10x32xf32>
    %239 = vector.broadcast %218 : vector<1x32xf32> to vector<10x32xf32>
    %240 = arith.addf %238, %239 : vector<10x32xf32>
    %241 = arith.truncf %240 : vector<10x32xf32> to vector<10x32xbf16>
    %c0_93 = arith.constant 0 : index
    %c0_94 = arith.constant 0 : index
    %c0_95 = arith.constant 0 : index
    %242 = vector.load %arg25[%c0_93, %c0_94, %c0_95] : memref<1x10x32xbf16, #tpu.memory_space<vmem>>, vector<1x10x32xbf16>
    %243 = vector.shape_cast %242 : vector<1x10x32xbf16> to vector<10x32xbf16>
    %244 = vector.shape_cast %241 : vector<10x32xbf16> to vector<1x10x32xbf16>
    tpu.vector_store %arg25[%c0_93, %c0_94, %c0_95], %244 {strides = array<i32>} : memref<1x10x32xbf16, #tpu.memory_space<vmem>>, vector<1x10x32xbf16>,
    return
  }
  func.func @transform_0(%arg0: i32) -> (i32, i32, i32) {
    %c0_i32 = arith.constant 0 : i32
    %c0_i32_0 = arith.constant 0 : i32
    %c0_i32_1 = arith.constant 0 : i32
    return %arg0, %c0_i32, %c0_i32_0 : i32, i32, i32
  }
  func.func @transform_1(%arg0: i32) -> (i32, i32, i32) {
    %c0_i32 = arith.constant 0 : i32
    %c0_i32_0 = arith.constant 0 : i32
    %c0_i32_1 = arith.constant 0 : i32
    return %arg0, %c0_i32, %c0_i32_0 : i32, i32, i32
  }
  func.func @transform_2(%arg0: i32) -> (i32, i32, i32) {
    %c0_i32 = arith.constant 0 : i32
    %c0_i32_0 = arith.constant 0 : i32
    %c0_i32_1 = arith.constant 0 : i32
    return %arg0, %c0_i32, %c0_i32_0 : i32, i32, i32
  }
  func.func @transform_3(%arg0: i32) -> (i32, i32, i32) {
    %c0_i32 = arith.constant 0 : i32
    %c0_i32_0 = arith.constant 0 : i32
    %c0_i32_1 = arith.constant 0 : i32
    return %arg0, %c0_i32, %c0_i32_0 : i32, i32, i32
  }
  func.func @transform_4(%arg0: i32) -> (i32, i32) {
    %c0_i32 = arith.constant 0 : i32
    %c0_i32_0 = arith.constant 0 : i32
    %c0_i32_1 = arith.constant 0 : i32
    return %c0_i32, %c0_i32_0 : i32, i32
  }
  func.func @transform_5(%arg0: i32) -> (i32, i32) {
    %c0_i32 = arith.constant 0 : i32
    %c0_i32_0 = arith.constant 0 : i32
    %c0_i32_1 = arith.constant 0 : i32
    return %c0_i32, %c0_i32_0 : i32, i32
  }
  func.func @transform_6(%arg0: i32) -> (i32, i32) {
    %c0_i32 = arith.constant 0 : i32
    %c0_i32_0 = arith.constant 0 : i32
    %c0_i32_1 = arith.constant 0 : i32
    return %c0_i32, %c0_i32_0 : i32, i32
  }
  func.func @transform_7(%arg0: i32) -> (i32, i32) {
    %c0_i32 = arith.constant 0 : i32
    %c0_i32_0 = arith.constant 0 : i32
    %c0_i32_1 = arith.constant 0 : i32
    return %c0_i32, %c0_i32_0 : i32, i32
  }
  func.func @transform_8(%arg0: i32) -> (i32, i32) {
    %c0_i32 = arith.constant 0 : i32
    %c0_i32_0 = arith.constant 0 : i32
    %c0_i32_1 = arith.constant 0 : i32
    return %c0_i32, %c0_i32_0 : i32, i32
  }
  func.func @transform_9(%arg0: i32) -> (i32, i32) {
    %c0_i32 = arith.constant 0 : i32
    %c0_i32_0 = arith.constant 0 : i32
    %c0_i32_1 = arith.constant 0 : i32
    return %c0_i32, %c0_i32_0 : i32, i32
  }
  func.func @transform_10(%arg0: i32) -> (i32, i32) {
    %c0_i32 = arith.constant 0 : i32
    %c0_i32_0 = arith.constant 0 : i32
    %c0_i32_1 = arith.constant 0 : i32
    return %c0_i32, %c0_i32_0 : i32, i32
  }
  func.func @transform_11(%arg0: i32) -> (i32, i32) {
    %c0_i32 = arith.constant 0 : i32
    %c0_i32_0 = arith.constant 0 : i32
    %c0_i32_1 = arith.constant 0 : i32
    return %c0_i32, %c0_i32_0 : i32, i32
  }
  func.func @transform_12(%arg0: i32) -> (i32, i32) {
    %c0_i32 = arith.constant 0 : i32
    %c0_i32_0 = arith.constant 0 : i32
    %c0_i32_1 = arith.constant 0 : i32
    return %c0_i32, %c0_i32_0 : i32, i32
  }
  func.func @transform_13(%arg0: i32) -> (i32, i32) {
    %c0_i32 = arith.constant 0 : i32
    %c0_i32_0 = arith.constant 0 : i32
    %c0_i32_1 = arith.constant 0 : i32
    return %c0_i32, %c0_i32_0 : i32, i32
  }
  func.func @transform_14(%arg0: i32) -> (i32, i32) {
    %c0_i32 = arith.constant 0 : i32
    %c0_i32_0 = arith.constant 0 : i32
    %c0_i32_1 = arith.constant 0 : i32
    return %c0_i32, %c0_i32_0 : i32, i32
  }
  func.func @transform_15(%arg0: i32) -> (i32, i32) {
    %c0_i32 = arith.constant 0 : i32
    %c0_i32_0 = arith.constant 0 : i32
    %c0_i32_1 = arith.constant 0 : i32
    return %c0_i32, %c0_i32_0 : i32, i32
  }
  func.func @transform_16(%arg0: i32) -> (i32, i32) {
    %c0_i32 = arith.constant 0 : i32
    %c0_i32_0 = arith.constant 0 : i32
    %c0_i32_1 = arith.constant 0 : i32
    return %c0_i32, %c0_i32_0 : i32, i32
  }
  func.func @transform_17(%arg0: i32) -> (i32, i32) {
    %c0_i32 = arith.constant 0 : i32
    %c0_i32_0 = arith.constant 0 : i32
    %c0_i32_1 = arith.constant 0 : i32
    return %c0_i32, %c0_i32_0 : i32, i32
  }
  func.func @transform_18(%arg0: i32) -> (i32, i32) {
    %c0_i32 = arith.constant 0 : i32
    %c0_i32_0 = arith.constant 0 : i32
    %c0_i32_1 = arith.constant 0 : i32
    return %c0_i32, %c0_i32_0 : i32, i32
  }
  func.func @transform_19(%arg0: i32) -> (i32, i32) {
    %c0_i32 = arith.constant 0 : i32
    %c0_i32_0 = arith.constant 0 : i32
    %c0_i32_1 = arith.constant 0 : i32
    return %c0_i32, %c0_i32_0 : i32, i32
  }
  func.func @transform_20(%arg0: i32) -> (i32, i32) {
    %c0_i32 = arith.constant 0 : i32
    %c0_i32_0 = arith.constant 0 : i32
    %c0_i32_1 = arith.constant 0 : i32
    return %c0_i32, %c0_i32_0 : i32, i32
  }
  func.func @transform_21(%arg0: i32) -> (i32, i32) {
    %c0_i32 = arith.constant 0 : i32
    %c0_i32_0 = arith.constant 0 : i32
    %c0_i32_1 = arith.constant 0 : i32
    return %c0_i32, %c0_i32_0 : i32, i32
  }
  func.func @transform_22(%arg0: i32) -> (i32, i32) {
    %c0_i32 = arith.constant 0 : i32
    %c0_i32_0 = arith.constant 0 : i32
    %c0_i32_1 = arith.constant 0 : i32
    return %c0_i32, %c0_i32_0 : i32, i32
  }
  func.func @transform_23(%arg0: i32) -> (i32, i32) {
    %c0_i32 = arith.constant 0 : i32
    %c0_i32_0 = arith.constant 0 : i32
    %c0_i32_1 = arith.constant 0 : i32
    return %c0_i32, %c0_i32_0 : i32, i32
  }
  func.func @transform_24(%arg0: i32) -> (i32, i32, i32) {
    %c0_i32 = arith.constant 0 : i32
    %c0_i32_0 = arith.constant 0 : i32
    %c0_i32_1 = arith.constant 0 : i32
    return %arg0, %c0_i32, %c0_i32_0 : i32, i32, i32
  }
}

module attributes {stable_mosaic.version = 11 : i64} {
  func.func @_final_proj_kernel(%arg0: i32, %arg1: i32, %arg2: memref<32x32xbf16, #tpu.memory_space<vmem>>, %arg3: memref<1x32xf32, #tpu.memory_space<vmem>>, %arg4: memref<1x32xf32, #tpu.memory_space<vmem>>, %arg5: memref<32x128xbf16, #tpu.memory_space<vmem>>, %arg6: memref<1x128xf32, #tpu.memory_space<vmem>>, %arg7: memref<32x128xf32, #tpu.memory_space<vmem>>) attributes {dimension_semantics = [#tpu.dimension_semantics<parallel>, #tpu.dimension_semantics<parallel>], iteration_bounds = array<i64: 1, 1>, scalar_prefetch = 0 : i64, scratch_operands = 0 : i64, tpu.core_type = #tpu.core_type<tc>, window_params = [{transform_indices = @transform_0, window_bounds = array<i64: 32, 32>}, {pipeline_mode = #tpu.pipeline_mode<synchronous>, transform_indices = @transform_1, window_bounds = array<i64: 1, 32>}, {pipeline_mode = #tpu.pipeline_mode<synchronous>, transform_indices = @transform_2, window_bounds = array<i64: 1, 32>}, {transform_indices = @transform_3, window_bounds = array<i64: 32, 128>}, {transform_indices = @transform_4, window_bounds = array<i64: 1, 128>}, {transform_indices = @transform_5, window_bounds = array<i64: 32, 128>}]} {
    %c0 = arith.constant 0 : index
    %c0_0 = arith.constant 0 : index
    %0 = vector.load %arg2[%c0, %c0_0] : memref<32x32xbf16, #tpu.memory_space<vmem>>, vector<32x32xbf16>
    %1 = arith.extf %0 : vector<32x32xbf16> to vector<32x32xf32>
    %c0_1 = arith.constant 0 : index
    %c0_2 = arith.constant 0 : index
    %2 = vector.load %arg3[%c0_1, %c0_2] : memref<1x32xf32, #tpu.memory_space<vmem>>, vector<1x32xf32>
    %c0_3 = arith.constant 0 : index
    %c0_4 = arith.constant 0 : index
    %3 = vector.load %arg4[%c0_3, %c0_4] : memref<1x32xf32, #tpu.memory_space<vmem>>, vector<1x32xf32>
    %cst = arith.constant dense<0.000000e+00> : vector<32xf32>
    %4 = vector.multi_reduction <add>, %1, %cst [1] : vector<32x32xf32> to vector<32xf32>
    %5 = vector.shape_cast %4 : vector<32xf32> to vector<32x1xf32>
    %cst_5 = arith.constant 3.200000e+01 : f32
    %6 = vector.broadcast %cst_5 : f32 to vector<32x1xf32>
    %7 = arith.divf %5, %6 : vector<32x1xf32>
    %8 = vector.broadcast %7 : vector<32x1xf32> to vector<32x32xf32>
    %9 = arith.subf %1, %8 : vector<32x32xf32>
    %10 = arith.mulf %9, %9 : vector<32x32xf32>
    %cst_6 = arith.constant dense<0.000000e+00> : vector<32xf32>
    %11 = vector.multi_reduction <add>, %10, %cst_6 [1] : vector<32x32xf32> to vector<32xf32>
    %12 = vector.shape_cast %11 : vector<32xf32> to vector<32x1xf32>
    %cst_7 = arith.constant 3.200000e+01 : f32
    %13 = vector.broadcast %cst_7 : f32 to vector<32x1xf32>
    %14 = arith.divf %12, %13 : vector<32x1xf32>
    %15 = vector.broadcast %7 : vector<32x1xf32> to vector<32x32xf32>
    %16 = arith.subf %1, %15 : vector<32x32xf32>
    %cst_8 = arith.constant 9.99999974E-6 : f32
    %17 = vector.broadcast %cst_8 : f32 to vector<32x1xf32>
    %18 = arith.addf %14, %17 : vector<32x1xf32>
    %19 = math.rsqrt %18 : vector<32x1xf32>
    %20 = vector.broadcast %19 : vector<32x1xf32> to vector<32x32xf32>
    %21 = arith.mulf %16, %20 : vector<32x32xf32>
    %22 = vector.broadcast %2 : vector<1x32xf32> to vector<32x32xf32>
    %23 = arith.mulf %21, %22 : vector<32x32xf32>
    %24 = vector.broadcast %3 : vector<1x32xf32> to vector<32x32xf32>
    %25 = arith.addf %23, %24 : vector<32x32xf32>
    %26 = arith.truncf %25 : vector<32x32xf32> to vector<32x32xbf16>
    %c0_9 = arith.constant 0 : index
    %c0_10 = arith.constant 0 : index
    %27 = vector.load %arg5[%c0_9, %c0_10] : memref<32x128xbf16, #tpu.memory_space<vmem>>, vector<32x128xbf16>
    %cst_11 = arith.constant dense<0.000000e+00> : vector<32x128xf32>
    %28 = tpu.matmul %26, %27, %cst_11 {dimension_numbers = #tpu.dot_dimension_numbers<[1], [0], [0], [1], [0, 0, 1, 1], [], []>} : vector<32x32xbf16>, vector<32x128xbf16>, vector<32x128xf32> -> vector<32x128xf32>
    %c0_12 = arith.constant 0 : index
    %c0_13 = arith.constant 0 : index
    %29 = vector.load %arg6[%c0_12, %c0_13] : memref<1x128xf32, #tpu.memory_space<vmem>>, vector<1x128xf32>
    %30 = vector.broadcast %29 : vector<1x128xf32> to vector<32x128xf32>
    %31 = arith.addf %28, %30 : vector<32x128xf32>
    %c0_14 = arith.constant 0 : index
    %c0_15 = arith.constant 0 : index
    %32 = vector.load %arg7[%c0_14, %c0_15] : memref<32x128xf32, #tpu.memory_space<vmem>>, vector<32x128xf32>
    tpu.vector_store %arg7[%c0_14, %c0_15], %31 {strides = array<i32>} : memref<32x128xf32, #tpu.memory_space<vmem>>, vector<32x128xf32>,
    return
  }
  func.func @transform_0(%arg0: i32, %arg1: i32) -> (i32, i32) {
    %c0_i32 = arith.constant 0 : i32
    %c0_i32_0 = arith.constant 0 : i32
    return %arg0, %c0_i32 : i32, i32
  }
  func.func @transform_1(%arg0: i32, %arg1: i32) -> (i32, i32) {
    %c0_i32 = arith.constant 0 : i32
    %c0_i32_0 = arith.constant 0 : i32
    %c0_i32_1 = arith.constant 0 : i32
    return %c0_i32, %c0_i32_0 : i32, i32
  }
  func.func @transform_2(%arg0: i32, %arg1: i32) -> (i32, i32) {
    %c0_i32 = arith.constant 0 : i32
    %c0_i32_0 = arith.constant 0 : i32
    %c0_i32_1 = arith.constant 0 : i32
    return %c0_i32, %c0_i32_0 : i32, i32
  }
  func.func @transform_3(%arg0: i32, %arg1: i32) -> (i32, i32) {
    %c0_i32 = arith.constant 0 : i32
    %c0_i32_0 = arith.constant 0 : i32
    return %c0_i32, %arg1 : i32, i32
  }
  func.func @transform_4(%arg0: i32, %arg1: i32) -> (i32, i32) {
    %c0_i32 = arith.constant 0 : i32
    %c0_i32_0 = arith.constant 0 : i32
    return %c0_i32, %arg1 : i32, i32
  }
  func.func @transform_5(%arg0: i32, %arg1: i32) -> (i32, i32) {
    %c0_i32 = arith.constant 0 : i32
    return %arg0, %arg1 : i32, i32
  }
}

</mosaic_0001>

<bundles_post_ra>
// kernel: transformer_forward.9
= control target key start
LH: loop header
LB: loop body
LE: loop exit
PB: predicated region body
PF: predicated region fallthrough
CT: control target
= control target key end

     0   :  { %vm31_vm0 = vcmask 261120   ;;  %s304_s0 = inlined_call_operand.vmem [shape: bf16[32,32], index: 0, kind: input, shape index: {}]   ;;  %s305_s3 = inlined_call_operand.vmem [shape: bf16[32,128], index: 3, kind: input, shape index: {}]   ;;  %s306_s1 = inlined_call_operand.vmem [shape: f32[1,32], index: 1, kind: input, shape index: {}]   ;;  %s307_s2 = inlined_call_operand.vmem [shape: f32[1,32], index: 2, kind: input, shape index: {}]   ;;  %s308_s4 = inlined_call_operand.vmem [shape: f32[1,128], index: 4, kind: input, shape index: {}]   ;;  %s309_s5 = inlined_call_operand.vmem [shape: f32[32,128], index: 5, kind: output, shape index: {}]  }
   0x1   :  { %v201_v0 = vld [vmem:[%s304_s0] sm:$0xff]   ;;  %v208_v1 = vld [vmem:[%s304_s0 + $0x8] sm:$0xff]  }
   0x2   :  { %v202_v2 = vunpack.c.l.bf16 %v201_v0  ;;  %v206_v3 = vunpack.c.l.bf16 %v208_v1  ;;  %v203_v4 = vunpack.c.h.bf16 %v201_v0  ;;  %v207_v5 = vunpack.c.h.bf16 %v208_v1  ;;  %v221_v30 = vld [vmem:[%s305_s3 + $0x8] sm:$0xff]   ;;  %v222_v31 = vld [vmem:[%s305_s3] sm:$0xff]  }
   0x3   :  { %213 = vmatprep.subr.bf16.mxu0 %v221_v30  ;;  %v193_v46 = vld [vmem:[%s306_s1] ss:$0 sm:$0xff] }
   0x4   :  { %v32_v6 = vsel %vm31_vm0, %v202_v2, 0.0  ;;  %v38_v7 = vsel %vm31_vm0, %v206_v3, 0.0  ;;  %v35_v8 = vsel %vm31_vm0, %v203_v4, 0.0  ;;  %v41_v9 = vsel %vm31_vm0, %v207_v5, 0.0  ;;  %214 = vmatpush3.bf16.msra.mxu0 %v221_v30  ;;  %v194_v51 = vld [vmem:[%s307_s2] ss:$0 sm:$0xff] }
   0x5   :  { %33 = vadd.xlane.f32.xlu0 %v32_v6  ;;  %39 = vadd.xlane.f32.xlu1 %v38_v7  ;;  %v195_v0 = vld [vmem:[%s308_s4] ss:$0 sm:$0xff] }
   0x6   :  { %215 = vmatprep.subr.bf16.mxu0 %v222_v31 }
   0x8   :  { %216 = vmatpush3.bf16.msra.mxu0 %v222_v31 }
   0x9   :  { %36 = vadd.xlane.f32.xlu0 %v35_v8  ;;  %42 = vadd.xlane.f32.xlu1 %v41_v9 }
  0x8e   :  { %v34_v10 = vpop.xlane.xlu0 %33  ;;  %v40_v11 = vpop.xlane.xlu1 %39 }
  0x8f   :  { %v45_v12 = vmul.f32 0.03125, %v34_v10  ;;  %v47_v13 = vmul.f32 0.03125, %v40_v11 }
  0x91   :  { %v49_v14 = vsub.f32 %v202_v2, %v45_v12  ;;  %v51_v15 = vsub.f32 %v206_v3, %v47_v13 }
  0x92   :  { %v37_v16 = vpop.xlane.xlu0 %36  ;;  %v43_v17 = vpop.xlane.xlu1 %42 }
  0x93   :  { %v46_v18 = vmul.f32 0.03125, %v37_v16  ;;  %v48_v19 = vmul.f32 0.03125, %v43_v17  ;;  %v53_v20 = vmul.f32 %v49_v14, %v49_v14  ;;  %v55_v21 = vmul.f32 %v51_v15, %v51_v15 }
  0x95   :  { %v50_v22 = vsub.f32 %v203_v4, %v46_v18  ;;  %v52_v23 = vsub.f32 %v207_v5, %v48_v19  ;;  %v57_v24 = vsel %vm31_vm0, %v53_v20, 0.0  ;;  %v63_v25 = vsel %vm31_vm0, %v55_v21, 0.0 }
  0x96   :  { %58 = vadd.xlane.f32.xlu0 %v57_v24 }
  0x97   :  { %v54_v26 = vmul.f32 %v50_v22, %v50_v22  ;;  %v56_v27 = vmul.f32 %v52_v23, %v52_v23 }
  0x99   :  { %v60_v28 = vsel %vm31_vm0, %v54_v26, 0.0  ;;  %v66_v29 = vsel %vm31_vm0, %v56_v27, 0.0 }
  0x9a   :  { %64 = vadd.xlane.f32.xlu0 %v63_v25  ;;  %61 = vadd.xlane.f32.xlu1 %v60_v28 }
  0x9e   :  { %67 = vadd.xlane.f32.xlu1 %v66_v29 }
 0x11f   :  { %v59_v32 = vpop.xlane.xlu0 %58 }
 0x120   :  { %v69_v33 = vmul.f32 0.03125, %v59_v32 }
 0x122   :  { %v73_v34 = vadd.f32 1e-05, %v69_v33 }
 0x123   :  { %v62_v35 = vpop.xlane.xlu1 %61  ;;  %v65_v36 = vpop.xlane.xlu0 %64 }
 0x124   :  { %223 = vrsqrt.f32 %v73_v34  ;;  %v70_v37 = vmul.f32 0.03125, %v62_v35  ;;  %v71_v38 = vmul.f32 0.03125, %v65_v36 }
 0x126   :  { %v74_v39 = vadd.f32 1e-05, %v70_v37  ;;  %v75_v40 = vadd.f32 1e-05, %v71_v38 }
 0x127   :  { %v68_v41 = vpop.xlane.xlu1 %67 }
 0x128   :  { %225 = vrsqrt.f32 %v74_v39  ;;  %v72_v42 = vmul.f32 0.03125, %v68_v41 }
 0x129   :  { %227 = vrsqrt.f32 %v75_v40 }
 0x12a   :  { %v76_v43 = vadd.f32 1e-05, %v72_v42 }
 0x12c   :  { %229 = vrsqrt.f32 %v76_v43 }
 0x131   :  { %v224_v44 = vpop.eup %223 }
 0x132   :  { %v81_v45 = vmul.f32 %v224_v44, %v49_v14 }
 0x134   :  { %v91_v50 = vmul.f32 %v193_v46, %v81_v45 }
 0x135   :  { %v226_v47 = vpop.eup %225 }
 0x136   :  { %v228_v48 = vpop.eup %227  ;;  %v82_v49 = vmul.f32 %v226_v47, %v50_v22  ;;  %v101_v55 = vadd.f32 %v194_v51, %v91_v50 }
 0x137   :  { %v83_v52 = vmul.f32 %v228_v48, %v51_v15 }
 0x138   :  { %v92_v53 = vmul.f32 %v193_v46, %v82_v49 }
 0x139   :  { %v230_v54 = vpop.eup %229  ;;  %v93_v58 = vmul.f32 %v193_v46, %v83_v52 }
 0x13a   :  { %v102_v56 = vadd.f32 %v194_v51, %v92_v53  ;;  %v84_v57 = vmul.f32 %v230_v54, %v52_v23 }
 0x13b   :  { %v103_v61 = vadd.f32 %v194_v51, %v93_v58 }
 0x13c   :  { %v105_v59 = vpack.c.bf16 %v102_v56, %v101_v55  ;;  %v94_v60 = vmul.f32 %v193_v46, %v84_v57 }
 0x13e   :  { %217 = vmatprep.mubr.msk.bf16.mxu0 %vm31_vm0, %v105_v59  ;;  %v104_v62 = vadd.f32 %v194_v51, %v94_v60 }
 0x140   :  { %v106_v63 = vpack.c.bf16 %v104_v62, %v103_v61 }
 0x142   :  { %218 = vmatmul.mubr.msk.bf16.vlgmr.msra.gmra.mxu0 %vm31_vm0, %v106_v63 }
 0x202   :  { %v219_v1 = vpop.f32.mrf.mxu0 }
 0x203   :  { %v179_v2 = vadd.f32 %v219_v1, %v195_v0 }
 0x204   :  { %v170_v3 = vpop.f32.mrf.mxu0 }
 0x205   :  { %187 = vst [vmem:[%s309_s5 + $0x10] sm:$0xff] %v179_v2  ;;  %v171_v4 = vadd.f32 %v195_v0, %v170_v3 }
 0x206   :  { %v220_v5 = vpop.f32.mrf.mxu0 }
 0x207   :  { %185 = vst [vmem:[%s309_s5] sm:$0xff] %v171_v4  ;;  %v182_v6 = vadd.f32 %v220_v5, %v195_v0 }
 0x208   :  { %v173_v7 = vpop.f32.mrf.mxu0 }
 0x209   :  { %188 = vst [vmem:[%s309_s5 + $0x18] sm:$0xff] %v182_v6  ;;  %v174_v8 = vadd.f32 %v195_v0, %v173_v7 }
 0x20b   :  { %186 = vst [vmem:[%s309_s5 + $0x8] sm:$0xff] %v174_v8 }

// kernel: transformer_forward.6
= control target key start
LH: loop header
LB: loop body
LE: loop exit
PB: predicated region body
PF: predicated region fallthrough
CT: control target
= control target key end

     0   :  { %s1886_s0 = inlined_call_operand.vmem [shape: bf16[2,8,32], index: 0, kind: input, shape index: {}]   ;;  %s1887_s1 = inlined_call_operand.vmem [shape: f32[2,1,8], index: 1, kind: input, shape index: {}]   ;;  %s1888_s2 = inlined_call_operand.vmem [shape: bf16[32,96], index: 2, kind: input, shape index: {}]   ;;  %s1889_s3 = inlined_call_operand.vmem [shape: f32[1,96], index: 3, kind: input, shape index: {}]   ;;  %s1890_s4 = inlined_call_operand.vmem [shape: bf16[32,32], index: 4, kind: input, shape index: {}]   ;;  %s1891_s5 = inlined_call_operand.vmem [shape: f32[1,32], index: 5, kind: input, shape index: {}]   ;;  %s1892_s6 = inlined_call_operand.vmem [shape: f32[1,32], index: 6, kind: input, shape index: {}]   ;;  %s1893_s7 = inlined_call_operand.vmem [shape: f32[1,32], index: 7, kind: input, shape index: {}]   ;;  %s1894_s8 = inlined_call_operand.vmem [shape: bf16[32,64], index: 8, kind: input, shape index: {}]   ;;  %s1895_s9 = inlined_call_operand.vmem [shape: f32[1,64], index: 9, kind: input, shape index: {}]   ;;  %s1896_s10 = inlined_call_operand.vmem [shape: bf16[64,32], index: 10, kind: input, shape index: {}]   ;;  %s1897_s11 = inlined_call_operand.hbm [shape: f32[1,32], index: 11, kind: input, shape index: {}]   ;;  %s1898_s12 = inlined_call_operand.hbm [shape: f32[1,32], index: 12, kind: input, shape index: {}]   ;;  %s1899_s13 = inlined_call_operand.hbm [shape: f32[1,32], index: 13, kind: input, shape index: {}]   ;;  %s1900_s14 = inlined_call_operand.vmem [shape: f32[1,32], index: 14, kind: input, shape index: {}]   ;;  %s1901_s15 = inlined_call_operand.vmem [shape: f32[1,32], index: 15, kind: input, shape index: {}]   ;;  %s1902_s16 = inlined_call_operand.vmem [shape: bf16[2,8,32], index: 16, kind: output, shape index: {}]  }
   0x1   :  { %1904 = sst [smem:[#allocation9_spill]] %s1886_s0 }
   0x2   :  { %21 = vsyncpa [#allocation3], 0 }
   0x3   :  { %22 = vsyncpa [#allocation5], 0  ;;  %s1685_s21 = smov 0  }
   0x4 LB: > { %s1691_s22 = sadd.s32 4294967295, %s1588_s21   ;;  %p1302_p0 = scmp.ge.s32.totalorder %s1588_s21, 1  ;;  %s1588_s21 = sphi %s1685_s21, %s28_s21  }
   0x5   : > { %p405_p1 = scmp.lt.s32.totalorder %s1588_s21, 3  ;;  %p1903_p2 = scmp.eq.s32.totalorder %s1691_s22, 0 }
   0x6   : > { %s1590_s24 = smov [#allocation4]   ;;  %s1591_s26 = smov [#allocation2]  }
   0x7   : > { %p1696_p3 = pnand %p1302_p0, %p405_p1  ;;  %s456_s25 = sshll.u32 %s1590_s24, 4  ;;  %s457_s25 = int_to_ptr.vmem [resolvable:$true] %s456_s25 }
   0x8   : > { %s445_s27 = sshll.u32 %s1591_s26, 4  ;;  %s1592_s28 = smov [#allocation6]   ;;  %s446_s27 = int_to_ptr.vmem [resolvable:$true] %s445_s27 }
   0x9   : > { %p1438_p4 = pneg %p1696_p3  ;;  %s467_s29 = sshll.u32 %s1592_s28, 4  ;;  %s1708_s29 = int_to_ptr.vmem [resolvable:$true] %s467_s29 }
   0xa   : > { %s1507_s0 = scalar_lea.vmem %s457_s25, 16  ;;  %s1514_s17 = scalar_lea.vmem %s457_s25, 32 }
   0xb   : > { %p1704_p5 = pnand %p1903_p2, %p1438_p4  ;;  %p1508_p7 = scmp.ne.s32.totalorder %s457_s25, %s1507_s0 }
   0xc   : > { %p1515_p10 = scmp.lt.s32.totalorder %s457_s25, %s457_s25  ;;  %p1516_p11 = scmp.lt.s32.totalorder %s1514_s17, %s1507_s0 }
   0xd   : > { %p1498_p6 = pneg %p1704_p5 }
   0xe   : > { %p1517_p12 = por %p1516_p11, %p1515_p10 }
   0xf   : > { %p1510_p8 = pnand %p1508_p7, %p1498_p6 }
  0x11   : > { %p1511_p9 = pneg %p1510_p8 }
  0x13   : > { %p1518_p13 = pnand %p1517_p12, %p1511_p9 }
  0x15   : > { %1521 = shalt.err (!%p1518_p13)
}
  0x16   : > { %1444 = dma.hbm_to_vmem [thread:$0]  (!%p1704_p5), %s1898_s12, 16, %s457_s25, [#allocation5]  }
  0x17   : > { %s1533_s20 = scalar_lea.vmem %s446_s27, 16  ;;  %s1540_s24 = scalar_lea.vmem %s446_s27, 32 }
  0x18   : > { %p1534_p0 = scmp.ne.s32.totalorder %s446_s27, %s1533_s20  ;;  %p1541_p7 = scmp.lt.s32.totalorder %s446_s27, %s446_s27 }
  0x19   : > { %p1542_p8 = scmp.lt.s32.totalorder %s1540_s24, %s1533_s20 }
  0x1a   : > { %p1536_p1 = pnand %p1534_p0, %p1498_p6 }
  0x1b   : > { %p1543_p2 = por %p1542_p8, %p1541_p7 }
  0x1c   : > { %p1537_p4 = pneg %p1536_p1 }
  0x1e   : > { %p1544_p10 = pnand %p1543_p2, %p1537_p4 }
  0x20   : > { %1547 = shalt.err (!%p1544_p10)
}
  0x21   : > { %1441 = dma.hbm_to_vmem [thread:$0]  (!%p1704_p5), %s1897_s11, 16, %s446_s27, [#allocation3]  }
  0x22   : > { %s1559_s25 = scalar_lea.vmem %s1708_s29, 16  ;;  %s1566_s0 = scalar_lea.vmem %s1708_s29, 32 }
  0x23   : > { %p1560_p9 = scmp.ne.s32.totalorder %s1708_s29, %s1559_s25  ;;  %p1567_p2 = scmp.lt.s32.totalorder %s1708_s29, %s1708_s29 }
  0x24   : > { %p1568_p13 = scmp.lt.s32.totalorder %s1566_s0, %s1559_s25 }
  0x25   : > { %p1562_p11 = pnand %p1560_p9, %p1498_p6 }
  0x26   : > { %p1569_p0 = por %p1568_p13, %p1567_p2 }
  0x27   : > { %p1563_p12 = pneg %p1562_p11 }
  0x29   : > { %p1570_p1 = pnand %p1569_p0, %p1563_p12 }
  0x2b   : > { %1573 = shalt.err (!%p1570_p1)
}
  0x2c   : > { %1447 = dma.hbm_to_vmem [thread:$0]  (!%p1704_p5), %s1899_s13, 16, %s1708_s29, [#allocation5]  }
  0x2d   : > { %499 = sbr.rel (%p1696_p3) target bundleno = 2848 (0xb20), region = 84  ;;  %p1907_p6 = scmp.eq.s32.totalorder (!%p1696_p3), %s1691_s22, 0 }
  0x32   : > { %1579 = dma.done.wait (%p1907_p6), [#allocation3], 16   ;;  %p1908_p4 = pmov %p1907_p6 }
  0x34   : > { %1581 = vsyncadd (%p1908_p4), [#allocation3], 4294967280  ;;  %p1909_p7 = pmov %p1908_p4 }
  0x35   : > { %p1910_p8 = pmov %p1908_p4 }
  0x36   : > { %1583 = dma.done.wait (%p1909_p7), [#allocation5], 32  }
  0x37   : > { %1585 = vsyncadd (%p1910_p8), [#allocation5], 4294967264  ;;  %p558_p10 = scmp.lt.s32.totalorder %s1691_s22, 1  ;;  %v1593_v0 = vmov 0.0   ;;  %vm1594_vm0 = vmmov 0   ;;  %v1472_v1 = vld [vmem:[%s1888_s2 + $0x8] sm:$0xff]   ;;  %v572_v17 = vlaneseq }
  0x38   : > { %1366 = vmatprep.subr.bf16.mxu0 %v1593_v0  ;;  %1370 = vmatprep.mubr.msk.bf16.mxu0 %vm1594_vm0, %v1593_v0  ;;  %s1911_s20 = sld [smem:[#allocation9_spill]]  ;;  %v1473_v2 = vld [vmem:[%s1888_s2] sm:$0xff]   ;;  %vm609_vm1 = vcmask 261120   ;;  %s1595_s17 = smov 112   ;;  %vm667_vm2 = vcmask 130048   ;;  %v1597_v20 = vmov -inf  }
  0x39   : > { %s1913_s22 = smov (!%p558_p10, %s1691_s22), 1  ;;  %1374 = vmatprep.subr.bf16.mxu1 %v1593_v0  ;;  %1376 = vmatprep.mubr.msk.bf16.mxu1 %vm1594_vm0, %v1593_v0  ;;  %v1314_v4 = vld [vmem:[%s1889_s3] ss:$0 sm:$0xff]  ;;  %s1596_s18 = smov 96   ;;  %v573_v18 = vshrl.u32 %v572_v17, 7  ;;  %v575_v19 = vand.u32 127, %v572_v17 }
  0x3a   : > { %s1311_s23 = sshll.u32 %s1913_s22, 2  ;;  %1367 = vmatpush3.bf16.msra.mxu0 %v1472_v1  ;;  %s564_s30 = scalar_lea.vmem %s1887_s1, %s1913_s22  ;;  %vm767_vm4 = vcmask 64512   ;;  %vm803_vm5 = vcmask 1043456   ;;  %v1474_v1 = vld [vmem:[%s1890_s4 + $0x8] sm:$0xff]   ;;  %vm1101_vm8 = vcmask 523264   ;;  %vm1205_vm9 = vcmask 257024  }
  0x3b   : > { %1368 = vmatprep.subr.bf16.mxu0 %v1593_v0  ;;  %vm576_vm3 = vcmp.le.s32.totalorder %v575_v19, %v573_v18  ;;  %v1313_v22 = vld [vmem:[%s564_s30] ss:$0 sm:$0xff]  ;;  %s1598_s19 = smov 64   ;;  %s1599_s25 = smov 16  }
  0x3c   : > { %v577_v21 = vsel %vm576_vm3, 0.0, %v1597_v20 }
  0x3d   : > { %v585_v23 = vadd.f32 %v1313_v22, %v577_v21 }
  0x3e   : > { %s561_s24 = scalar_lea.vmem %s1911_s20, %s1311_s23  ;;  %1369 = vmatpush3.bf16.msra.mxu0 %v1473_v2  ;;  %v1475_v2 = vld [vmem:[%s1890_s4] sm:$0xff]  }
  0x3f   : > { %v1775_v3 = vld [vmem:[%s561_s24] sm:$0xf]  ;;  %1380 = vmatprep.subr.bf16.mxu0 %v1593_v0 }
  0x41   : > { %1371 = vmatmul.mubr.msk.bf16.vlgmr.msra.gmra.mxu0 %vm609_vm1, %v1775_v3 }
  0x42   : > { %1382 = vmatprep.mubr.msk.bf16.mxu0 %vm1594_vm0, %v1593_v0 }
 0x101   : > { %v647_v5 = vpop.f32.mrf.mxu0 }
 0x102   : > { %v648_v6 = vadd.f32 %v1314_v4, %v647_v5 }
 0x103   : > { %v1372_v7 = vpop.f32.mrf.mxu0 }
 0x104   : > { %v1785_v8 = vpack.c.bf16 %v648_v6, %v648_v6  ;;  %659 = vrot.lane.b32.xlu0 %v648_v6, %s1595_s17 }
 0x105   : > { %v650_v9 = vpop.f32.mrf.mxu0 }
 0x106   : > { %665 = vrot.lane.b32.xlu1 %v1785_v8, %s1596_s18 }
 0x107   : > { %v1373_v10 = vpop.f32.mrf.mxu0 }
 0x176   : > { %v660_v11 = vpop.permute.xlu0 %659 }
 0x177   : > { %v663_v12 = vpack.c.bf16 %v660_v11, %v660_v11 }
 0x178   : > { %v666_v13 = vpop.permute.xlu1 %665 }
 0x179   : > { %715 = vrot.lane.b32.xlu0 %v663_v12, %s1596_s18  ;;  %v672_v14 = vsel %vm667_vm2, %v666_v13, 0  ;;  %s568_s18 = scalar_lea.vmem %s1902_s16, %s1311_s23 }
 0x17a   : > { %1375 = vmatpush3.bf16.xpose.msra.mxu1 %v672_v14 }
 0x17b   : > { %1386 = vmatprep.subr.bf16.mxu1 %v1593_v0 }
 0x181   : > { %1377 = vmatmul.mubr.msk.bf16.vlgmr.msra.gmra.mxu1 %vm667_vm2, %v1785_v8 }
 0x182   : > { %1388 = vmatprep.mubr.msk.bf16.mxu1 %vm1594_vm0, %v1593_v0 }
 0x1eb   : > { %v716_v15 = vpop.permute.xlu0 %715 }
 0x1ec   : > { %v721_v16 = vsel %vm667_vm2, %v716_v15, 0  ;;  %v1322_v15 = vld [vmem:[%s1891_s5] ss:$0 sm:$0xff] }
 0x1ed   : > { %1381 = vmatpush3.bf16.xpose.msra.mxu0 %v721_v16  ;;  %v571_v16 = vunpack.c.l.bf16 %v1775_v3  ;;  %v1476_v3 = vld [vmem:[%s1894_s8 + $0x8] sm:$0xff]  }
 0x1ee   : > { %1392 = vmatprep.subr.bf16.mxu0 %v1593_v0 }
 0x1f4   : > { %1383 = vmatmul.mubr.msk.bf16.vlgmr.msra.gmra.mxu0 %vm667_vm2, %v663_v12 }
 0x1f5   : > { %1394 = vmatprep.mubr.msk.bf16.mxu0 %vm1594_vm0, %v1593_v0 }
 0x241   : > { %v708_v24 = vpop.f32.mrf.mxu1 }
 0x242   : > { %v763_v25 = vmul.f32 0.25, %v708_v24 }
 0x243   : > { %v1378_v26 = vpop.f32.mrf.mxu1 }
 0x244   : > { %v765_v27 = vadd.f32 %v763_v25, %v585_v23 }
 0x245   : > { %v711_v28 = vpop.f32.mrf.mxu1 }
 0x246   : > { %v768_v29 = vsel %vm767_vm4, %v765_v27, -inf }
 0x247   : > { %769 = vmax.xlane.f32.xlu0 %v768_v29  ;;  %v1379_v30 = vpop.f32.mrf.mxu1  ;;  %v1477_v29 = vld [vmem:[%s1894_s8] sm:$0xff]  }
 0x248   : > { %v1478_v30 = vld [vmem:[%s1896_s10 + $0x18] sm:$0xff]  }
 0x2b4   : > { %v757_v31 = vpop.f32.mrf.mxu0 }
 0x2b5   : > { %v764_v32 = vmul.f32 0.25, %v757_v31  ;;  %v1479_v31 = vld [vmem:[%s1896_s10 + $0x10] sm:$0xff]  }
 0x2b6   : > { %v1384_v33 = vpop.f32.mrf.mxu0 }
 0x2b7   : > { %v766_v34 = vadd.f32 %v764_v32, %v585_v23 }
 0x2b8   : > { %v760_v35 = vpop.f32.mrf.mxu0 }
 0x2b9   : > { %v771_v36 = vsel %vm767_vm4, %v766_v34, -inf }
 0x2ba   : > { %772 = vmax.xlane.f32.xlu1 %v771_v36  ;;  %v1385_v37 = vpop.f32.mrf.mxu0  ;;  %v1326_v36 = vld [vmem:[%s1892_s6] ss:$0 sm:$0xff] }
 0x2cb   : > { %847 = vrot.lane.b32.xlu1 %v663_v12, %s1598_s19 }
 0x2d0   : > { %v770_v38 = vpop.xlane.xlu0 %769 }
 0x2d1   : > { %v774_v39 = vmax.f32 %v770_v38, -1e+30  ;;  %v1327_v38 = vld [vmem:[%s1893_s7] ss:$0 sm:$0xff] }
 0x2d3   : > { %v776_v41 = vsub.f32 %v765_v27, %v774_v39 }
 0x2d5   : > { %v778_v45 = vmul.f32 1.442695, %v776_v41 }
 0x343   : > { %v773_v40 = vpop.xlane.xlu1 %772 }
 0x344   : > { %v775_v42 = vmax.f32 %v773_v40, -1e+30 }
 0x346   : > { %v777_v43 = vsub.f32 %v766_v34, %v775_v42  ;;  %v1480_v42 = vld [vmem:[%s1896_s10 + $0x8] sm:$0xff]  }
 0x347   : > { %v848_v44 = vpop.permute.xlu1 %847 }
 0x348   : > { %v780_v46 = vmul.f32 1.442695, %v777_v43  ;;  %v853_v47 = vsel %vm803_vm5, %v848_v44, 0  ;;  %v1481_v43 = vld [vmem:[%s1896_s10] sm:$0xff]  }
 0x349   : > { %1393 = vmatpush3.bf16.msra.mxu0 %v853_v47  ;;  %v1328_v44 = vld [vmem:[%s1895_s9] ss:$0 sm:$0xff] }
 0x34a   : > { %1482 = vpow2.f32 %v780_v46  ;;  %1406 = vmatprep.subr.bf16.mxu0 %v1593_v0 }
 0x34b   : > { %1484 = vpow2.f32 %v778_v45 }
 0x357   : > { %v1483_v48 = vpop.eup %1482 }
 0x358   : > { %v785_v49 = vsel %vm767_vm4, %v1483_v48, 0.0  ;;  %v1485_v50 = vpop.eup %1484 }
 0x359   : > { %786 = vadd.xlane.f32.xlu0 %v785_v49  ;;  %v782_v51 = vsel %vm767_vm4, %v1485_v50, 0.0 }
 0x35d   : > { %783 = vadd.xlane.f32.xlu0 %v782_v51 }
 0x373   : > { %798 = vrot.lane.b32.xlu0 %v1785_v8, %s1598_s19 }
 0x3e2   : > { %v787_v52 = vpop.xlane.xlu0 %786 }
 0x3e3   : > { %vm789_vm6 = vcmp.gt.f32.partialorder %v787_v52, 0.0 }
 0x3e4   : > { %v791_v53 = vsel %vm789_vm6, %v787_v52, 1.0  ;;  %v1332_v52 = vld [vmem:[#allocation2] ss:$0 sm:$0xff] }
 0x3e5   : > { %1486 = vrcp.f32 %v791_v53 }
 0x3e6   : > { %v784_v54 = vpop.xlane.xlu0 %783 }
 0x3e7   : > { %vm788_vm7 = vcmp.gt.f32.partialorder %v784_v54, 0.0 }
 0x3e8   : > { %v790_v55 = vsel %vm788_vm7, %v784_v54, 1.0 }
 0x3e9   : > { %1488 = vrcp.f32 %v790_v55 }
 0x3ea   : > { %v799_v56 = vpop.permute.xlu0 %798 }
 0x3eb   : > { %v805_v57 = vsel %vm803_vm5, %v799_v56, 0 }
 0x3ec   : > { %1387 = vmatpush3.bf16.msra.mxu1 %v805_v57 }
 0x3ed   : > { %1398 = vmatprep.subr.bf16.mxu1 %v1593_v0 }
 0x3f2   : > { %v1487_v58 = vpop.eup %1486 }
 0x3f3   : > { %v795_v59 = vmul.f32 %v1487_v58, %v1483_v48 }
 0x3f5   : > { %v797_v60 = vpack.c.bf16 %v795_v59, %v795_v59 }
 0x3f6   : > { %v1489_v61 = vpop.eup %1488 }
 0x3f7   : > { %1395 = vmatmul.mubr.msk.bf16.vlgmr.msra.gmra.mxu0 %vm767_vm4, %v797_v60  ;;  %v794_v62 = vmul.f32 %v1489_v61, %v1485_v50 }
 0x3f8   : > { %1410 = vmatprep.mubr.msk.bf16.mxu0 %vm1594_vm0, %v1593_v0  ;;  %1407 = vmatpush3.bf16.msra.mxu0 %v1476_v3 }
 0x3f9   : > { %v796_v63 = vpack.c.bf16 %v794_v62, %v794_v62  ;;  %1408 = vmatprep.subr.bf16.mxu0 %v1593_v0 }
 0x3fb   : > { %1389 = vmatmul.mubr.msk.bf16.vlgmr.msra.gmra.mxu1 %vm767_vm4, %v796_v63 }
 0x3fc   : > { %1402 = vmatprep.mubr.msk.bf16.mxu1 %vm1594_vm0, %v1593_v0  ;;  %1399 = vmatpush3.bf16.msra.mxu1 %v1474_v1 }
 0x3fd   : > { %1400 = vmatprep.subr.bf16.mxu1 %v1593_v0  ;;  %1409 = vmatpush3.bf16.msra.mxu0 %v1477_v29 }
 0x400   : > { %1401 = vmatpush3.bf16.msra.mxu1 %v1475_v2 }
 0x401   : > { %1414 = vmatprep.subr.bf16.mxu1 %v1593_v0 }
 0x4b7   : > { %v889_v4 = vpop.f32.mrf.mxu0 }
 0x4b8   : > { %896 = vrot.lane.b32.xlu1 %v889_v4, %s1599_s25 }
 0x4b9   : > { %v1396_v5 = vpop.f32.mrf.mxu0 }
 0x4bb   : > { %v841_v6 = vpop.f32.mrf.mxu1  ;;  %v892_v7 = vpop.f32.mrf.mxu0 }
 0x4bd   : > { %v1390_v8 = vpop.f32.mrf.mxu1  ;;  %v1397_v9 = vpop.f32.mrf.mxu0 }
 0x4be   : > { %v1339_v8 = vld [vmem:[#allocation6] ss:$0 sm:$0xff] }
 0x4bf   : > { %v844_v10 = vpop.f32.mrf.mxu1 }
 0x4c1   : > { %v1391_v11 = vpop.f32.mrf.mxu1 }
 0x52a   : > { %v897_v12 = vpop.permute.xlu1 %896 }
 0x52b   : > { %v899_v13 = vsel %vm667_vm2, %v841_v6, %v897_v12  ;;  %v1338_v6 = vld [vmem:[#allocation4] ss:$0 sm:$0xff] }
 0x52c   : > { %v900_v14 = vpack.c.bf16 %v899_v13, %v899_v13 }
 0x52e   : > { %1403 = vmatmul.mubr.msk.bf16.vlgmr.msra.gmra.mxu1 %vm609_vm1, %v900_v14 }
 0x52f   : > { %1422 = vmatprep.mubr.msk.bf16.mxu1 %vm1594_vm0, %v1593_v0  ;;  %1415 = vmatpush3.bf16.msra.mxu1 %v1478_v30 }
 0x530   : > { %1416 = vmatprep.subr.bf16.mxu1 %v1593_v0 }
 0x533   : > { %1417 = vmatpush3.bf16.msra.mxu1 %v1479_v31 }
 0x534   : > { %1418 = vmatprep.subr.bf16.mxu1 %v1593_v0 }
 0x537   : > { %1419 = vmatpush3.bf16.msra.mxu1 %v1480_v42 }
 0x538   : > { %1420 = vmatprep.subr.bf16.mxu1 %v1593_v0 }
 0x53b   : > { %1421 = vmatpush3.bf16.msra.mxu1 %v1481_v43 }
 0x5ee   : > { %v956_v17 = vpop.f32.mrf.mxu1 }
 0x5ef   : > { %v957_v18 = vadd.f32 %v1322_v15, %v956_v17 }
 0x5f0   : > { %v1404_v19 = vpop.f32.mrf.mxu1 }
 0x5f1   : > { %v962_v20 = vadd.f32 %v957_v18, %v571_v16 }
 0x5f2   : > { %v959_v21 = vpop.f32.mrf.mxu1 }
 0x5f3   : > { %v965_v22 = vsel %vm609_vm1, %v962_v20, 0.0  ;;  %v1340_v21 = vld [vmem:[%s1900_s14] ss:$0 sm:$0xff] }
 0x5f4   : > { %v1405_v23 = vpop.f32.mrf.mxu1  ;;  %966 = vadd.xlane.f32.xlu1 %v965_v22 }
 0x5f5   : > { %v1341_v23 = vld [vmem:[%s1901_s15] ss:$0 sm:$0xff] }
 0x67d   : > { %v967_v24 = vpop.xlane.xlu1 %966 }
 0x67e   : > { %v969_v25 = vmul.f32 0.03125, %v967_v24 }
 0x680   : > { %v970_v26 = vsub.f32 %v962_v20, %v969_v25 }
 0x682   : > { %v971_v27 = vmul.f32 %v970_v26, %v970_v26 }
 0x684   : > { %v972_v28 = vsel %vm609_vm1, %v971_v27, 0.0 }
 0x685   : > { %973 = vadd.xlane.f32.xlu0 %v972_v28 }
 0x70e   : > { %v974_v32 = vpop.xlane.xlu0 %973 }
 0x70f   : > { %v975_v33 = vmul.f32 0.03125, %v974_v32 }
 0x711   : > { %v976_v34 = vadd.f32 1e-05, %v975_v33 }
 0x713   : > { %1490 = vrsqrt.f32 %v976_v34 }
 0x720   : > { %v1491_v35 = vpop.eup %1490 }
 0x721   : > { %v978_v37 = vmul.f32 %v1491_v35, %v970_v26 }
 0x723   : > { %v985_v39 = vmul.f32 %v1326_v36, %v978_v37 }
 0x725   : > { %v992_v40 = vadd.f32 %v1327_v38, %v985_v39 }
 0x727   : > { %v1007_v41 = vpack.c.bf16 %v992_v40, %v992_v40 }
 0x729   : > { %1411 = vmatmul.mubr.msk.bf16.vlgmr.msra.gmra.mxu0 %vm609_vm1, %v1007_v41 }
 0x7e9   : > { %v1063_v45 = vpop.f32.mrf.mxu0 }
 0x7ea   : > { %v1064_v46 = vadd.f32 %v1328_v44, %v1063_v45 }
 0x7eb   : > { %v1412_v47 = vpop.f32.mrf.mxu0 }
 0x7ec   : > { %v1069_v48 = vmax.f32 %v1064_v46, 0.0 }
 0x7ed   : > { %v1066_v49 = vpop.f32.mrf.mxu0 }
 0x7ee   : > { %v1070_v50 = vpack.c.bf16 %v1069_v48, %v1069_v48 }
 0x7ef   : > { %v1413_v51 = vpop.f32.mrf.mxu0 }
 0x7f0   : > { %1423 = vmatmul.mubr.msk.bf16.vlgmr.msra.gmra.mxu1 %vm1101_vm8, %v1070_v50 }
 0x8b0   : > { %v1139_v0 = vpop.f32.mrf.mxu1 }
 0x8b1   : > { %v1140_v53 = vadd.f32 %v1332_v52, %v1139_v0 }
 0x8b2   : > { %v1424_v54 = vpop.f32.mrf.mxu1 }
 0x8b3   : > { %v1145_v55 = vadd.f32 %v1140_v53, %v992_v40 }
 0x8b4   : > { %v1142_v56 = vpop.f32.mrf.mxu1 }
 0x8b5   : > { %v1148_v57 = vsel %vm609_vm1, %v1145_v55, 0.0 }
 0x8b6   : > { %1149 = vadd.xlane.f32.xlu1 %v1148_v57  ;;  %v1425_v58 = vpop.f32.mrf.mxu1 }
 0x93f   : > { %v1150_v59 = vpop.xlane.xlu1 %1149 }
 0x940   : > { %v1151_v60 = vmul.f32 0.03125, %v1150_v59 }
 0x942   : > { %v1152_v61 = vsub.f32 %v1145_v55, %v1151_v60 }
 0x944   : > { %v1153_v62 = vmul.f32 %v1152_v61, %v1152_v61 }
 0x946   : > { %v1154_v63 = vsel %vm609_vm1, %v1153_v62, 0.0 }
 0x947   : > { %1155 = vadd.xlane.f32.xlu0 %v1154_v63 }
 0x9d0   : > { %v1156_v1 = vpop.xlane.xlu0 %1155 }
 0x9d1   : > { %v1157_v2 = vmul.f32 0.03125, %v1156_v1 }
 0x9d3   : > { %v1158_v4 = vadd.f32 1e-05, %v1157_v2 }
 0x9d5   : > { %1492 = vrsqrt.f32 %v1158_v4 }
 0x9e2   : > { %v1493_v5 = vpop.eup %1492 }
 0x9e3   : > { %v1160_v7 = vmul.f32 %v1493_v5, %v1152_v61 }
 0x9e5   : > { %v1167_v9 = vmul.f32 %v1338_v6, %v1160_v7 }
 0x9e7   : > { %v1174_v10 = vadd.f32 %v1339_v8, %v1167_v9 }
 0x9e9   : > { %v1177_v11 = vsel %vm609_vm1, %v1174_v10, 0.0 }
 0x9ea   : > { %1178 = vadd.xlane.f32.xlu1 %v1177_v11 }
 0xa73   : > { %v1179_v12 = vpop.xlane.xlu1 %1178 }
 0xa74   : > { %v1180_v13 = vmul.f32 0.03125, %v1179_v12 }
 0xa76   : > { %v1181_v14 = vsub.f32 %v1174_v10, %v1180_v13 }
 0xa78   : > { %v1182_v15 = vmul.f32 %v1181_v14, %v1181_v14 }
 0xa7a   : > { %v1183_v16 = vsel %vm609_vm1, %v1182_v15, 0.0 }
 0xa7b   : > { %1184 = vadd.xlane.f32.xlu0 %v1183_v16 }
 0xb04   : > { %v1185_v17 = vpop.xlane.xlu0 %1184 }
 0xb05   : > { %v1186_v18 = vmul.f32 0.03125, %v1185_v17 }
 0xb07   : > { %v1187_v19 = vadd.f32 1e-05, %v1186_v18 }
 0xb09   : > { %1494 = vrsqrt.f32 %v1187_v19 }
 0xb16   : > { %v1495_v20 = vpop.eup %1494 }
 0xb17   : > { %v1189_v22 = vmul.f32 %v1495_v20, %v1181_v14 }
 0xb19   : > { %v1196_v24 = vmul.f32 %v1340_v21, %v1189_v22 }
 0xb1b   : > { %v1203_v25 = vadd.f32 %v1341_v23, %v1196_v24 }
 0xb1d   : > { %v1204_v26 = vpack.c.bf16 %v1203_v25, %v1203_v25 }
 0xb1f   : > { %1206 = vst.msk [vmem:[%s568_s18] sm:$0xf] %vm1205_vm9, %v1204_v26 }
 0xb20 PF: > { %s28_s21 = sadd.s32 1, %s1588_s21  }
 0xb21   : > { %p25_p3 = scmp.ge.s32.totalorder %s28_s21, 4  }
 0xb23   :  { %27 = sbr.rel (!%p25_p3) target bundleno = 4 (0x4), region = 130 }
 0xb28   :  { %1226 = vsyncpa [#allocation3], 1 }
 0xb29   :  { %1228 = vsyncpa [#allocation3 + $0x1], 1 }
 0xb2a   :  { %1229 = vsyncpa [#allocation5], 1 }

// kernel: transformer_forward.5
= control target key start
LH: loop header
LB: loop body
LE: loop exit
PB: predicated region body
PF: predicated region fallthrough
CT: control target
= control target key end

     0   :  { %s1457_s21 = smov 0   ;;  %s1598_s0 = inlined_call_operand.vmem [shape: bf16[2,8,32], index: 0, kind: input, shape index: {}]   ;;  %s1599_s1 = inlined_call_operand.vmem [shape: f32[2,1,8], index: 1, kind: input, shape index: {}]   ;;  %s1600_s2 = inlined_call_operand.vmem [shape: bf16[32,96], index: 2, kind: input, shape index: {}]   ;;  %s1601_s3 = inlined_call_operand.vmem [shape: f32[1,96], index: 3, kind: input, shape index: {}]   ;;  %s1602_s4 = inlined_call_operand.vmem [shape: bf16[32,32], index: 4, kind: input, shape index: {}]   ;;  %s1603_s5 = inlined_call_operand.vmem [shape: f32[1,32], index: 5, kind: input, shape index: {}]   ;;  %s1604_s6 = inlined_call_operand.vmem [shape: f32[1,32], index: 6, kind: input, shape index: {}]   ;;  %s1605_s7 = inlined_call_operand.vmem [shape: f32[1,32], index: 7, kind: input, shape index: {}]   ;;  %s1606_s8 = inlined_call_operand.vmem [shape: bf16[32,64], index: 8, kind: input, shape index: {}]   ;;  %s1607_s9 = inlined_call_operand.vmem [shape: f32[1,64], index: 9, kind: input, shape index: {}]   ;;  %s1608_s10 = inlined_call_operand.vmem [shape: bf16[64,32], index: 10, kind: input, shape index: {}]   ;;  %s1609_s11 = inlined_call_operand.vmem [shape: f32[1,32], index: 11, kind: input, shape index: {}]   ;;  %s1610_s12 = inlined_call_operand.vmem [shape: f32[1,32], index: 12, kind: input, shape index: {}]   ;;  %s1611_s13 = inlined_call_operand.vmem [shape: f32[1,32], index: 13, kind: input, shape index: {}]   ;;  %s1612_s14 = inlined_call_operand.vmem [shape: f32[1,32], index: 14, kind: input, shape index: {}]   ;;  %s1613_s15 = inlined_call_operand.vmem [shape: f32[1,32], index: 15, kind: input, shape index: {}]   ;;  %s1614_s16 = inlined_call_operand.vmem [shape: bf16[2,8,32], index: 16, kind: output, shape index: {}]  }
   0x1   :  { %1615 = sst [smem:[#allocation2_spill]] %s1598_s0 }
   0x2 LB: > { %s1202_s22 = sadd.s32 4294967295, %s1363_s21   ;;  %p1206_p0 = scmp.ge.s32.totalorder %s1363_s21, 1  ;;  %s1363_s21 = sphi %s1457_s21, %s26_s21  }
   0x3   : > { %p469_p1 = scmp.lt.s32.totalorder %s1363_s21, 3 }
   0x5   : > { %p470_p2 = pnand %p1206_p0, %p469_p1 }
   0x6   : > { %p520_p3 = scmp.lt.s32.totalorder (!%p470_p2), %s1202_s22, 1  ;;  %s1616_s28 = sld [smem:[#allocation2_spill]] (!%p470_p2) }
   0x7   : > { %473 = sbr.rel (%p470_p2) target bundleno = 2496 (0x9c0), region = 84  ;;  %s1367_s17 = smov (!%p470_p2), 112  }
   0x8   : > { %s1368_s18 = smov (!%p470_p2), 96   ;;  %s1370_s15 = smov (!%p470_p2), 64  }
   0xc   : > { %v1335_v0 = vld [vmem:[%s1600_s2 + $0x8] sm:$0xff]   ;;  %v1365_v1 = vmov 0.0   ;;  %v1336_v2 = vld [vmem:[%s1600_s2] sm:$0xff]   ;;  %vm1366_vm0 = vmmov 0   ;;  %s1618_s22 = smov (!%p520_p3, %s1202_s22), 1  ;;  %vm571_vm1 = vcmask 261120   ;;  %v534_v17 = vlaneseq }
   0xd   : > { %1260 = vmatprep.subr.bf16.mxu0 %v1365_v1  ;;  %1268 = vmatprep.subr.bf16.mxu1 %v1365_v1  ;;  %s1207_s25 = sshll.u32 %s1618_s22, 2  ;;  %v1210_v4 = vld [vmem:[%s1601_s3] ss:$0 sm:$0xff]  ;;  %vm629_vm2 = vcmask 130048   ;;  %s526_s14 = scalar_lea.vmem %s1599_s1, %s1618_s22  ;;  %v1369_v20 = vmov -inf   ;;  %vm729_vm4 = vcmask 64512  }
   0xe   : > { %1261 = vmatpush3.bf16.msra.mxu0 %v1335_v0  ;;  %1264 = vmatprep.mubr.msk.bf16.mxu0 %vm1366_vm0, %v1365_v1  ;;  %s523_s29 = scalar_lea.vmem %s1616_s28, %s1207_s25  ;;  %v535_v18 = vshrl.u32 %v534_v17, 7  ;;  %v537_v19 = vand.u32 127, %v534_v17  ;;  %v1209_v22 = vld [vmem:[%s526_s14] ss:$0 sm:$0xff]  ;;  %vm765_vm5 = vcmask 1043456   ;;  %v1337_v0 = vld [vmem:[%s1602_s4 + $0x8] sm:$0xff]  }
   0xf   : > { %1262 = vmatprep.subr.bf16.mxu0 %v1365_v1  ;;  %1270 = vmatprep.mubr.msk.bf16.mxu1 %vm1366_vm0, %v1365_v1  ;;  %v1487_v3 = vld [vmem:[%s523_s29] sm:$0xf]  ;;  %s1371_s28 = smov 16   ;;  %vm1063_vm8 = vcmask 523264   ;;  %s530_s29 = scalar_lea.vmem %s1614_s16, %s1207_s25  ;;  %vm1138_vm9 = vcmask 257024  }
  0x10   : > { %vm538_vm3 = vcmp.le.s32.totalorder %v537_v19, %v535_v18 }
  0x11   : > { %v539_v21 = vsel %vm538_vm3, 0.0, %v1369_v20 }
  0x12   : > { %1263 = vmatpush3.bf16.msra.mxu0 %v1336_v2  ;;  %v547_v23 = vadd.f32 %v1209_v22, %v539_v21  ;;  %v1338_v2 = vld [vmem:[%s1602_s4] sm:$0xff]  }
  0x13   : > { %1274 = vmatprep.subr.bf16.mxu0 %v1365_v1 }
  0x15   : > { %1265 = vmatmul.mubr.msk.bf16.vlgmr.msra.gmra.mxu0 %vm571_vm1, %v1487_v3 }
  0x16   : > { %1276 = vmatprep.mubr.msk.bf16.mxu0 %vm1366_vm0, %v1365_v1 }
  0xd5   : > { %v609_v5 = vpop.f32.mrf.mxu0 }
  0xd6   : > { %v610_v6 = vadd.f32 %v1210_v4, %v609_v5 }
  0xd7   : > { %v1266_v7 = vpop.f32.mrf.mxu0 }
  0xd8   : > { %v1496_v8 = vpack.c.bf16 %v610_v6, %v610_v6  ;;  %621 = vrot.lane.b32.xlu0 %v610_v6, %s1367_s17 }
  0xd9   : > { %v612_v9 = vpop.f32.mrf.mxu0 }
  0xda   : > { %627 = vrot.lane.b32.xlu1 %v1496_v8, %s1368_s18 }
  0xdb   : > { %v1267_v10 = vpop.f32.mrf.mxu0 }
 0x14a   : > { %v622_v11 = vpop.permute.xlu0 %621 }
 0x14b   : > { %v625_v12 = vpack.c.bf16 %v622_v11, %v622_v11 }
 0x14c   : > { %v628_v13 = vpop.permute.xlu1 %627 }
 0x14d   : > { %677 = vrot.lane.b32.xlu0 %v625_v12, %s1368_s18  ;;  %v634_v14 = vsel %vm629_vm2, %v628_v13, 0 }
 0x14e   : > { %1269 = vmatpush3.bf16.xpose.msra.mxu1 %v634_v14 }
 0x14f   : > { %1280 = vmatprep.subr.bf16.mxu1 %v1365_v1 }
 0x155   : > { %1271 = vmatmul.mubr.msk.bf16.vlgmr.msra.gmra.mxu1 %vm629_vm2, %v1496_v8 }
 0x156   : > { %1282 = vmatprep.mubr.msk.bf16.mxu1 %vm1366_vm0, %v1365_v1 }
 0x1bf   : > { %v678_v15 = vpop.permute.xlu0 %677 }
 0x1c0   : > { %v683_v16 = vsel %vm629_vm2, %v678_v15, 0  ;;  %v1218_v15 = vld [vmem:[%s1603_s5] ss:$0 sm:$0xff] }
 0x1c1   : > { %1275 = vmatpush3.bf16.xpose.msra.mxu0 %v683_v16  ;;  %v533_v16 = vunpack.c.l.bf16 %v1487_v3  ;;  %v1339_v3 = vld [vmem:[%s1606_s8 + $0x8] sm:$0xff]  }
 0x1c2   : > { %1286 = vmatprep.subr.bf16.mxu0 %v1365_v1 }
 0x1c8   : > { %1277 = vmatmul.mubr.msk.bf16.vlgmr.msra.gmra.mxu0 %vm629_vm2, %v625_v12 }
 0x1c9   : > { %1288 = vmatprep.mubr.msk.bf16.mxu0 %vm1366_vm0, %v1365_v1 }
 0x215   : > { %v670_v24 = vpop.f32.mrf.mxu1 }
 0x216   : > { %v725_v25 = vmul.f32 0.25, %v670_v24 }
 0x217   : > { %v1272_v26 = vpop.f32.mrf.mxu1 }
 0x218   : > { %v727_v27 = vadd.f32 %v725_v25, %v547_v23 }
 0x219   : > { %v673_v28 = vpop.f32.mrf.mxu1 }
 0x21a   : > { %v730_v29 = vsel %vm729_vm4, %v727_v27, -inf }
 0x21b   : > { %731 = vmax.xlane.f32.xlu0 %v730_v29  ;;  %v1273_v30 = vpop.f32.mrf.mxu1  ;;  %v1340_v29 = vld [vmem:[%s1606_s8] sm:$0xff]  }
 0x21c   : > { %v1341_v30 = vld [vmem:[%s1608_s10 + $0x18] sm:$0xff]  }
 0x288   : > { %v719_v31 = vpop.f32.mrf.mxu0 }
 0x289   : > { %v726_v32 = vmul.f32 0.25, %v719_v31  ;;  %v1342_v31 = vld [vmem:[%s1608_s10 + $0x10] sm:$0xff]  }
 0x28a   : > { %v1278_v33 = vpop.f32.mrf.mxu0 }
 0x28b   : > { %v728_v34 = vadd.f32 %v726_v32, %v547_v23 }
 0x28c   : > { %v722_v35 = vpop.f32.mrf.mxu0 }
 0x28d   : > { %v733_v36 = vsel %vm729_vm4, %v728_v34, -inf }
 0x28e   : > { %734 = vmax.xlane.f32.xlu1 %v733_v36  ;;  %v1279_v37 = vpop.f32.mrf.mxu0  ;;  %v1222_v36 = vld [vmem:[%s1604_s6] ss:$0 sm:$0xff] }
 0x29f   : > { %809 = vrot.lane.b32.xlu1 %v625_v12, %s1370_s15 }
 0x2a4   : > { %v732_v38 = vpop.xlane.xlu0 %731 }
 0x2a5   : > { %v736_v39 = vmax.f32 %v732_v38, -1e+30  ;;  %v1223_v38 = vld [vmem:[%s1605_s7] ss:$0 sm:$0xff] }
 0x2a7   : > { %v738_v41 = vsub.f32 %v727_v27, %v736_v39 }
 0x2a9   : > { %v740_v45 = vmul.f32 1.442695, %v738_v41 }
 0x317   : > { %v735_v40 = vpop.xlane.xlu1 %734 }
 0x318   : > { %v737_v42 = vmax.f32 %v735_v40, -1e+30 }
 0x31a   : > { %v739_v43 = vsub.f32 %v728_v34, %v737_v42  ;;  %v1343_v42 = vld [vmem:[%s1608_s10 + $0x8] sm:$0xff]  }
 0x31b   : > { %v810_v44 = vpop.permute.xlu1 %809 }
 0x31c   : > { %v742_v46 = vmul.f32 1.442695, %v739_v43  ;;  %v815_v47 = vsel %vm765_vm5, %v810_v44, 0  ;;  %v1344_v43 = vld [vmem:[%s1608_s10] sm:$0xff]  }
 0x31d   : > { %1287 = vmatpush3.bf16.msra.mxu0 %v815_v47  ;;  %v1224_v44 = vld [vmem:[%s1607_s9] ss:$0 sm:$0xff] }
 0x31e   : > { %1345 = vpow2.f32 %v742_v46  ;;  %1300 = vmatprep.subr.bf16.mxu0 %v1365_v1 }
 0x31f   : > { %1347 = vpow2.f32 %v740_v45 }
 0x32b   : > { %v1346_v48 = vpop.eup %1345 }
 0x32c   : > { %v747_v49 = vsel %vm729_vm4, %v1346_v48, 0.0  ;;  %v1348_v50 = vpop.eup %1347 }
 0x32d   : > { %748 = vadd.xlane.f32.xlu0 %v747_v49  ;;  %v744_v51 = vsel %vm729_vm4, %v1348_v50, 0.0 }
 0x331   : > { %745 = vadd.xlane.f32.xlu0 %v744_v51 }
 0x347   : > { %760 = vrot.lane.b32.xlu0 %v1496_v8, %s1370_s15 }
 0x3b6   : > { %v749_v52 = vpop.xlane.xlu0 %748 }
 0x3b7   : > { %vm751_vm6 = vcmp.gt.f32.partialorder %v749_v52, 0.0 }
 0x3b8   : > { %v753_v53 = vsel %vm751_vm6, %v749_v52, 1.0 }
 0x3b9   : > { %1349 = vrcp.f32 %v753_v53 }
 0x3ba   : > { %v746_v54 = vpop.xlane.xlu0 %745 }
 0x3bb   : > { %vm750_vm7 = vcmp.gt.f32.partialorder %v746_v54, 0.0 }
 0x3bc   : > { %v752_v55 = vsel %vm750_vm7, %v746_v54, 1.0 }
 0x3bd   : > { %1351 = vrcp.f32 %v752_v55 }
 0x3be   : > { %v761_v56 = vpop.permute.xlu0 %760 }
 0x3bf   : > { %v767_v57 = vsel %vm765_vm5, %v761_v56, 0 }
 0x3c0   : > { %1281 = vmatpush3.bf16.msra.mxu1 %v767_v57 }
 0x3c1   : > { %1292 = vmatprep.subr.bf16.mxu1 %v1365_v1 }
 0x3c6   : > { %v1350_v58 = vpop.eup %1349 }
 0x3c7   : > { %v757_v59 = vmul.f32 %v1350_v58, %v1346_v48 }
 0x3c9   : > { %v759_v60 = vpack.c.bf16 %v757_v59, %v757_v59 }
 0x3ca   : > { %v1352_v61 = vpop.eup %1351 }
 0x3cb   : > { %1289 = vmatmul.mubr.msk.bf16.vlgmr.msra.gmra.mxu0 %vm729_vm4, %v759_v60  ;;  %v756_v62 = vmul.f32 %v1352_v61, %v1348_v50 }
 0x3cc   : > { %1304 = vmatprep.mubr.msk.bf16.mxu0 %vm1366_vm0, %v1365_v1  ;;  %1301 = vmatpush3.bf16.msra.mxu0 %v1339_v3 }
 0x3cd   : > { %v758_v63 = vpack.c.bf16 %v756_v62, %v756_v62  ;;  %1302 = vmatprep.subr.bf16.mxu0 %v1365_v1 }
 0x3cf   : > { %1283 = vmatmul.mubr.msk.bf16.vlgmr.msra.gmra.mxu1 %vm729_vm4, %v758_v63 }
 0x3d0   : > { %1296 = vmatprep.mubr.msk.bf16.mxu1 %vm1366_vm0, %v1365_v1  ;;  %1293 = vmatpush3.bf16.msra.mxu1 %v1337_v0 }
 0x3d1   : > { %1294 = vmatprep.subr.bf16.mxu1 %v1365_v1  ;;  %1303 = vmatpush3.bf16.msra.mxu0 %v1340_v29 }
 0x3d4   : > { %1295 = vmatpush3.bf16.msra.mxu1 %v1338_v2 }
 0x3d5   : > { %1308 = vmatprep.subr.bf16.mxu1 %v1365_v1 }
 0x48b   : > { %v851_v4 = vpop.f32.mrf.mxu0 }
 0x48c   : > { %858 = vrot.lane.b32.xlu1 %v851_v4, %s1371_s28 }
 0x48d   : > { %v1290_v5 = vpop.f32.mrf.mxu0 }
 0x48f   : > { %v803_v6 = vpop.f32.mrf.mxu1  ;;  %v854_v7 = vpop.f32.mrf.mxu0 }
 0x491   : > { %v1284_v8 = vpop.f32.mrf.mxu1  ;;  %v1291_v9 = vpop.f32.mrf.mxu0 }
 0x492   : > { %v1235_v8 = vld [vmem:[%s1611_s13] ss:$0 sm:$0xff] }
 0x493   : > { %v806_v10 = vpop.f32.mrf.mxu1 }
 0x495   : > { %v1285_v11 = vpop.f32.mrf.mxu1 }
 0x4fe   : > { %v859_v12 = vpop.permute.xlu1 %858 }
 0x4ff   : > { %v861_v13 = vsel %vm629_vm2, %v803_v6, %v859_v12  ;;  %v1234_v6 = vld [vmem:[%s1610_s12] ss:$0 sm:$0xff] }
 0x500   : > { %v862_v14 = vpack.c.bf16 %v861_v13, %v861_v13 }
 0x502   : > { %1297 = vmatmul.mubr.msk.bf16.vlgmr.msra.gmra.mxu1 %vm571_vm1, %v862_v14 }
 0x503   : > { %1316 = vmatprep.mubr.msk.bf16.mxu1 %vm1366_vm0, %v1365_v1  ;;  %1309 = vmatpush3.bf16.msra.mxu1 %v1341_v30 }
 0x504   : > { %1310 = vmatprep.subr.bf16.mxu1 %v1365_v1 }
 0x507   : > { %1311 = vmatpush3.bf16.msra.mxu1 %v1342_v31 }
 0x508   : > { %1312 = vmatprep.subr.bf16.mxu1 %v1365_v1 }
 0x50b   : > { %1313 = vmatpush3.bf16.msra.mxu1 %v1343_v42 }
 0x50c   : > { %1314 = vmatprep.subr.bf16.mxu1 %v1365_v1  ;;  %v1228_v1 = vld [vmem:[%s1609_s11] ss:$0 sm:$0xff] }
 0x50f   : > { %1315 = vmatpush3.bf16.msra.mxu1 %v1344_v43 }
 0x5c2   : > { %v918_v17 = vpop.f32.mrf.mxu1 }
 0x5c3   : > { %v919_v18 = vadd.f32 %v1218_v15, %v918_v17 }
 0x5c4   : > { %v1298_v19 = vpop.f32.mrf.mxu1 }
 0x5c5   : > { %v924_v20 = vadd.f32 %v919_v18, %v533_v16 }
 0x5c6   : > { %v921_v21 = vpop.f32.mrf.mxu1 }
 0x5c7   : > { %v927_v22 = vsel %vm571_vm1, %v924_v20, 0.0 }
 0x5c8   : > { %v1299_v23 = vpop.f32.mrf.mxu1  ;;  %928 = vadd.xlane.f32.xlu1 %v927_v22 }
 0x651   : > { %v929_v24 = vpop.xlane.xlu1 %928 }
 0x652   : > { %v931_v25 = vmul.f32 0.03125, %v929_v24 }
 0x654   : > { %v932_v26 = vsub.f32 %v924_v20, %v931_v25 }
 0x656   : > { %v933_v27 = vmul.f32 %v932_v26, %v932_v26 }
 0x658   : > { %v934_v28 = vsel %vm571_vm1, %v933_v27, 0.0 }
 0x659   : > { %935 = vadd.xlane.f32.xlu0 %v934_v28 }
 0x6e2   : > { %v936_v32 = vpop.xlane.xlu0 %935 }
 0x6e3   : > { %v937_v33 = vmul.f32 0.03125, %v936_v32 }
 0x6e5   : > { %v938_v34 = vadd.f32 1e-05, %v937_v33 }
 0x6e7   : > { %1353 = vrsqrt.f32 %v938_v34 }
 0x6f4   : > { %v1354_v35 = vpop.eup %1353 }
 0x6f5   : > { %v940_v37 = vmul.f32 %v1354_v35, %v932_v26 }
 0x6f7   : > { %v947_v39 = vmul.f32 %v1222_v36, %v940_v37 }
 0x6f9   : > { %v954_v40 = vadd.f32 %v1223_v38, %v947_v39 }
 0x6fb   : > { %v969_v41 = vpack.c.bf16 %v954_v40, %v954_v40 }
 0x6fd   : > { %1305 = vmatmul.mubr.msk.bf16.vlgmr.msra.gmra.mxu0 %vm571_vm1, %v969_v41 }
 0x7bd   : > { %v1025_v45 = vpop.f32.mrf.mxu0 }
 0x7be   : > { %v1026_v46 = vadd.f32 %v1224_v44, %v1025_v45 }
 0x7bf   : > { %v1306_v47 = vpop.f32.mrf.mxu0 }
 0x7c0   : > { %v1031_v48 = vmax.f32 %v1026_v46, 0.0 }
 0x7c1   : > { %v1028_v49 = vpop.f32.mrf.mxu0 }
 0x7c2   : > { %v1032_v50 = vpack.c.bf16 %v1031_v48, %v1031_v48 }
 0x7c3   : > { %v1307_v51 = vpop.f32.mrf.mxu0 }
 0x7c4   : > { %1317 = vmatmul.mubr.msk.bf16.vlgmr.msra.gmra.mxu1 %vm1063_vm8, %v1032_v50 }
 0x884   : > { %v1101_v52 = vpop.f32.mrf.mxu1 }
 0x885   : > { %v1102_v53 = vadd.f32 %v1228_v1, %v1101_v52 }
 0x886   : > { %v1318_v54 = vpop.f32.mrf.mxu1 }
 0x887   : > { %v1107_v55 = vadd.f32 %v1102_v53, %v954_v40 }
 0x888   : > { %v1104_v56 = vpop.f32.mrf.mxu1 }
 0x889   : > { %v1110_v57 = vsel %vm571_vm1, %v1107_v55, 0.0 }
 0x88a   : > { %1111 = vadd.xlane.f32.xlu1 %v1110_v57  ;;  %v1319_v58 = vpop.f32.mrf.mxu1 }
 0x913   : > { %v1112_v59 = vpop.xlane.xlu1 %1111 }
 0x914   : > { %v1113_v60 = vmul.f32 0.03125, %v1112_v59 }
 0x916   : > { %v1114_v61 = vsub.f32 %v1107_v55, %v1113_v60 }
 0x918   : > { %v1115_v62 = vmul.f32 %v1114_v61, %v1114_v61 }
 0x91a   : > { %v1116_v63 = vsel %vm571_vm1, %v1115_v62, 0.0 }
 0x91b   : > { %1117 = vadd.xlane.f32.xlu0 %v1116_v63 }
 0x9a4   : > { %v1118_v0 = vpop.xlane.xlu0 %1117 }
 0x9a5   : > { %v1119_v2 = vmul.f32 0.03125, %v1118_v0 }
 0x9a7   : > { %v1120_v4 = vadd.f32 1e-05, %v1119_v2 }
 0x9a9   : > { %1355 = vrsqrt.f32 %v1120_v4 }
 0x9b6   : > { %v1356_v5 = vpop.eup %1355 }
 0x9b7   : > { %v1122_v7 = vmul.f32 %v1356_v5, %v1114_v61 }
 0x9b9   : > { %v1129_v9 = vmul.f32 %v1234_v6, %v1122_v7 }
 0x9bb   : > { %v1136_v10 = vadd.f32 %v1235_v8, %v1129_v9 }
 0x9bd   : > { %v1137_v11 = vpack.c.bf16 %v1136_v10, %v1136_v10 }
 0x9bf   : > { %1139 = vst.msk [vmem:[%s530_s29] sm:$0xf] %vm1138_vm9, %v1137_v11 }
 0x9c0 PF: > { %s26_s21 = sadd.s32 1, %s1363_s21  }
 0x9c1   : > { %p23_p4 = scmp.ge.s32.totalorder %s26_s21, 4  }
 0x9c3   :  { %25 = sbr.rel (!%p23_p4) target bundleno = 2 (0x2), region = 117 }

// kernel: transformer_forward.7
= control target key start
LH: loop header
LB: loop body
LE: loop exit
PB: predicated region body
PF: predicated region fallthrough
CT: control target
= control target key end

     0   :  { %s2858_s0 = inlined_call_operand.vmem [shape: bf16[2,10,32], index: 0, kind: input, shape index: {}]   ;;  %s2859_s1 = inlined_call_operand.vmem [shape: bf16[2,8,32], index: 1, kind: input, shape index: {}]   ;;  %s2860_s2 = inlined_call_operand.vmem [shape: f32[2,1,10], index: 2, kind: input, shape index: {}]   ;;  %s2861_s3 = inlined_call_operand.vmem [shape: f32[2,1,8], index: 3, kind: input, shape index: {}]   ;;  %s2862_s4 = inlined_call_operand.vmem [shape: bf16[32,96], index: 4, kind: input, shape index: {}]   ;;  %s2863_s5 = inlined_call_operand.vmem [shape: f32[1,96], index: 5, kind: input, shape index: {}]   ;;  %s2864_s6 = inlined_call_operand.vmem [shape: bf16[32,32], index: 6, kind: input, shape index: {}]   ;;  %s2865_s7 = inlined_call_operand.vmem [shape: f32[1,32], index: 7, kind: input, shape index: {}]   ;;  %s2866_s8 = inlined_call_operand.vmem [shape: f32[1,32], index: 8, kind: input, shape index: {}]   ;;  %s2867_s9 = inlined_call_operand.vmem [shape: f32[1,32], index: 9, kind: input, shape index: {}]   ;;  %s2868_s10 = inlined_call_operand.vmem [shape: bf16[32,32], index: 10, kind: input, shape index: {}]   ;;  %s2869_s11 = inlined_call_operand.vmem [shape: f32[1,32], index: 11, kind: input, shape index: {}]   ;;  %s2870_s12 = inlined_call_operand.vmem [shape: bf16[32,64], index: 12, kind: input, shape index: {}]   ;;  %s2871_s13 = inlined_call_operand.vmem [shape: f32[1,64], index: 13, kind: input, shape index: {}]   ;;  %s2872_s14 = inlined_call_operand.vmem [shape: bf16[32,32], index: 14, kind: input, shape index: {}]   ;;  %s2873_s15 = inlined_call_operand.vmem [shape: f32[1,32], index: 15, kind: input, shape index: {}]   ;;  %s2874_s16 = inlined_call_operand.vmem [shape: f32[1,32], index: 16, kind: input, shape index: {}]   ;;  %s2875_s17 = inlined_call_operand.vmem [shape: f32[1,32], index: 17, kind: input, shape index: {}]   ;;  %s2876_s18 = inlined_call_operand.vmem [shape: bf16[32,64], index: 18, kind: input, shape index: {}]   ;;  %s2877_s19 = inlined_call_operand.vmem [shape: f32[1,64], index: 19, kind: input, shape index: {}]   ;;  %s2878_s20 = inlined_call_operand.vmem [shape: bf16[64,32], index: 20, kind: input, shape index: {}]   ;;  %s2879_s21 = inlined_call_operand.vmem [shape: f32[1,32], index: 21, kind: input, shape index: {}]   ;;  %s2880_s22 = inlined_call_operand.vmem [shape: f32[1,32], index: 22, kind: input, shape index: {}]   ;;  %s2881_s23 = inlined_call_operand.vmem [shape: f32[1,32], index: 23, kind: input, shape index: {}]   ;;  %s2882_s24 = inlined_call_operand.vmem [shape: bf16[2,10,32], index: 24, kind: output, shape index: {}]  }
   0x1   :  { %2891 = sst [smem:[#allocation2_spill]] %s2858_s0 }
   0x2   :  { %2892 = sst [smem:[#allocation3_spill]] %s2859_s1 }
   0x3   :  { %2893 = sst [smem:[#allocation4_spill]] %s2860_s2 }
   0x4   :  { %2894 = sst [smem:[#allocation5_spill]] %s2861_s3 }
   0x5   :  { %2895 = sst [smem:[#allocation6_spill]] %s2862_s4 }
   0x6   :  { %2896 = sst [smem:[#allocation7_spill]] %s2863_s5  ;;  %s2576_s5 = smov 0  }
   0x7   :  { %2897 = sst [smem:[#allocation8_spill]] %s2864_s6 }
   0x8   :  { %2898 = sst [smem:[#allocation9_spill]] %s2865_s7 }
   0x9   :  { %2899 = sst [smem:[#allocation10_spill]] %s2866_s8 }
   0xa LB: > { %s2128_s26 = sadd.s32 4294967295, %s2442_s5   ;;  %p2132_p0 = scmp.ge.s32.totalorder %s2442_s5, 1  ;;  %s2442_s5 = sphi %s2576_s5, %s34_s5  }
   0xb   : > { %p687_p1 = scmp.lt.s32.totalorder %s2442_s5, 3 }
   0xd   : > { %p688_p2 = pnand %p2132_p0, %p687_p1 }
   0xe   : > { %s2900_s6 = sld [smem:[#allocation6_spill]] (!%p688_p2)  ;;  %p763_p3 = scmp.lt.s32.totalorder (!%p688_p2), %s2128_s26, 1 }
   0xf   : > { %691 = sbr.rel (%p688_p2) target bundleno = 4205 (0x106d), region = 116  ;;  %s2901_s3 = sld [smem:[#allocation2_spill]] (!%p688_p2) }
  0x10   : > { %s2902_s1 = sld [smem:[#allocation7_spill]] (!%p688_p2)  ;;  %s2889_s27 = smov (!%p688_p2), 112  }
  0x11   : > { %s2887_s28 = smov (!%p688_p2), 96   ;;  %s2903_s7 = sld [smem:[#allocation4_spill]] (!%p688_p2) }
  0x12   : > { %s2904_s4 = sld [smem:[#allocation8_spill]] (!%p688_p2)  ;;  %s2886_s29 = smov (!%p688_p2), 16  }
  0x14   : > { %v2375_v0 = vld [vmem:[%s2900_s6 + $0x8] sm:$0xff]   ;;  %v2444_v1 = vmov 0.0   ;;  %v2376_v2 = vld [vmem:[%s2900_s6] sm:$0xff]   ;;  %vm2445_vm0 = vmmov 0   ;;  %s2914_s26 = smov (!%p763_p3, %s2128_s26), 1  ;;  %vm844_vm1 = vcmask 261120   ;;  %v789_v27 = vlaneseq }
  0x15   : > { %2232 = vmatprep.subr.bf16.mxu1 %v2444_v1  ;;  %2246 = vmatprep.subr.bf16.mxu0 %v2444_v1  ;;  %s2885_s0 = sshll.u32 %s2914_s26, 3  ;;  %vm907_vm2 = vcmask 130048   ;;  %v2448_v31 = vmov -inf   ;;  %vm1013_vm5 = vcmask 80896   ;;  %vm1017_vm6 = vcmask 74752  }
  0x16   : > { %2233 = vmatpush3.bf16.msra.mxu1 %v2375_v0  ;;  %2236 = vmatprep.mubr.msk.bf16.mxu1 %vm2445_vm0, %v2444_v1  ;;  %s767_s25 = scalar_lea.vmem %s2901_s3, %s2885_s0  ;;  %v2140_v7 = vld [vmem:[%s2902_s1] ss:$0 sm:$0xff]  ;;  %v790_v28 = vshrl.u32 %v789_v27, 7  ;;  %v793_v29 = vand.u32 127, %v789_v27  ;;  %s2449_s3 = smov 64   ;;  %vm1078_vm8 = vcmask 1044480  }
  0x17   : > { %2234 = vmatprep.subr.bf16.mxu1 %v2444_v1  ;;  %2248 = vmatprep.mubr.msk.bf16.mxu0 %vm2445_vm0, %v2444_v1  ;;  %v2606_v3 = vld [vmem:[%s767_s25] sm:$0xf]  ;;  %v2608_v4 = vld [vmem:[%s767_s25 + $0x4] sm:$0x1]  ;;  %s774_s30 = scalar_lea.vmem %s2903_s7, %s2914_s26  ;;  %vm1252_vm12 = vcmask 254976   ;;  %vm1550_vm13 = vcmask 64512  }
  0x18   : > { %v2141_v5 = vcombine.low %v2606_v3, %v2608_v4  ;;  %v791_v30 = vadd.s32 8, %v790_v28  ;;  %vm794_vm3 = vcmp.le.s32.totalorder %v793_v29, %v790_v28  ;;  %v2138_v33 = vld [vmem:[%s774_s30] ss:$0 sm:$0xff]  ;;  %s2908_s30 = smov 112   ;;  %vm1554_vm14 = vcmask 58368  }
  0x19   : > { %v2643_v32 = vsel %vm794_vm3, 0.0, %v2448_v31  ;;  %vm1616_vm3 = vcmask 1043456  }
  0x1a   : > { %2235 = vmatpush3.bf16.msra.mxu1 %v2376_v2  ;;  %vm795_vm4 = vcmp.le.s32.totalorder %v793_v29, %v791_v30  ;;  %v805_v38 = vadd.f32 %v2138_v33, %v2643_v32 }
  0x1b   : > { %2240 = vmatprep.subr.bf16.mxu1 %v2444_v1  ;;  %v2645_v34 = vsel %vm795_vm4, 0.0, %v2448_v31 }
  0x1c   : > { %v806_v39 = vadd.f32 %v2138_v33, %v2645_v34 }
  0x1d   : > { %2237 = vmatmul.mubr.msk.bf16.vlgmr.msra.gmra.mxu1 %vm844_vm1, %v2141_v5 }
  0x1e   : > { %2242 = vmatprep.mubr.msk.bf16.mxu1 %vm2445_vm0, %v2444_v1 }
  0xdd   : > { %v882_v6 = vpop.f32.mrf.mxu1 }
  0xde   : > { %v883_v10 = vadd.f32 %v2140_v7, %v882_v6 }
  0xdf   : > { %v2238_v8 = vpop.f32.mrf.mxu1 }
  0xe1   : > { %v885_v9 = vpop.f32.mrf.mxu1 }
  0xe2   : > { %v886_v11 = vadd.f32 %v2140_v7, %v885_v9 }
  0xe3   : > { %v2239_v12 = vpop.f32.mrf.mxu1 }
  0xe4   : > { %v2618_v13 = vpack.c.bf16 %v886_v11, %v883_v10  ;;  %v2355_v14 = vpack.i.bf16 %v886_v11, %v883_v10 }
  0xe6   : > { %2356 = vrot.lane.b32.xlu0 %v2355_v14, %s2889_s27  ;;  %905 = vrot.lane.b32.xlu1 %v2618_v13, %s2887_s28 }
 0x158   : > { %v2357_v15 = vpop.permute.xlu0 %2356  ;;  %v906_v16 = vpop.permute.xlu1 %905 }
 0x159   : > { %v2359_v17 = vunpack.i.h.bf16 %v2357_v15  ;;  %v2358_v18 = vunpack.i.l.bf16 %v2357_v15  ;;  %v912_v19 = vsel %vm907_vm2, %v906_v16, 0 }
 0x15a   : > { %2241 = vmatpush3.bf16.xpose.msra.mxu1 %v912_v19 }
 0x15b   : > { %v2624_v20 = vpack.c.bf16 %v2359_v17, %v2358_v18  ;;  %2252 = vmatprep.subr.bf16.mxu1 %v2444_v1 }
 0x15d   : > { %956 = vrot.lane.b32.xlu0 %v2624_v20, %s2887_s28  ;;  %s2906_s28 = sld [smem:[#allocation3_spill]] }
 0x161   : > { %2243 = vmatmul.mubr.msk.bf16.vlgmr.msra.gmra.mxu1 %vm907_vm2, %v2618_v13 }
 0x162   : > { %2254 = vmatprep.mubr.msk.bf16.mxu1 %vm2445_vm0, %v2444_v1 }
 0x1cf   : > { %v957_v21 = vpop.permute.xlu0 %956 }
 0x1d0   : > { %v962_v22 = vsel %vm907_vm2, %v957_v21, 0 }
 0x1d1   : > { %2247 = vmatpush3.bf16.xpose.msra.mxu0 %v962_v22 }
 0x1d2   : > { %2258 = vmatprep.subr.bf16.mxu0 %v2444_v1 }
 0x1d8   : > { %2249 = vmatmul.mubr.msk.bf16.vlgmr.msra.gmra.mxu0 %vm907_vm2, %v2624_v20 }
 0x1d9   : > { %2260 = vmatprep.mubr.msk.bf16.mxu0 %vm2445_vm0, %v2444_v1 }
 0x221   : > { %v948_v23 = vpop.f32.mrf.mxu1 }
 0x222   : > { %v1005_v43 = vmul.f32 0.25, %v948_v23 }
 0x223   : > { %v2244_v24 = vpop.f32.mrf.mxu1 }
 0x224   : > { %v1009_v51 = vadd.f32 %v1005_v43, %v805_v38 }
 0x225   : > { %v951_v25 = vpop.f32.mrf.mxu1 }
 0x226   : > { %v1006_v36 = vmul.f32 0.25, %v951_v25  ;;  %v1014_v52 = vsel %vm1013_vm5, %v1009_v51, -inf }
 0x227   : > { %v2245_v26 = vpop.f32.mrf.mxu1 }
 0x228   : > { %v1010_v46 = vadd.f32 %v1006_v36, %v806_v39 }
 0x22a   : > { %v1018_v50 = vsel %vm1017_vm6, %v1010_v46, -inf }
 0x298   : > { %v998_v35 = vpop.f32.mrf.mxu0 }
 0x299   : > { %v1007_v37 = vmul.f32 0.25, %v998_v35 }
 0x29a   : > { %v2250_v40 = vpop.f32.mrf.mxu0 }
 0x29b   : > { %v1011_v41 = vadd.f32 %v1007_v37, %v805_v38  ;;  %v2378_v40 = vld [vmem:[%s2904_s4 + $0x8] sm:$0xff]  }
 0x29c   : > { %v1001_v42 = vpop.f32.mrf.mxu0 }
 0x29d   : > { %v1008_v44 = vmul.f32 0.25, %v1001_v42  ;;  %v1021_v45 = vsel %vm1013_vm5, %v1011_v41, -inf }
 0x29e   : > { %v2251_v47 = vpop.f32.mrf.mxu0  ;;  %1022 = vmax.xlane.f32.xlu1 %v1021_v45 }
 0x29f   : > { %v1012_v48 = vadd.f32 %v1008_v44, %v806_v39 }
 0x2a1   : > { %v1024_v49 = vsel %vm1017_vm6, %v1012_v48, -inf }
 0x2a2   : > { %1025 = vmax.xlane.f32.xlu0 %v1024_v49  ;;  %1019 = vmax.xlane.f32.xlu1 %v1018_v50 }
 0x2a6   : > { %1015 = vmax.xlane.f32.xlu0 %v1014_v52 }
 0x327   : > { %v1023_v53 = vpop.xlane.xlu1 %1022 }
 0x328   : > { %v1029_v54 = vmax.f32 %v1023_v53, -1e+30 }
 0x32a   : > { %v1033_v55 = vsub.f32 %v1011_v41, %v1029_v54  ;;  %v2379_v41 = vld [vmem:[%s2904_s4] sm:$0xff]  }
 0x32b   : > { %v1026_v56 = vpop.xlane.xlu0 %1025  ;;  %v1020_v57 = vpop.xlane.xlu1 %1019 }
 0x32c   : > { %v1039_v58 = vmul.f32 1.442695, %v1033_v55  ;;  %v1030_v59 = vmax.f32 %v1026_v56, -1e+30  ;;  %v1028_v60 = vmax.f32 %v1020_v57, -1e+30 }
 0x32e   : > { %2392 = vpow2.f32 %v1039_v58  ;;  %v1034_v61 = vsub.f32 %v1012_v48, %v1030_v59  ;;  %v1032_v0 = vsub.f32 %v1010_v46, %v1028_v60  ;;  %v787_v58 = vunpack.c.l.bf16 %v2606_v3 }
 0x32f   : > { %v1016_v62 = vpop.xlane.xlu0 %1015 }
 0x330   : > { %v1041_v63 = vmul.f32 1.442695, %v1034_v61  ;;  %v1027_v2 = vmax.f32 %v1016_v62, -1e+30  ;;  %v1037_v6 = vmul.f32 1.442695, %v1032_v0 }
 0x332   : > { %2394 = vpow2.f32 %v1041_v63  ;;  %v1031_v5 = vsub.f32 %v1009_v51, %v1027_v2  ;;  %v788_v63 = vunpack.c.l.bf16 %v2608_v4 }
 0x334   : > { %v1035_v7 = vmul.f32 1.442695, %v1031_v5 }
 0x336   : > { %2396 = vpow2.f32 %v1035_v7 }
 0x337   : > { %2398 = vpow2.f32 %v1037_v6 }
 0x33b   : > { %v2393_v8 = vpop.eup %2392 }
 0x33c   : > { %v1049_v9 = vsel %vm1013_vm5, %v2393_v8, 0.0 }
 0x33d   : > { %1050 = vadd.xlane.f32.xlu0 %v1049_v9 }
 0x33f   : > { %v2395_v10 = vpop.eup %2394 }
 0x340   : > { %v1052_v11 = vsel %vm1017_vm6, %v2395_v10, 0.0 }
 0x341   : > { %1053 = vadd.xlane.f32.xlu1 %v1052_v11 }
 0x343   : > { %v2397_v12 = vpop.eup %2396 }
 0x344   : > { %v1043_v14 = vsel %vm1013_vm5, %v2397_v12, 0.0  ;;  %v2399_v15 = vpop.eup %2398 }
 0x345   : > { %1044 = vadd.xlane.f32.xlu1 %v1043_v14  ;;  %v1046_v16 = vsel %vm1017_vm6, %v2399_v15, 0.0 }
 0x349   : > { %1047 = vadd.xlane.f32.xlu1 %v1046_v16 }
 0x353   : > { %1123 = vrot.lane.b32.xlu0 %v2624_v20, %s2449_s3 }
 0x35a   : > { %1073 = vrot.lane.b32.xlu1 %v2618_v13, %s2449_s3  ;;  %s2905_s3 = sld [smem:[#allocation9_spill]] }
 0x360   : > { %v2149_v57 = vld [vmem:[%s2905_s3] ss:$0 sm:$0xff]  ;;  %s2135_s3 = sshll.u32 %s2914_s26, 2 }
 0x361   : > { %s771_s27 = scalar_lea.vmem %s2906_s28, %s2135_s3  ;;  %s2907_s28 = sld [smem:[#allocation10_spill]] }
 0x362   : > { %s2911_s3 = smov 16  }
 0x3c6   : > { %v1051_v17 = vpop.xlane.xlu0 %1050 }
 0x3c7   : > { %vm1057_vm7 = vcmp.gt.f32.partialorder %v1051_v17, 0.0 }
 0x3c8   : > { %v1061_v18 = vsel %vm1057_vm7, %v1051_v17, 1.0 }
 0x3c9   : > { %2400 = vrcp.f32 %v1061_v18  ;;  %v2380_v18 = vld [vmem:[%s2870_s12 + $0x8] sm:$0xff]  }
 0x3ca   : > { %v1124_v19 = vpop.permute.xlu0 %1123  ;;  %v1054_v21 = vpop.xlane.xlu1 %1053 }
 0x3cb   : > { %v1129_v22 = vsel %vm1078_vm8, %v1124_v19, 0  ;;  %vm1058_vm9 = vcmp.gt.f32.partialorder %v1054_v21, 0.0  ;;  %v2381_v19 = vld [vmem:[%s2870_s12] sm:$0xff]  }
 0x3cc   : > { %v1062_v23 = vsel %vm1058_vm9, %v1054_v21, 1.0  ;;  %2259 = vmatpush3.bf16.msra.mxu0 %v1129_v22  ;;  %v2382_v21 = vld [vmem:[%s2868_s10 + $0x8] sm:$0xff]   ;;  %v786_v22 = vld [vmem:[%s771_s27] sm:$0xf]  ;;  %s2909_s27 = sld [smem:[#allocation5_spill]] }
 0x3cd   : > { %2402 = vrcp.f32 %v1062_v23  ;;  %2272 = vmatprep.subr.bf16.mxu0 %v2444_v1  ;;  %v2383_v23 = vld [vmem:[%s2868_s10] sm:$0xff]  }
 0x3ce   : > { %v1045_v24 = vpop.xlane.xlu1 %1044 }
 0x3cf   : > { %vm1055_vm10 = vcmp.gt.f32.partialorder %v1045_v24, 0.0 }
 0x3d0   : > { %v1059_v20 = vsel %vm1055_vm10, %v1045_v24, 1.0 }
 0x3d1   : > { %2404 = vrcp.f32 %v1059_v20 }
 0x3d2   : > { %v1048_v25 = vpop.xlane.xlu1 %1047 }
 0x3d3   : > { %vm1056_vm11 = vcmp.gt.f32.partialorder %v1048_v25, 0.0 }
 0x3d4   : > { %v1060_v13 = vsel %vm1056_vm11, %v1048_v25, 1.0 }
 0x3d5   : > { %2406 = vrcp.f32 %v1060_v13 }
 0x3d6   : > { %v1074_v26 = vpop.permute.xlu1 %1073  ;;  %v2401_v28 = vpop.eup %2400 }
 0x3d7   : > { %v1080_v27 = vsel %vm1078_vm8, %v1074_v26, 0  ;;  %v1069_v30 = vmul.f32 %v2401_v28, %v2393_v8 }
 0x3d8   : > { %2253 = vmatpush3.bf16.msra.mxu1 %v1080_v27 }
 0x3d9   : > { %2264 = vmatprep.subr.bf16.mxu1 %v2444_v1 }
 0x3da   : > { %v2403_v29 = vpop.eup %2402 }
 0x3db   : > { %v1070_v31 = vmul.f32 %v2403_v29, %v2395_v10 }
 0x3dd   : > { %v1072_v33 = vpack.c.bf16 %v1070_v31, %v1069_v30  ;;  %v2153_v30 = vld [vmem:[%s2907_s28] ss:$0 sm:$0xff]  ;;  %s777_s28 = scalar_lea.vmem %s2909_s27, %s2914_s26 }
 0x3de   : > { %v2405_v35 = vpop.eup %2404 }
 0x3df   : > { %2261 = vmatmul.mubr.msk.bf16.vlgmr.msra.gmra.mxu0 %vm1013_vm5, %v1072_v33  ;;  %v1067_v37 = vmul.f32 %v2405_v35, %v2397_v12 }
 0x3e0   : > { %2276 = vmatprep.mubr.msk.bf16.mxu0 %vm2445_vm0, %v2444_v1  ;;  %2273 = vmatpush3.bf16.msra.mxu0 %v2382_v21 }
 0x3e1   : > { %2274 = vmatprep.subr.bf16.mxu0 %v2444_v1 }
 0x3e2   : > { %v2407_v36 = vpop.eup %2406 }
 0x3e3   : > { %v1068_v38 = vmul.f32 %v2407_v36, %v2399_v15  ;;  %v2154_v36 = vld [vmem:[%s2867_s9] ss:$0 sm:$0xff] }
 0x3e4   : > { %2275 = vmatpush3.bf16.msra.mxu0 %v2383_v23 }
 0x3e5   : > { %v1071_v39 = vpack.c.bf16 %v1068_v38, %v1067_v37  ;;  %2288 = vmatprep.subr.bf16.mxu0 %v2444_v1 }
 0x3e7   : > { %2255 = vmatmul.mubr.msk.bf16.vlgmr.msra.gmra.mxu1 %vm1013_vm5, %v1071_v39 }
 0x3e8   : > { %2268 = vmatprep.mubr.msk.bf16.mxu1 %vm2445_vm0, %v2444_v1  ;;  %2265 = vmatpush3.bf16.msra.mxu1 %v2378_v40 }
 0x3e9   : > { %2266 = vmatprep.subr.bf16.mxu1 %v2444_v1 }
 0x3ec   : > { %2267 = vmatpush3.bf16.msra.mxu1 %v2379_v41  ;;  %v2159_v41 = vld [vmem:[%s2871_s13] ss:$0 sm:$0xff] }
 0x3ed   : > { %2280 = vmatprep.subr.bf16.mxu1 %v2444_v1 }
 0x49f   : > { %v1165_v42 = vpop.f32.mrf.mxu0 }
 0x4a1   : > { %v2262_v43 = vpop.f32.mrf.mxu0 }
 0x4a3   : > { %v1168_v44 = vpop.f32.mrf.mxu0 }
 0x4a4   : > { %v2360_v45 = vpack.i.bf16 %v1168_v44, %v1165_v42 }
 0x4a5   : > { %v2263_v46 = vpop.f32.mrf.mxu0 }
 0x4a6   : > { %2361 = vrot.lane.b32.xlu0 %v2360_v45, %s2886_s29  ;;  %s2910_s29 = smov 96  }
 0x4a7   : > { %v1116_v47 = vpop.f32.mrf.mxu1 }
 0x4a9   : > { %v2256_v48 = vpop.f32.mrf.mxu1 }
 0x4ab   : > { %v1119_v49 = vpop.f32.mrf.mxu1 }
 0x4ad   : > { %v2257_v50 = vpop.f32.mrf.mxu1 }
 0x518   : > { %v2362_v51 = vpop.permute.xlu0 %2361 }
 0x519   : > { %v2364_v52 = vunpack.i.h.bf16 %v2362_v51  ;;  %v2363_v53 = vunpack.i.l.bf16 %v2362_v51 }
 0x51b   : > { %v1180_v54 = vsel %vm907_vm2, %v1116_v47, %v2363_v53  ;;  %v1181_v55 = vsel %vm907_vm2, %v1119_v49, %v2364_v52  ;;  %v2155_v53 = vld [vmem:[%s2869_s11] ss:$0 sm:$0xff] }
 0x51c   : > { %v1182_v56 = vpack.c.bf16 %v1181_v55, %v1180_v54 }
 0x51e   : > { %2269 = vmatmul.mubr.msk.bf16.vlgmr.msra.gmra.mxu1 %vm844_vm1, %v1182_v56 }
 0x51f   : > { %2284 = vmatprep.mubr.msk.bf16.mxu1 %vm2445_vm0, %v2444_v1  ;;  %2281 = vmatpush3.bf16.msra.mxu1 %v2380_v18 }
 0x520   : > { %2282 = vmatprep.subr.bf16.mxu1 %v2444_v1 }
 0x523   : > { %2283 = vmatpush3.bf16.msra.mxu1 %v2381_v19 }
 0x524   : > { %2294 = vmatprep.subr.bf16.mxu1 %v2444_v1 }
 0x526   : > { %2285 = vmatmul.mubr.msk.bf16.vlgmr.msra.gmra.mxu1 %vm844_vm1, %v786_v22 }
 0x527   : > { %2296 = vmatprep.mubr.msk.bf16.mxu1 %vm2445_vm0, %v2444_v1 }
 0x5de   : > { %v1238_v59 = vpop.f32.mrf.mxu1 }
 0x5df   : > { %v1239_v60 = vadd.f32 %v2149_v57, %v1238_v59 }
 0x5e0   : > { %v2270_v61 = vpop.f32.mrf.mxu1 }
 0x5e1   : > { %v1245_v62 = vadd.f32 %v1239_v60, %v787_v58 }
 0x5e2   : > { %v1241_v0 = vpop.f32.mrf.mxu1 }
 0x5e3   : > { %v1242_v2 = vadd.f32 %v2149_v57, %v1241_v0  ;;  %v1249_v5 = vsel %vm844_vm1, %v1245_v62, 0.0 }
 0x5e4   : > { %v2271_v6 = vpop.f32.mrf.mxu1  ;;  %1250 = vadd.xlane.f32.xlu0 %v1249_v5 }
 0x5e5   : > { %v1246_v7 = vadd.f32 %v1242_v2, %v788_v63 }
 0x5e6   : > { %v1421_v42 = vpop.f32.mrf.mxu1 }
 0x5e7   : > { %v1253_v8 = vsel %vm1252_vm12, %v1246_v7, 0.0  ;;  %v1422_v43 = vadd.f32 %v2159_v41, %v1421_v42 }
 0x5e8   : > { %1254 = vadd.xlane.f32.xlu1 %v1253_v8  ;;  %v2286_v44 = vpop.f32.mrf.mxu1  ;;  %v2139_v8 = vld [vmem:[%s777_s28] ss:$0 sm:$0xff]  ;;  %s2912_s28 = sshll.u32 %s2914_s26, 3 }
 0x5e9   : > { %v2733_v45 = vpack.c.bf16 %v1422_v43, %v1422_v43  ;;  %s782_s2 = scalar_lea.vmem %s2882_s24, %s2912_s28 }
 0x5ea   : > { %v1424_v46 = vpop.f32.mrf.mxu1 }
 0x5eb   : > { %v1452_v48 = vsel %vm907_vm2, %v2733_v45, 0 }
 0x5ec   : > { %v2287_v47 = vpop.f32.mrf.mxu1 }
 0x5f9   : > { %1443 = vrot.lane.b32.xlu1 %v1422_v43, %s2908_s30 }
 0x66d   : > { %v1251_v9 = vpop.xlane.xlu0 %1250 }
 0x66e   : > { %v1257_v10 = vmul.f32 0.03125, %v1251_v9 }
 0x670   : > { %v1259_v3 = vsub.f32 %v1245_v62, %v1257_v10 }
 0x671   : > { %v1255_v11 = vpop.xlane.xlu1 %1254 }
 0x672   : > { %v1258_v12 = vmul.f32 0.03125, %v1255_v11  ;;  %v1261_v14 = vmul.f32 %v1259_v3, %v1259_v3  ;;  %v814_v11 = vadd.f32 %v2139_v8, %v2643_v32 }
 0x674   : > { %v1260_v15 = vsub.f32 %v1246_v7, %v1258_v12  ;;  %v1263_v4 = vsel %vm844_vm1, %v1261_v14, 0.0 }
 0x675   : > { %1264 = vadd.xlane.f32.xlu0 %v1263_v4  ;;  %v1444_v49 = vpop.permute.xlu1 %1443  ;;  %v815_v4 = vadd.f32 %v2139_v8, %v2645_v34 }
 0x676   : > { %v1262_v16 = vmul.f32 %v1260_v15, %v1260_v15  ;;  %v2739_v50 = vpack.c.bf16 %v1444_v49, %v1444_v49 }
 0x678   : > { %v1266_v17 = vsel %vm1252_vm12, %v1262_v16, 0.0  ;;  %v1499_v51 = vsel %vm907_vm2, %v2739_v50, 0 }
 0x679   : > { %1267 = vadd.xlane.f32.xlu0 %v1266_v17  ;;  %2295 = vmatpush3.bf16.xpose.msra.mxu1 %v1499_v51 }
 0x67a   : > { %2306 = vmatprep.subr.bf16.mxu1 %v2444_v1 }
 0x6fe   : > { %v1265_v24 = vpop.xlane.xlu0 %1264 }
 0x6ff   : > { %v1269_v20 = vmul.f32 0.03125, %v1265_v24 }
 0x701   : > { %v1271_v25 = vadd.f32 1e-05, %v1269_v20 }
 0x702   : > { %v1268_v13 = vpop.xlane.xlu0 %1267 }
 0x703   : > { %2408 = vrsqrt.f32 %v1271_v25  ;;  %v1270_v26 = vmul.f32 0.03125, %v1268_v13 }
 0x705   : > { %v1272_v27 = vadd.f32 1e-05, %v1270_v26 }
 0x707   : > { %2410 = vrsqrt.f32 %v1272_v27 }
 0x710   : > { %v2409_v28 = vpop.eup %2408 }
 0x711   : > { %v1275_v29 = vmul.f32 %v2409_v28, %v1259_v3 }
 0x713   : > { %v1283_v35 = vmul.f32 %v2153_v30, %v1275_v29 }
 0x714   : > { %v2411_v31 = vpop.eup %2410 }
 0x715   : > { %v1276_v33 = vmul.f32 %v2411_v31, %v1260_v15  ;;  %v2721_v38 = vadd.f32 %v2154_v36, %v1283_v35 }
 0x717   : > { %v1284_v37 = vmul.f32 %v2153_v30, %v1276_v33 }
 0x719   : > { %v2723_v39 = vadd.f32 %v2154_v36, %v1284_v37 }
 0x71b   : > { %v1293_v40 = vpack.c.bf16 %v2723_v39, %v2721_v38 }
 0x71d   : > { %2277 = vmatmul.mubr.msk.bf16.vlgmr.msra.gmra.mxu0 %vm844_vm1, %v1293_v40 }
 0x71e   : > { %2290 = vmatprep.mubr.msk.bf16.mxu0 %vm2445_vm0, %v2444_v1  ;;  %2289 = vmatpush3.bf16.xpose.msra.mxu0 %v1452_v48 }
 0x71f   : > { %2300 = vmatprep.subr.bf16.mxu0 %v2444_v1 }
 0x7dd   : > { %v1354_v52 = vpop.f32.mrf.mxu0 }
 0x7de   : > { %v1355_v56 = vadd.f32 %v2155_v53, %v1354_v52 }
 0x7df   : > { %v2278_v54 = vpop.f32.mrf.mxu0 }
 0x7e1   : > { %v1357_v55 = vpop.f32.mrf.mxu0 }
 0x7e2   : > { %v1358_v57 = vadd.f32 %v2155_v53, %v1357_v55 }
 0x7e3   : > { %v2279_v58 = vpop.f32.mrf.mxu0 }
 0x7e4   : > { %v2365_v59 = vpack.i.bf16 %v1358_v57, %v1355_v56  ;;  %v1440_v60 = vpack.c.bf16 %v1358_v57, %v1355_v56 }
 0x7e6   : > { %2366 = vrot.lane.b32.xlu0 %v2365_v59, %s2908_s30  ;;  %2291 = vmatmul.mubr.msk.bf16.vlgmr.msra.gmra.mxu0 %vm907_vm2, %v1440_v60 }
 0x7e7   : > { %2302 = vmatprep.mubr.msk.bf16.mxu0 %vm2445_vm0, %v2444_v1 }
 0x858   : > { %v2367_v61 = vpop.permute.xlu0 %2366 }
 0x859   : > { %v2369_v62 = vunpack.i.h.bf16 %v2367_v61  ;;  %v2368_v63 = vunpack.i.l.bf16 %v2367_v61 }
 0x85b   : > { %v1441_v0 = vpack.c.bf16 %v2369_v62, %v2368_v63 }
 0x85d   : > { %2297 = vmatmul.mubr.msk.bf16.vlgmr.msra.gmra.mxu1 %vm907_vm2, %v1441_v0 }
 0x85e   : > { %2308 = vmatprep.mubr.msk.bf16.mxu1 %vm2445_vm0, %v2444_v1 }
 0x8a6   : > { %v1488_v2 = vpop.f32.mrf.mxu0 }
 0x8a7   : > { %v1542_v10 = vmul.f32 0.25, %v1488_v2 }
 0x8a8   : > { %v2292_v5 = vpop.f32.mrf.mxu0 }
 0x8a9   : > { %v1546_v19 = vadd.f32 %v1542_v10, %v814_v11 }
 0x8aa   : > { %v1491_v6 = vpop.f32.mrf.mxu0 }
 0x8ab   : > { %v1543_v16 = vmul.f32 0.25, %v1491_v6  ;;  %v1551_v24 = vsel %vm1550_vm13, %v1546_v19, -inf }
 0x8ac   : > { %v2293_v7 = vpop.f32.mrf.mxu0 }
 0x8ad   : > { %v1547_v32 = vadd.f32 %v1543_v16, %v815_v4 }
 0x8af   : > { %v1555_v20 = vsel %vm1554_vm14, %v1547_v32, -inf }
 0x91d   : > { %v1535_v9 = vpop.f32.mrf.mxu1 }
 0x91e   : > { %v1544_v3 = vmul.f32 0.25, %v1535_v9 }
 0x91f   : > { %v2298_v12 = vpop.f32.mrf.mxu1 }
 0x920   : > { %v1548_v14 = vadd.f32 %v1544_v3, %v814_v11  ;;  %v2384_v11 = vld [vmem:[%s2872_s14 + $0x8] sm:$0xff]   ;;  %v2385_v12 = vld [vmem:[%s2872_s14] sm:$0xff]  }
 0x921   : > { %v1538_v15 = vpop.f32.mrf.mxu1 }
 0x922   : > { %v1545_v17 = vmul.f32 0.25, %v1538_v15  ;;  %v1558_v18 = vsel %vm1550_vm13, %v1548_v14, -inf }
 0x923   : > { %1559 = vmax.xlane.f32.xlu1 %v1558_v18  ;;  %v2299_v21 = vpop.f32.mrf.mxu1 }
 0x924   : > { %v1549_v22 = vadd.f32 %v1545_v17, %v815_v4 }
 0x926   : > { %v1561_v23 = vsel %vm1554_vm14, %v1549_v22, -inf }
 0x927   : > { %1562 = vmax.xlane.f32.xlu0 %v1561_v23  ;;  %1552 = vmax.xlane.f32.xlu1 %v1551_v24 }
 0x92b   : > { %1556 = vmax.xlane.f32.xlu0 %v1555_v20 }
 0x9ac   : > { %v1560_v34 = vpop.xlane.xlu1 %1559 }
 0x9ad   : > { %v1566_v25 = vmax.f32 %v1560_v34, -1e+30 }
 0x9af   : > { %v1570_v13 = vsub.f32 %v1548_v14, %v1566_v25 }
 0x9b0   : > { %v1563_v26 = vpop.xlane.xlu0 %1562  ;;  %v1553_v27 = vpop.xlane.xlu1 %1552 }
 0x9b1   : > { %v1576_v28 = vmul.f32 1.442695, %v1570_v13  ;;  %v1567_v29 = vmax.f32 %v1563_v26, -1e+30  ;;  %v1564_v30 = vmax.f32 %v1553_v27, -1e+30 }
 0x9b2   : > { %v2167_v13 = vld [vmem:[%s2873_s15] ss:$0 sm:$0xff] }
 0x9b3   : > { %2412 = vpow2.f32 %v1576_v28  ;;  %v1571_v31 = vsub.f32 %v1549_v22, %v1567_v29  ;;  %v1568_v33 = vsub.f32 %v1546_v19, %v1564_v30 }
 0x9b4   : > { %v1557_v35 = vpop.xlane.xlu0 %1556 }
 0x9b5   : > { %v1578_v36 = vmul.f32 1.442695, %v1571_v31  ;;  %v1572_v37 = vmul.f32 1.442695, %v1568_v33  ;;  %v1565_v40 = vmax.f32 %v1557_v35, -1e+30 }
 0x9b7   : > { %2414 = vpow2.f32 %v1578_v36  ;;  %v1569_v41 = vsub.f32 %v1547_v32, %v1565_v40 }
 0x9b8   : > { %2416 = vpow2.f32 %v1572_v37 }
 0x9b9   : > { %v1574_v42 = vmul.f32 1.442695, %v1569_v41 }
 0x9bb   : > { %2418 = vpow2.f32 %v1574_v42 }
 0x9c0   : > { %v2413_v43 = vpop.eup %2412 }
 0x9c1   : > { %v1586_v44 = vsel %vm1550_vm13, %v2413_v43, 0.0 }
 0x9c2   : > { %1587 = vadd.xlane.f32.xlu1 %v1586_v44 }
 0x9c4   : > { %v2415_v46 = vpop.eup %2414 }
 0x9c5   : > { %v1589_v47 = vsel %vm1554_vm14, %v2415_v46, 0.0  ;;  %v2417_v48 = vpop.eup %2416 }
 0x9c6   : > { %1590 = vadd.xlane.f32.xlu0 %v1589_v47  ;;  %v1580_v49 = vsel %vm1550_vm13, %v2417_v48, 0.0 }
 0x9c8   : > { %v2419_v51 = vpop.eup %2418 }
 0x9c9   : > { %v1583_v52 = vsel %vm1554_vm14, %v2419_v51, 0.0 }
 0x9ca   : > { %1581 = vadd.xlane.f32.xlu0 %v1580_v49 }
 0x9ce   : > { %1584 = vadd.xlane.f32.xlu0 %v1583_v52  ;;  %v2388_v52 = vld [vmem:[%s2878_s20 + $0x18] sm:$0xff]  }
 0x9d3   : > { %1662 = vrot.lane.b32.xlu1 %v2739_v50, %s2910_s29 }
 0x9e4   : > { %1611 = vrot.lane.b32.xlu0 %v2733_v45, %s2910_s29 }
 0xa4b   : > { %v1588_v53 = vpop.xlane.xlu1 %1587 }
 0xa4c   : > { %vm1594_vm15 = vcmp.gt.f32.partialorder %v1588_v53, 0.0 }
 0xa4d   : > { %v1598_v54 = vsel %vm1594_vm15, %v1588_v53, 1.0 }
 0xa4e   : > { %2420 = vrcp.f32 %v1598_v54 }
 0xa4f   : > { %v1663_v55 = vpop.permute.xlu1 %1662  ;;  %v1591_v56 = vpop.xlane.xlu0 %1590 }
 0xa50   : > { %v1668_v57 = vsel %vm1616_vm3, %v1663_v55, 0  ;;  %vm1595_vm4 = vcmp.gt.f32.partialorder %v1591_v56, 0.0 }
 0xa51   : > { %v1599_v58 = vsel %vm1595_vm4, %v1591_v56, 1.0  ;;  %2307 = vmatpush3.bf16.msra.mxu1 %v1668_v57 }
 0xa52   : > { %2422 = vrcp.f32 %v1599_v58  ;;  %2320 = vmatprep.subr.bf16.mxu1 %v2444_v1 }
 0xa53   : > { %v1582_v59 = vpop.xlane.xlu0 %1581 }
 0xa54   : > { %vm1592_vm5 = vcmp.gt.f32.partialorder %v1582_v59, 0.0 }
 0xa55   : > { %v1596_v50 = vsel %vm1592_vm5, %v1582_v59, 1.0 }
 0xa56   : > { %2424 = vrcp.f32 %v1596_v50 }
 0xa57   : > { %v1585_v60 = vpop.xlane.xlu0 %1584 }
 0xa58   : > { %vm1593_vm6 = vcmp.gt.f32.partialorder %v1585_v60, 0.0 }
 0xa59   : > { %v1597_v45 = vsel %vm1593_vm6, %v1585_v60, 1.0  ;;  %v2171_v60 = vld [vmem:[%s2874_s16] ss:$0 sm:$0xff] }
 0xa5a   : > { %2426 = vrcp.f32 %v1597_v45 }
 0xa5b   : > { %v1612_v61 = vpop.permute.xlu0 %1611  ;;  %v2421_v63 = vpop.eup %2420 }
 0xa5c   : > { %v1618_v62 = vsel %vm1616_vm3, %v1612_v61, 0  ;;  %v1606_v2 = vmul.f32 %v2421_v63, %v2413_v43  ;;  %v2172_v63 = vld [vmem:[%s2875_s17] ss:$0 sm:$0xff] }
 0xa5d   : > { %2301 = vmatpush3.bf16.msra.mxu0 %v1618_v62 }
 0xa5e   : > { %2312 = vmatprep.subr.bf16.mxu0 %v2444_v1 }
 0xa5f   : > { %v2423_v0 = vpop.eup %2422 }
 0xa60   : > { %v1607_v5 = vmul.f32 %v2423_v0, %v2415_v46 }
 0xa62   : > { %v1609_v6 = vpack.c.bf16 %v1607_v5, %v1606_v2 }
 0xa63   : > { %v2425_v7 = vpop.eup %2424 }
 0xa64   : > { %2309 = vmatmul.mubr.msk.bf16.vlgmr.msra.gmra.mxu1 %vm1550_vm13, %v1609_v6  ;;  %v1604_v9 = vmul.f32 %v2425_v7, %v2417_v48  ;;  %v2389_v7 = vld [vmem:[%s2878_s20 + $0x10] sm:$0xff]  }
 0xa65   : > { %2324 = vmatprep.mubr.msk.bf16.mxu1 %vm2445_vm0, %v2444_v1 }
 0xa67   : > { %v2427_v8 = vpop.eup %2426 }
 0xa68   : > { %v1605_v10 = vmul.f32 %v2427_v8, %v2419_v51  ;;  %v2387_v51 = vld [vmem:[%s2876_s18] sm:$0xff]   ;;  %v2390_v8 = vld [vmem:[%s2878_s20 + $0x8] sm:$0xff]  }
 0xa6a   : > { %v1608_v3 = vpack.c.bf16 %v1605_v10, %v1604_v9  ;;  %v2391_v9 = vld [vmem:[%s2878_s20] sm:$0xff]  }
 0xa6b   : > { %v2173_v10 = vld [vmem:[%s2877_s19] ss:$0 sm:$0xff] }
 0xa6c   : > { %2303 = vmatmul.mubr.msk.bf16.vlgmr.msra.gmra.mxu0 %vm1550_vm13, %v1608_v3 }
 0xa6d   : > { %2316 = vmatprep.mubr.msk.bf16.mxu0 %vm2445_vm0, %v2444_v1  ;;  %2313 = vmatpush3.bf16.msra.mxu0 %v2384_v11 }
 0xa6e   : > { %2314 = vmatprep.subr.bf16.mxu0 %v2444_v1 }
 0xa71   : > { %2315 = vmatpush3.bf16.msra.mxu0 %v2385_v12 }
 0xa72   : > { %2328 = vmatprep.subr.bf16.mxu0 %v2444_v1 }
 0xb24   : > { %v1704_v14 = vpop.f32.mrf.mxu1 }
 0xb26   : > { %v2310_v15 = vpop.f32.mrf.mxu1 }
 0xb28   : > { %v1707_v4 = vpop.f32.mrf.mxu1 }
 0xb29   : > { %v2370_v16 = vpack.i.bf16 %v1707_v4, %v1704_v14 }
 0xb2a   : > { %v2311_v17 = vpop.f32.mrf.mxu1 }
 0xb2b   : > { %2371 = vrot.lane.b32.xlu1 %v2370_v16, %s2911_s3 }
 0xb2c   : > { %v1654_v18 = vpop.f32.mrf.mxu0 }
 0xb2e   : > { %v2304_v19 = vpop.f32.mrf.mxu0 }
 0xb30   : > { %v1657_v21 = vpop.f32.mrf.mxu0 }
 0xb32   : > { %v2305_v22 = vpop.f32.mrf.mxu0 }
 0xb9d   : > { %v2372_v23 = vpop.permute.xlu1 %2371 }
 0xb9e   : > { %v2374_v24 = vunpack.i.h.bf16 %v2372_v23  ;;  %v2373_v32 = vunpack.i.l.bf16 %v2372_v23 }
 0xba0   : > { %v1719_v20 = vsel %vm907_vm2, %v1654_v18, %v2373_v32  ;;  %v1720_v34 = vsel %vm907_vm2, %v1657_v21, %v2374_v24  ;;  %vm2041_vm2 = vcmask 253952  }
 0xba1   : > { %v1721_v25 = vpack.c.bf16 %v1720_v34, %v1719_v20 }
 0xba3   : > { %2317 = vmatmul.mubr.msk.bf16.vlgmr.msra.gmra.mxu0 %vm844_vm1, %v1721_v25 }
 0xba4   : > { %2336 = vmatprep.mubr.msk.bf16.mxu0 %vm2445_vm0, %v2444_v1  ;;  %2329 = vmatpush3.bf16.msra.mxu0 %v2388_v52  ;;  %vm1940_vm0 = vcmask 523264  }
 0xba5   : > { %2330 = vmatprep.subr.bf16.mxu0 %v2444_v1 }
 0xba8   : > { %2331 = vmatpush3.bf16.msra.mxu0 %v2389_v7 }
 0xba9   : > { %2332 = vmatprep.subr.bf16.mxu0 %v2444_v1 }
 0xbac   : > { %2333 = vmatpush3.bf16.msra.mxu0 %v2390_v8 }
 0xbad   : > { %2334 = vmatprep.subr.bf16.mxu0 %v2444_v1 }
 0xbb0   : > { %2335 = vmatpush3.bf16.msra.mxu0 %v2391_v9 }
 0xc63   : > { %v1777_v26 = vpop.f32.mrf.mxu0 }
 0xc64   : > { %v1778_v27 = vadd.f32 %v2167_v13, %v1777_v26 }
 0xc65   : > { %v2318_v28 = vpop.f32.mrf.mxu0 }
 0xc66   : > { %v1784_v29 = vadd.f32 %v1778_v27, %v2721_v38 }
 0xc67   : > { %v1780_v30 = vpop.f32.mrf.mxu0 }
 0xc68   : > { %v1781_v31 = vadd.f32 %v2167_v13, %v1780_v30  ;;  %v1788_v33 = vsel %vm844_vm1, %v1784_v29, 0.0 }
 0xc69   : > { %1789 = vadd.xlane.f32.xlu1 %v1788_v33  ;;  %v2319_v35 = vpop.f32.mrf.mxu0 }
 0xc6a   : > { %v1785_v36 = vadd.f32 %v1781_v31, %v2723_v39  ;;  %v2386_v39 = vld [vmem:[%s2876_s18 + $0x8] sm:$0xff]  }
 0xc6b   : > { %2321 = vmatpush3.bf16.msra.mxu1 %v2386_v39 }
 0xc6c   : > { %v1791_v37 = vsel %vm1252_vm12, %v1785_v36, 0.0  ;;  %2322 = vmatprep.subr.bf16.mxu1 %v2444_v1  ;;  %v2177_v1 = vld [vmem:[%s2879_s21] ss:$0 sm:$0xff] }
 0xc6d   : > { %1792 = vadd.xlane.f32.xlu0 %v1791_v37 }
 0xc6f   : > { %2323 = vmatpush3.bf16.msra.mxu1 %v2387_v51 }
 0xcf2   : > { %v1790_v40 = vpop.xlane.xlu1 %1789 }
 0xcf3   : > { %v1794_v41 = vmul.f32 0.03125, %v1790_v40 }
 0xcf5   : > { %v1796_v42 = vsub.f32 %v1784_v29, %v1794_v41 }
 0xcf6   : > { %v1793_v43 = vpop.xlane.xlu0 %1792 }
 0xcf7   : > { %v1795_v44 = vmul.f32 0.03125, %v1793_v43  ;;  %v1798_v46 = vmul.f32 %v1796_v42, %v1796_v42 }
 0xcf9   : > { %v1797_v47 = vsub.f32 %v1785_v36, %v1795_v44  ;;  %v1800_v38 = vsel %vm844_vm1, %v1798_v46, 0.0 }
 0xcfa   : > { %1801 = vadd.xlane.f32.xlu1 %v1800_v38  ;;  %v2183_v38 = vld [vmem:[%s2880_s22] ss:$0 sm:$0xff] }
 0xcfb   : > { %v1799_v48 = vmul.f32 %v1797_v47, %v1797_v47 }
 0xcfd   : > { %v1803_v49 = vsel %vm1252_vm12, %v1799_v48, 0.0 }
 0xcfe   : > { %1804 = vadd.xlane.f32.xlu1 %v1803_v49  ;;  %v2184_v49 = vld [vmem:[%s2881_s23] ss:$0 sm:$0xff] }
 0xd83   : > { %v1802_v53 = vpop.xlane.xlu1 %1801 }
 0xd84   : > { %v1806_v54 = vmul.f32 0.03125, %v1802_v53 }
 0xd86   : > { %v1808_v55 = vadd.f32 1e-05, %v1806_v54 }
 0xd87   : > { %v1805_v56 = vpop.xlane.xlu1 %1804 }
 0xd88   : > { %2428 = vrsqrt.f32 %v1808_v55  ;;  %v1807_v57 = vmul.f32 0.03125, %v1805_v56 }
 0xd8a   : > { %v1809_v58 = vadd.f32 1e-05, %v1807_v57 }
 0xd8c   : > { %2430 = vrsqrt.f32 %v1809_v58 }
 0xd95   : > { %v2429_v59 = vpop.eup %2428 }
 0xd96   : > { %v1812_v50 = vmul.f32 %v2429_v59, %v1796_v42 }
 0xd98   : > { %v1820_v62 = vmul.f32 %v2171_v60, %v1812_v50 }
 0xd99   : > { %v2431_v45 = vpop.eup %2430 }
 0xd9a   : > { %v1813_v61 = vmul.f32 %v2431_v45, %v1797_v47  ;;  %v1828_v2 = vadd.f32 %v2172_v63, %v1820_v62 }
 0xd9c   : > { %v1821_v0 = vmul.f32 %v2171_v60, %v1813_v61 }
 0xd9e   : > { %v1829_v5 = vadd.f32 %v2172_v63, %v1821_v0 }
 0xda0   : > { %v1844_v6 = vpack.c.bf16 %v1829_v5, %v1828_v2 }
 0xda2   : > { %2325 = vmatmul.mubr.msk.bf16.vlgmr.msra.gmra.mxu1 %vm844_vm1, %v1844_v6 }
 0xe62   : > { %v1900_v3 = vpop.f32.mrf.mxu1 }
 0xe63   : > { %v1901_v12 = vadd.f32 %v2173_v10, %v1900_v3 }
 0xe64   : > { %v2326_v11 = vpop.f32.mrf.mxu1 }
 0xe65   : > { %v1907_v16 = vmax.f32 %v1901_v12, 0.0 }
 0xe66   : > { %v1903_v14 = vpop.f32.mrf.mxu1 }
 0xe67   : > { %v1904_v15 = vadd.f32 %v2173_v10, %v1903_v14 }
 0xe68   : > { %v2327_v4 = vpop.f32.mrf.mxu1 }
 0xe69   : > { %v1908_v17 = vmax.f32 %v1904_v15, 0.0 }
 0xe6b   : > { %v1909_v18 = vpack.c.bf16 %v1908_v17, %v1907_v16 }
 0xe6d   : > { %2337 = vmatmul.mubr.msk.bf16.vlgmr.msra.gmra.mxu0 %vm1940_vm0, %v1909_v18 }
 0xf2d   : > { %v1978_v19 = vpop.f32.mrf.mxu0 }
 0xf2e   : > { %v1979_v21 = vadd.f32 %v2177_v1, %v1978_v19 }
 0xf2f   : > { %v2338_v22 = vpop.f32.mrf.mxu0 }
 0xf30   : > { %v1985_v23 = vadd.f32 %v1979_v21, %v1828_v2 }
 0xf31   : > { %v1981_v24 = vpop.f32.mrf.mxu0 }
 0xf32   : > { %v1982_v32 = vadd.f32 %v2177_v1, %v1981_v24  ;;  %v1989_v20 = vsel %vm844_vm1, %v1985_v23, 0.0 }
 0xf33   : > { %1990 = vadd.xlane.f32.xlu0 %v1989_v20  ;;  %v2339_v34 = vpop.f32.mrf.mxu0 }
 0xf34   : > { %v1986_v25 = vadd.f32 %v1982_v32, %v1829_v5 }
 0xf36   : > { %v1992_v13 = vsel %vm1252_vm12, %v1986_v25, 0.0 }
 0xf37   : > { %1993 = vadd.xlane.f32.xlu1 %v1992_v13 }
 0xfbc   : > { %v1991_v26 = vpop.xlane.xlu0 %1990 }
 0xfbd   : > { %v1995_v27 = vmul.f32 0.03125, %v1991_v26 }
 0xfbf   : > { %v1997_v28 = vsub.f32 %v1985_v23, %v1995_v27 }
 0xfc0   : > { %v1994_v29 = vpop.xlane.xlu1 %1993 }
 0xfc1   : > { %v1996_v30 = vmul.f32 0.03125, %v1994_v29  ;;  %v1999_v31 = vmul.f32 %v1997_v28, %v1997_v28 }
 0xfc3   : > { %v1998_v33 = vsub.f32 %v1986_v25, %v1996_v30  ;;  %v2001_v35 = vsel %vm844_vm1, %v1999_v31, 0.0  ;;  %vm2039_vm1 = vcmask 257024  }
 0xfc4   : > { %2002 = vadd.xlane.f32.xlu0 %v2001_v35 }
 0xfc5   : > { %v2000_v36 = vmul.f32 %v1998_v33, %v1998_v33 }
 0xfc7   : > { %v2004_v37 = vsel %vm1252_vm12, %v2000_v36, 0.0 }
 0xfc8   : > { %2005 = vadd.xlane.f32.xlu1 %v2004_v37 }
0x104d   : > { %v2003_v40 = vpop.xlane.xlu0 %2002 }
0x104e   : > { %v2007_v41 = vmul.f32 0.03125, %v2003_v40 }
0x1050   : > { %v2009_v42 = vadd.f32 1e-05, %v2007_v41 }
0x1051   : > { %v2006_v43 = vpop.xlane.xlu1 %2005 }
0x1052   : > { %2432 = vrsqrt.f32 %v2009_v42  ;;  %v2008_v44 = vmul.f32 0.03125, %v2006_v43 }
0x1054   : > { %v2010_v46 = vadd.f32 1e-05, %v2008_v44 }
0x1056   : > { %2434 = vrsqrt.f32 %v2010_v46 }
0x105f   : > { %v2433_v47 = vpop.eup %2432 }
0x1060   : > { %v2013_v48 = vmul.f32 %v2433_v47, %v1997_v28 }
0x1062   : > { %v2021_v39 = vmul.f32 %v2183_v38, %v2013_v48 }
0x1063   : > { %v2435_v51 = vpop.eup %2434 }
0x1064   : > { %v2029_v52 = vadd.f32 %v2184_v49, %v2021_v39  ;;  %v2014_v53 = vmul.f32 %v2435_v51, %v1998_v33 }
0x1066   : > { %v2191_v54 = vpack.c.bf16 %v2029_v52, %v2029_v52  ;;  %v2022_v55 = vmul.f32 %v2183_v38, %v2014_v53 }
0x1068   : > { %2040 = vst.msk [vmem:[%s782_s2] sm:$0xf] %vm2039_vm1, %v2191_v54  ;;  %v2030_v56 = vadd.f32 %v2184_v49, %v2022_v55 }
0x106a   : > { %v2192_v57 = vpack.c.bf16 %v2030_v56, %v2030_v56 }
0x106c   : > { %2042 = vst.msk [vmem:[%s782_s2 + $0x4] sm:$0x1] %vm2041_vm2, %v2192_v57 }
0x106d PF: > { %s34_s5 = sadd.s32 1, %s2442_s5  }
0x106e   : > { %p31_p4 = scmp.ge.s32.totalorder %s34_s5, 4  }
0x1070   :  { %33 = sbr.rel (!%p31_p4) target bundleno = 10 (0xa), region = 155 }

</bundles_post_ra>
